<compile_context>
chip_gen: v6e
topology: v6e:2x2x1
jax: 0.10.0
libtpu: 0.0.40
codegen_flags: <defaults>
</compile_context>

<pallas_src>
import functools

import jax
import jax.numpy as jnp
from jax.experimental import pallas as pl
from jax.experimental.pallas import tpu as pltpu


def _focal_kernel(x_ref, y_ref, a_ref, o_ref, *, gamma, ignore_index, n_rows,
                  tile, use_alpha, mask_rows):
    x = x_ref[...].astype(jnp.float32)          # (T, C) logits (upcast in VMEM only)
    y = y_ref[...]                              # (T, 1) int32 labels
    t, c = x.shape

    # Valid rows: label != ignore_index, and (only on a ragged last tile) inside
    # the unpadded row range.
    valid = y != ignore_index                                          # (T, 1) bool
    if mask_rows:
        row_ids = (jax.lax.broadcasted_iota(jnp.int32, (t, 1), 0)
                   + pl.program_id(0) * tile)
        valid = jnp.logical_and(valid, row_ids < n_rows)

    # Numerically-stable log_softmax over the class axis.
    m = jnp.max(x, axis=-1, keepdims=True)
    lse = jnp.log(jnp.sum(jnp.exp(x - m), axis=-1, keepdims=True)) + m
    log_p = x - lse                                                    # (T, C)

    # Gather log_p[row, y[row]] (and alpha[y[row]]) via one-hot select; no gather op.
    cls = jax.lax.broadcasted_iota(jnp.int32, (t, c), 1)
    hit = cls == y                                                     # (T, C) bool
    log_pt = jnp.sum(jnp.where(hit, log_p, 0.0), axis=-1, keepdims=True)  # (T, 1)

    pt = jnp.exp(log_pt)
    q = jnp.maximum(1.0 - pt, 0.0)

    # focal term; integer-gamma fast path avoids jnp.power's exp+log on the EUP.
    if gamma == 0.0:
        focal = jnp.ones_like(q)            # (1-pt)**0 == 1, incl. pt == 1
    elif float(gamma).is_integer() and 0 < gamma <= 8:
        focal = q
        for _ in range(int(gamma) - 1):
            focal = focal * q
    else:
        focal = jnp.power(q, gamma)

    neg_w_logpt = -log_pt                  # NLLLoss(weight=alpha, reduction='none')
    if use_alpha:
        alpha = a_ref[...].astype(jnp.float32)                         # (1, C)
        alpha_y = jnp.sum(jnp.where(hit, alpha, 0.0), axis=-1, keepdims=True)
        neg_w_logpt = alpha_y * neg_w_logpt

    # select (not multiply) so garbage from padded / ignored rows never leaks NaNs
    loss = jnp.where(valid, focal * neg_w_logpt, 0.0)

    s = jnp.sum(loss)
    cnt = jnp.sum(valid.astype(jnp.float32))

    # Per-tile partial output block: lane 0 = sum(loss), lane 1 = n_valid, rest 0.
    lane = jax.lax.broadcasted_iota(jnp.int32, o_ref.shape, 2)
    o_ref[...] = jnp.where(lane == 0, s, jnp.where(lane == 1, cnt, 0.0))


def _choose_tile(n_rows, n_classes):
    """Row tile sized by lane-padded f32 working-set footprint (~2 MiB per (T,C)
    temp), multiple of 8 sublanes, capped at 2048 rows."""
    if n_rows < 8:
        return max(n_rows, 1)
    padded_c = max(128, ((n_classes + 127) // 128) * 128)
    rows = (2 * 1024 * 1024) // (padded_c * 4)
    rows = min(max(rows, 8), 2048, n_rows)
    return max(8, (rows // 8) * 8)


def focal_loss(x, y, alpha=None, gamma=0.0, reduction='mean', ignore_index=-100):
    """Pallas FocalLoss forward. x: (..., C) float logits, y: (...) int labels."""
    if reduction not in ('mean', 'sum'):
        # TODO(synk): reduction='none' returns a dynamically-shaped (filtered)
        # per-element loss vector; no clean static-shape Pallas equivalent.
        raise ValueError("Only 'mean' and 'sum' reductions are supported.")

    c = x.shape[-1]
    x2 = x.reshape(-1, c)                       # keep HBM dtype; no host upcast/pad
    y2 = y.reshape(-1, 1).astype(jnp.int32)
    n = x2.shape[0]
    if n == 0:
        return jnp.float32(0.0)

    use_alpha = alpha is not None
    if use_alpha:
        alpha_arr = jnp.asarray(alpha, jnp.float32).reshape(1, c)
    else:
        alpha_arr = jnp.ones((1, c), jnp.float32)   # passed but never read

    tile = _choose_tile(n, c)
    grid = pl.cdiv(n, tile)
    mask_rows = (n % tile) != 0

    kernel = functools.partial(
        _focal_kernel,
        gamma=float(gamma),
        ignore_index=int(ignore_index),
        n_rows=n,
        tile=tile,
        use_alpha=use_alpha,
        mask_rows=mask_rows,
    )

    bytes_accessed = (x2.size * jnp.dtype(x2.dtype).itemsize
                      + y2.size * 4 + c * 4 + grid * 128 * 4)
    cost = pl.CostEstimate(
        flops=int(8 * n * c + 16 * n),
        transcendentals=int(n * (c + 2)),
        bytes_accessed=int(bytes_accessed),
    )

    partials = pl.pallas_call(
        kernel,
        out_shape=jax.ShapeDtypeStruct((grid, 1, 128), jnp.float32),
        grid_spec=pltpu.PrefetchScalarGridSpec(
            num_scalar_prefetch=0,
            grid=(grid,),
            in_specs=[
                pl.BlockSpec((tile, c), lambda i: (i, 0)),   # logits tile
                pl.BlockSpec((tile, 1), lambda i: (i, 0)),   # labels tile
                pl.BlockSpec((1, c), lambda i: (0, 0)),      # alpha (broadcast)
            ],
            out_specs=pl.BlockSpec((1, 1, 128), lambda i: (i, 0, 0)),
        ),
        compiler_params=pltpu.CompilerParams(
            dimension_semantics=("parallel",),               # megacore-shardable
            vmem_limit_bytes=48 * 1024 * 1024,
        ),
        cost_estimate=cost,
    )(x2, y2, alpha_arr)

    totals = jnp.sum(partials, axis=(0, 1))    # (128,): [sum_loss, n_valid, 0, ...]
    s, cnt = totals[0], totals[1]
    if reduction == 'mean':
        return jnp.where(cnt > 0, s / jnp.maximum(cnt, 1.0), jnp.float32(0.0))
    return s


def focal_loss_ref(x, y, alpha, gamma, reduction, ignore_index):
    """Pure-JAX reference mirroring the PyTorch code (masked, static shapes)."""
    c = x.shape[-1]
    x2 = x.reshape(-1, c).astype(jnp.float32)
    y2 = y.reshape(-1)
    mask = y2 != ignore_index
    y_safe = jnp.where(mask, y2, 0)
    log_p = jax.nn.log_softmax(x2, axis=-1)
    log_pt = jnp.take_along_axis(log_p, y_safe[:, None], axis=-1)[:, 0]
    a = alpha[y_safe] if alpha is not None else 1.0
    ce = -a * log_pt
    pt = jnp.exp(log_pt)
    loss = jnp.where(mask, ((1.0 - pt) ** gamma) * ce, 0.0)
    cnt = jnp.sum(mask)
    if reduction == 'mean':
        return jnp.where(cnt > 0, jnp.sum(loss) / jnp.maximum(cnt, 1), 0.0)
    return jnp.sum(loss)


if __name__ == "__main__":
    key = jax.random.PRNGKey(0)
    kx, ky, km, kx2, ky2 = jax.random.split(key, 5)

    # Case 1: (B, H, W, C) logits, mean reduction, gamma=2 (integer fast path), alpha.
    B, H, W, C = 2, 16, 16, 4
    x = jax.random.normal(kx, (B, H, W, C), dtype=jnp.float32)
    y = jax.random.randint(ky, (B, H, W), 0, C, dtype=jnp.int32)
    y = jnp.where(jax.random.uniform(km, (B, H, W)) < 0.1, -100, y)
    alpha = jnp.array([0.1, 0.2, 0.3, 0.4], dtype=jnp.float32)

    out1 = jax.block_until_ready(
        focal_loss(x, y, alpha=alpha, gamma=2.0, reduction='mean', ignore_index=-100))
    ref1 = focal_loss_ref(x, y, alpha, 2.0, 'mean', -100)
    assert jnp.allclose(out1, ref1, atol=1e-5, rtol=1e-5), (out1, ref1)

    # Case 2: ragged row count (not a multiple of the tile), sum reduction,
    # non-integer gamma (jnp.power path), no alpha (static no-weight path).
    N2, C2 = 63, 4
    x_r = jax.random.normal(kx2, (N2, C2), dtype=jnp.float32)
    y_r = jax.random.randint(ky2, (N2,), 0, C2, dtype=jnp.int32)
    out2 = jax.block_until_ready(
        focal_loss(x_r, y_r, alpha=None, gamma=1.5, reduction='sum', ignore_index=-100))
    ref2 = focal_loss_ref(x_r, y_r, None, 1.5, 'sum', -100)
    assert jnp.allclose(out2, ref2, atol=1e-5, rtol=1e-5), (out2, ref2)

    # Case 3: every label ignored -> loss is exactly 0.0 (matches reference).
    y_ign = jnp.full((B, H, W), -100, dtype=jnp.int32)
    out3 = jax.block_until_ready(
        focal_loss(x, y_ign, alpha=alpha, gamma=2.0, reduction='mean', ignore_index=-100))
    assert jnp.allclose(out3, 0.0, atol=1e-6), out3

    print("KERNEL_OK")
</pallas_src>

<mosaic_0001>
module attributes {stable_mosaic.version = 11 : i64} {
  func.func @_focal_kernel(%arg0: i32, %arg1: memref<512x4xf32, #tpu.memory_space<vmem>>, %arg2: memref<512x1xi32, #tpu.memory_space<vmem>>, %arg3: memref<1x4xf32, #tpu.memory_space<vmem>>, %arg4: memref<1x1x128xf32, #tpu.memory_space<vmem>>) attributes {dimension_semantics = [#tpu.dimension_semantics<parallel>], iteration_bounds = array<i64: 1>, scalar_prefetch = 0 : i64, scratch_operands = 0 : i64, tpu.core_type = #tpu.core_type<tc>, window_params = [{transform_indices = @transform_0, window_bounds = array<i64: 512, 4>}, {transform_indices = @transform_1, window_bounds = array<i64: 512, 1>}, {pipeline_mode = #tpu.pipeline_mode<synchronous>, transform_indices = @transform_2, window_bounds = array<i64: 1, 4>}, {transform_indices = @transform_3, window_bounds = array<i64: 1, 1, 128>}]} {
    %c0 = arith.constant 0 : index
    %c0_0 = arith.constant 0 : index
    %0 = vector.load %arg1[%c0, %c0_0] : memref<512x4xf32, #tpu.memory_space<vmem>>, vector<512x4xf32>
    %c0_1 = arith.constant 0 : index
    %c0_2 = arith.constant 0 : index
    %1 = vector.load %arg2[%c0_1, %c0_2] : memref<512x1xi32, #tpu.memory_space<vmem>>, vector<512x1xi32>
    %c-100_i32 = arith.constant -100 : i32
    %2 = vector.broadcast %c-100_i32 : i32 to vector<512x1xi32>
    %3 = arith.cmpi ne, %1, %2 : vector<512x1xi32>
    %cst = arith.constant dense<0xFF800000> : vector<512xf32>
    %4 = vector.multi_reduction <maximumf>, %0, %cst [1] : vector<512x4xf32> to vector<512xf32>
    %5 = vector.shape_cast %4 : vector<512xf32> to vector<512x1xf32>
    %6 = vector.broadcast %5 : vector<512x1xf32> to vector<512x4xf32>
    %7 = arith.subf %0, %6 : vector<512x4xf32>
    %8 = math.exp %7 : vector<512x4xf32>
    %cst_3 = arith.constant dense<0.000000e+00> : vector<512xf32>
    %9 = vector.multi_reduction <add>, %8, %cst_3 [1] : vector<512x4xf32> to vector<512xf32>
    %10 = vector.shape_cast %9 : vector<512xf32> to vector<512x1xf32>
    %11 = math.log %10 : vector<512x1xf32>
    %12 = arith.addf %11, %5 : vector<512x1xf32>
    %13 = vector.broadcast %12 : vector<512x1xf32> to vector<512x4xf32>
    %14 = arith.subf %0, %13 : vector<512x4xf32>
    %15 = tpu.iota {dimensions = array<i32: 1>} : vector<512x4xi32>
    %16 = vector.broadcast %1 : vector<512x1xi32> to vector<512x4xi32>
    %17 = arith.cmpi eq, %15, %16 : vector<512x4xi32>
    %cst_4 = arith.constant 0.000000e+00 : f32
    %18 = vector.broadcast %cst_4 : f32 to vector<512x4xf32>
    %19 = arith.select %17, %14, %18 : vector<512x4xi1>, vector<512x4xf32>
    %cst_5 = arith.constant dense<0.000000e+00> : vector<512xf32>
    %20 = vector.multi_reduction <add>, %19, %cst_5 [1] : vector<512x4xf32> to vector<512xf32>
    %21 = vector.shape_cast %20 : vector<512xf32> to vector<512x1xf32>
    %22 = math.exp %21 : vector<512x1xf32>
    %cst_6 = arith.constant 1.000000e+00 : f32
    %23 = vector.broadcast %cst_6 : f32 to vector<512x1xf32>
    %24 = arith.subf %23, %22 : vector<512x1xf32>
    %cst_7 = arith.constant 0.000000e+00 : f32
    %25 = vector.broadcast %cst_7 : f32 to vector<512x1xf32>
    %26 = arith.maximumf %24, %25 : vector<512x1xf32>
    %27 = arith.mulf %26, %26 : vector<512x1xf32>
    %cst_8 = arith.constant 0.000000e+00 : f32
    %28 = vector.broadcast %cst_8 : f32 to vector<512x1xf32>
    %29 = arith.subf %28, %21 : vector<512x1xf32>
    %c0_9 = arith.constant 0 : index
    %c0_10 = arith.constant 0 : index
    %30 = vector.load %arg3[%c0_9, %c0_10] : memref<1x4xf32, #tpu.memory_space<vmem>>, vector<1x4xf32>
    %cst_11 = arith.constant 0.000000e+00 : f32
    %31 = vector.shape_cast %30 : vector<1x4xf32> to vector<1x4xf32>
    %32 = vector.broadcast %31 : vector<1x4xf32> to vector<512x4xf32>
    %33 = vector.broadcast %cst_11 : f32 to vector<512x4xf32>
    %34 = arith.select %17, %32, %33 : vector<512x4xi1>, vector<512x4xf32>
    %cst_12 = arith.constant dense<0.000000e+00> : vector<512xf32>
    %35 = vector.multi_reduction <add>, %34, %cst_12 [1] : vector<512x4xf32> to vector<512xf32>
    %36 = vector.shape_cast %35 : vector<512xf32> to vector<512x1xf32>
    %37 = arith.mulf %36, %29 : vector<512x1xf32>
    %38 = arith.mulf %27, %37 : vector<512x1xf32>
    %cst_13 = arith.constant 0.000000e+00 : f32
    %39 = vector.broadcast %cst_13 : f32 to vector<512x1xf32>
    %40 = arith.select %3, %38, %39 : vector<512x1xi1>, vector<512x1xf32>
    %41 = vector.shape_cast %40 : vector<512x1xf32> to vector<1x512x1xf32>
    %cst_14 = arith.constant dense<0.000000e+00> : vector<1xf32>
    %42 = vector.multi_reduction <add>, %41, %cst_14 [1, 2] : vector<1x512x1xf32> to vector<1xf32>
    %43 = vector.shape_cast %42 : vector<1xf32> to vector<1x1x1xf32>
    %44 = vector.extract %43[0, 0, 0] : f32 from vector<1x1x1xf32>
    %45 = arith.extui %3 : vector<512x1xi1> to vector<512x1xi32>
    %46 = arith.sitofp %45 : vector<512x1xi32> to vector<512x1xf32>
    %47 = vector.shape_cast %46 : vector<512x1xf32> to vector<1x512x1xf32>
    %cst_15 = arith.constant dense<0.000000e+00> : vector<1xf32>
    %48 = vector.multi_reduction <add>, %47, %cst_15 [1, 2] : vector<1x512x1xf32> to vector<1xf32>
    %49 = vector.shape_cast %48 : vector<1xf32> to vector<1x1x1xf32>
    %50 = vector.extract %49[0, 0, 0] : f32 from vector<1x1x1xf32>
    %51 = tpu.iota {dimensions = array<i32: 2>} : vector<1x1x128xi32>
    %c0_i32 = arith.constant 0 : i32
    %52 = vector.broadcast %c0_i32 : i32 to vector<1x1x128xi32>
    %53 = arith.cmpi eq, %51, %52 : vector<1x1x128xi32>
    %c1_i32 = arith.constant 1 : i32
    %54 = vector.broadcast %c1_i32 : i32 to vector<1x1x128xi32>
    %55 = arith.cmpi eq, %51, %54 : vector<1x1x128xi32>
    %cst_16 = arith.constant 0.000000e+00 : f32
    %56 = vector.broadcast %50 : f32 to vector<1x1x128xf32>
    %57 = vector.broadcast %cst_16 : f32 to vector<1x1x128xf32>
    %58 = arith.select %55, %56, %57 : vector<1x1x128xi1>, vector<1x1x128xf32>
    %59 = vector.broadcast %44 : f32 to vector<1x1x128xf32>
    %60 = arith.select %53, %59, %58 : vector<1x1x128xi1>, vector<1x1x128xf32>
    %c0_17 = arith.constant 0 : index
    %c0_18 = arith.constant 0 : index
    %c0_19 = arith.constant 0 : index
    %61 = vector.load %arg4[%c0_17, %c0_18, %c0_19] : memref<1x1x128xf32, #tpu.memory_space<vmem>>, vector<1x1x128xf32>
    tpu.vector_store %arg4[%c0_17, %c0_18, %c0_19], %60 {strides = array<i32>} : memref<1x1x128xf32, #tpu.memory_space<vmem>>, vector<1x1x128xf32>,
    return
  }
  func.func @transform_0(%arg0: i32) -> (i32, i32) {
    %c0_i32 = arith.constant 0 : i32
    %c0_i32_0 = arith.constant 0 : i32
    return %arg0, %c0_i32 : i32, i32
  }
  func.func @transform_1(%arg0: i32) -> (i32, i32) {
    %c0_i32 = arith.constant 0 : i32
    %c0_i32_0 = arith.constant 0 : i32
    return %arg0, %c0_i32 : i32, i32
  }
  func.func @transform_2(%arg0: i32) -> (i32, i32) {
    %c0_i32 = arith.constant 0 : i32
    %c0_i32_0 = arith.constant 0 : i32
    %c0_i32_1 = arith.constant 0 : i32
    return %c0_i32, %c0_i32_0 : i32, i32
  }
  func.func @transform_3(%arg0: i32) -> (i32, i32, i32) {
    %c0_i32 = arith.constant 0 : i32
    %c0_i32_0 = arith.constant 0 : i32
    %c0_i32_1 = arith.constant 0 : i32
    return %arg0, %c0_i32, %c0_i32_0 : i32, i32, i32
  }
}

</mosaic_0001>

<bundles_post_ra>
// kernel: tpu_custom_call.1
= control target key start
LH: loop header
LB: loop body
LE: loop exit
PB: predicated region body
PF: predicated region fallthrough
CT: control target
= control target key end

     0   :  { %vm207_vm0 = vcmask 31744   ;;  %s7102_s0 = inlined_call_operand.vmem [shape: f32[512,4], index: 0, kind: input, shape index: {}]   ;;  %s7103_s1 = inlined_call_operand.vmem [shape: s32[512,1], index: 1, kind: input, shape index: {}]   ;;  %s7104_s2 = inlined_call_operand.vmem [shape: f32[1,4], index: 2, kind: input, shape index: {}]   ;;  %s7105_s3 = inlined_call_operand.hbm [shape: f32[1,1,128], index: 3, kind: output, shape index: {}]  }
   0x1   :  { %v3426_v0 = vld [vmem:[%s7102_s0] sm:$0xff]  ;;  %v3431_v1 = vld [vmem:[%s7102_s0 + $0x10] sm:$0xff]  ;;  %v3436_v2 = vld [vmem:[%s7102_s0 + $0x8] sm:$0xff] }
   0x2   :  { %v208_v3 = vsel %vm207_vm0, %v3426_v0, -inf  ;;  %v214_v4 = vsel %vm207_vm0, %v3431_v1, -inf  ;;  %v3445_v5 = vld [vmem:[%s7102_s0 + $0x18] sm:$0xff]  ;;  %v211_v6 = vsel %vm207_vm0, %v3436_v2, -inf  ;;  %v3454_v8 = vld [vmem:[%s7102_s0 + $0x20] sm:$0xff]  ;;  %v3459_v9 = vld [vmem:[%s7102_s0 + $0x28] sm:$0xff] }
   0x3   :  { %209 = vmax.xlane.f32.xlu0 %v208_v3  ;;  %215 = vmax.xlane.f32.xlu1 %v214_v4  ;;  %v217_v7 = vsel %vm207_vm0, %v3445_v5, -inf  ;;  %v220_v10 = vsel %vm207_vm0, %v3454_v8, -inf  ;;  %v223_v11 = vsel %vm207_vm0, %v3459_v9, -inf  ;;  %v3468_v12 = vld [vmem:[%s7102_s0 + $0x30] sm:$0xff]  ;;  %v3473_v13 = vld [vmem:[%s7102_s0 + $0x38] sm:$0xff]  ;;  %v3482_v16 = vld [vmem:[%s7102_s0 + $0x40] sm:$0xff] }
   0x4   :  { %v226_v14 = vsel %vm207_vm0, %v3468_v12, -inf  ;;  %v229_v15 = vsel %vm207_vm0, %v3473_v13, -inf  ;;  %v3487_v17 = vld [vmem:[%s7102_s0 + $0x48] sm:$0xff]  ;;  %v232_v18 = vsel %vm207_vm0, %v3482_v16, -inf  ;;  %v3496_v20 = vld [vmem:[%s7102_s0 + $0x50] sm:$0xff]  ;;  %v3501_v21 = vld [vmem:[%s7102_s0 + $0x58] sm:$0xff] }
   0x5   :  { %v235_v19 = vsel %vm207_vm0, %v3487_v17, -inf  ;;  %v238_v22 = vsel %vm207_vm0, %v3496_v20, -inf  ;;  %v241_v23 = vsel %vm207_vm0, %v3501_v21, -inf  ;;  %v3510_v24 = vld [vmem:[%s7102_s0 + $0x60] sm:$0xff]  ;;  %v3515_v25 = vld [vmem:[%s7102_s0 + $0x68] sm:$0xff] }
   0x7   :  { %212 = vmax.xlane.f32.xlu0 %v211_v6  ;;  %218 = vmax.xlane.f32.xlu1 %v217_v7 }
   0xb   :  { %221 = vmax.xlane.f32.xlu0 %v220_v10  ;;  %224 = vmax.xlane.f32.xlu1 %v223_v11 }
   0xf   :  { %227 = vmax.xlane.f32.xlu0 %v226_v14  ;;  %230 = vmax.xlane.f32.xlu1 %v229_v15 }
  0x13   :  { %233 = vmax.xlane.f32.xlu0 %v232_v18  ;;  %236 = vmax.xlane.f32.xlu1 %v235_v19 }
  0x14   :  { %8 = vsyncpa [#allocation3], 0  ;;  %v244_v26 = vsel %vm207_vm0, %v3510_v24, -inf  ;;  %v247_v27 = vsel %vm207_vm0, %v3515_v25, -inf  ;;  %v3524_v28 = vld [vmem:[%s7102_s0 + $0x70] sm:$0xff]  ;;  %v3529_v29 = vld [vmem:[%s7102_s0 + $0x78] sm:$0xff] }
  0x15   :  { %v250_v30 = vsel %vm207_vm0, %v3524_v28, -inf  ;;  %v253_v31 = vsel %vm207_vm0, %v3529_v29, -inf  ;;  %v3538_v32 = vld [vmem:[%s7102_s0 + $0x80] sm:$0xff]  ;;  %v3543_v33 = vld [vmem:[%s7102_s0 + $0x88] sm:$0xff]  ;;  %v3552_v36 = vld [vmem:[%s7102_s0 + $0x90] sm:$0xff]  ;;  %s3402_s18 = smov [#allocation2]  }
  0x16   :  { %v256_v34 = vsel %vm207_vm0, %v3538_v32, -inf  ;;  %v259_v35 = vsel %vm207_vm0, %v3543_v33, -inf  ;;  %v3557_v37 = vld [vmem:[%s7102_s0 + $0x98] sm:$0xff]  ;;  %v262_v38 = vsel %vm207_vm0, %v3552_v36, -inf  ;;  %v3566_v40 = vld [vmem:[%s7102_s0 + $0xa0] sm:$0xff]  ;;  %v3571_v41 = vld [vmem:[%s7102_s0 + $0xa8] sm:$0xff] }
  0x17   :  { %239 = vmax.xlane.f32.xlu0 %v238_v22  ;;  %242 = vmax.xlane.f32.xlu1 %v241_v23  ;;  %v265_v39 = vsel %vm207_vm0, %v3557_v37, -inf  ;;  %v268_v42 = vsel %vm207_vm0, %v3566_v40, -inf  ;;  %v271_v43 = vsel %vm207_vm0, %v3571_v41, -inf  ;;  %v3580_v44 = vld [vmem:[%s7102_s0 + $0xb0] sm:$0xff]  ;;  %v3585_v45 = vld [vmem:[%s7102_s0 + $0xb8] sm:$0xff]  ;;  %v3594_v48 = vld [vmem:[%s7102_s0 + $0xc0] sm:$0xff] }
  0x18   :  { %v274_v46 = vsel %vm207_vm0, %v3580_v44, -inf  ;;  %v277_v47 = vsel %vm207_vm0, %v3585_v45, -inf  ;;  %v3599_v49 = vld [vmem:[%s7102_s0 + $0xc8] sm:$0xff]  ;;  %v280_v50 = vsel %vm207_vm0, %v3594_v48, -inf  ;;  %v3608_v52 = vld [vmem:[%s7102_s0 + $0xd0] sm:$0xff]  ;;  %v3613_v53 = vld [vmem:[%s7102_s0 + $0xd8] sm:$0xff] }
  0x19   :  { %v283_v51 = vsel %vm207_vm0, %v3599_v49, -inf  ;;  %v286_v54 = vsel %vm207_vm0, %v3608_v52, -inf  ;;  %v289_v55 = vsel %vm207_vm0, %v3613_v53, -inf  ;;  %v3622_v56 = vld [vmem:[%s7102_s0 + $0xe0] sm:$0xff]  ;;  %v3627_v57 = vld [vmem:[%s7102_s0 + $0xe8] sm:$0xff]  ;;  %v3636_v60 = vld [vmem:[%s7102_s0 + $0xf0] sm:$0xff] }
  0x1a   :  { %v292_v58 = vsel %vm207_vm0, %v3622_v56, -inf  ;;  %v295_v59 = vsel %vm207_vm0, %v3627_v57, -inf  ;;  %v3641_v61 = vld [vmem:[%s7102_s0 + $0xf8] sm:$0xff]  ;;  %v298_v62 = vsel %vm207_vm0, %v3636_v60, -inf  ;;  %v3650_v3 = vld [vmem:[%s7102_s0 + $0x100] sm:$0xff]  ;;  %v3655_v4 = vld [vmem:[%s7102_s0 + $0x108] sm:$0xff] }
  0x1b   :  { %245 = vmax.xlane.f32.xlu0 %v244_v26  ;;  %248 = vmax.xlane.f32.xlu1 %v247_v27  ;;  %v301_v63 = vsel %vm207_vm0, %v3641_v61, -inf  ;;  %v304_v6 = vsel %vm207_vm0, %v3650_v3, -inf  ;;  %v307_v7 = vsel %vm207_vm0, %v3655_v4, -inf  ;;  %v3664_v10 = vld [vmem:[%s7102_s0 + $0x110] sm:$0xff]  ;;  %v3669_v11 = vld [vmem:[%s7102_s0 + $0x118] sm:$0xff]  ;;  %v3678_v18 = vld [vmem:[%s7102_s0 + $0x120] sm:$0xff] }
  0x1c   :  { %v310_v14 = vsel %vm207_vm0, %v3664_v10, -inf  ;;  %v313_v15 = vsel %vm207_vm0, %v3669_v11, -inf  ;;  %v3683_v19 = vld [vmem:[%s7102_s0 + $0x128] sm:$0xff]  ;;  %v316_v22 = vsel %vm207_vm0, %v3678_v18, -inf  ;;  %v3692_v26 = vld [vmem:[%s7102_s0 + $0x130] sm:$0xff]  ;;  %v3697_v27 = vld [vmem:[%s7102_s0 + $0x138] sm:$0xff] }
  0x1d   :  { %v319_v23 = vsel %vm207_vm0, %v3683_v19, -inf  ;;  %s2807_s19 = sshll.u32 %s3402_s18, 4  ;;  %s2808_s19 = int_to_ptr.vmem [resolvable:$true] %s2807_s19 }
  0x1e   :  { %s3378_s21 = scalar_lea.vmem %s2808_s19, 16  ;;  %s3382_s22 = scalar_lea.vmem %s2808_s19, 32 }
  0x1f   :  { %251 = vmax.xlane.f32.xlu0 %v250_v30  ;;  %254 = vmax.xlane.f32.xlu1 %v253_v31  ;;  %v322_v30 = vsel %vm207_vm0, %v3692_v26, -inf  ;;  %v325_v31 = vsel %vm207_vm0, %v3697_v27, -inf  ;;  %p3379_p0 = scmp.ne.s32.totalorder %s2808_s19, %s3378_s21  ;;  %p3383_p1 = scmp.lt.s32.totalorder %s2808_s19, %s2808_s19 }
  0x20   :  { %p3384_p2 = scmp.lt.s32.totalorder %s3382_s22, %s3378_s21 }
  0x22   :  { %p3385_p3 = por %p3384_p2, %p3383_p1 }
  0x23   :  { %257 = vmax.xlane.f32.xlu0 %v256_v34  ;;  %260 = vmax.xlane.f32.xlu1 %v259_v35  ;;  %v3706_v34 = vld [vmem:[%s7102_s0 + $0x140] sm:$0xff]  ;;  %v3711_v35 = vld [vmem:[%s7102_s0 + $0x148] sm:$0xff] }
  0x24   :  { %p3386_p4 = pnand %p3385_p3, %p3379_p0 }
  0x27   :  { %263 = vmax.xlane.f32.xlu0 %v262_v38  ;;  %266 = vmax.xlane.f32.xlu1 %v265_v39  ;;  %v328_v38 = vsel %vm207_vm0, %v3706_v34, -inf  ;;  %v331_v39 = vsel %vm207_vm0, %v3711_v35, -inf }
  0x2b   :  { %269 = vmax.xlane.f32.xlu0 %v268_v42  ;;  %272 = vmax.xlane.f32.xlu1 %v271_v43  ;;  %v3720_v42 = vld [vmem:[%s7102_s0 + $0x150] sm:$0xff]  ;;  %v3725_v43 = vld [vmem:[%s7102_s0 + $0x158] sm:$0xff] }
  0x2f   :  { %275 = vmax.xlane.f32.xlu0 %v274_v46  ;;  %278 = vmax.xlane.f32.xlu1 %v277_v47  ;;  %v334_v46 = vsel %vm207_vm0, %v3720_v42, -inf  ;;  %v337_v47 = vsel %vm207_vm0, %v3725_v43, -inf }
  0x33   :  { %281 = vmax.xlane.f32.xlu0 %v280_v50  ;;  %284 = vmax.xlane.f32.xlu1 %v283_v51  ;;  %v3734_v50 = vld [vmem:[%s7102_s0 + $0x160] sm:$0xff]  ;;  %v3739_v51 = vld [vmem:[%s7102_s0 + $0x168] sm:$0xff] }
  0x37   :  { %287 = vmax.xlane.f32.xlu0 %v286_v54  ;;  %290 = vmax.xlane.f32.xlu1 %v289_v55  ;;  %v340_v54 = vsel %vm207_vm0, %v3734_v50, -inf  ;;  %v343_v55 = vsel %vm207_vm0, %v3739_v51, -inf }
  0x3b   :  { %293 = vmax.xlane.f32.xlu0 %v292_v58  ;;  %296 = vmax.xlane.f32.xlu1 %v295_v59  ;;  %v3748_v58 = vld [vmem:[%s7102_s0 + $0x170] sm:$0xff]  ;;  %v3753_v59 = vld [vmem:[%s7102_s0 + $0x178] sm:$0xff] }
  0x3f   :  { %299 = vmax.xlane.f32.xlu0 %v298_v62  ;;  %302 = vmax.xlane.f32.xlu1 %v301_v63  ;;  %v346_v62 = vsel %vm207_vm0, %v3748_v58, -inf  ;;  %v349_v63 = vsel %vm207_vm0, %v3753_v59, -inf }
  0x43   :  { %305 = vmax.xlane.f32.xlu0 %v304_v6  ;;  %308 = vmax.xlane.f32.xlu1 %v307_v7  ;;  %v3762_v6 = vld [vmem:[%s7102_s0 + $0x180] sm:$0xff]  ;;  %v3767_v7 = vld [vmem:[%s7102_s0 + $0x188] sm:$0xff] }
  0x47   :  { %311 = vmax.xlane.f32.xlu0 %v310_v14  ;;  %314 = vmax.xlane.f32.xlu1 %v313_v15  ;;  %v352_v14 = vsel %vm207_vm0, %v3762_v6, -inf  ;;  %v355_v15 = vsel %vm207_vm0, %v3767_v7, -inf }
  0x4b   :  { %317 = vmax.xlane.f32.xlu0 %v316_v22  ;;  %320 = vmax.xlane.f32.xlu1 %v319_v23  ;;  %v3776_v22 = vld [vmem:[%s7102_s0 + $0x190] sm:$0xff]  ;;  %v3781_v23 = vld [vmem:[%s7102_s0 + $0x198] sm:$0xff] }
  0x4f   :  { %323 = vmax.xlane.f32.xlu0 %v322_v30  ;;  %326 = vmax.xlane.f32.xlu1 %v325_v31  ;;  %v358_v30 = vsel %vm207_vm0, %v3776_v22, -inf  ;;  %v361_v31 = vsel %vm207_vm0, %v3781_v23, -inf }
  0x53   :  { %329 = vmax.xlane.f32.xlu0 %v328_v38  ;;  %332 = vmax.xlane.f32.xlu1 %v331_v39  ;;  %v3790_v38 = vld [vmem:[%s7102_s0 + $0x1a0] sm:$0xff]  ;;  %v3795_v39 = vld [vmem:[%s7102_s0 + $0x1a8] sm:$0xff] }
  0x54   :  { %7351 = vst [vmem:[#allocation5_spill] sm:$0xff] %v3790_v38  ;;  %7352 = vst [vmem:[#allocation6_spill] sm:$0xff] %v3795_v39 }
  0x57   :  { %335 = vmax.xlane.f32.xlu0 %v334_v46  ;;  %338 = vmax.xlane.f32.xlu1 %v337_v47  ;;  %v364_v46 = vsel %vm207_vm0, %v3790_v38, -inf  ;;  %v367_v47 = vsel %vm207_vm0, %v3795_v39, -inf }
  0x5b   :  { %341 = vmax.xlane.f32.xlu0 %v340_v54  ;;  %344 = vmax.xlane.f32.xlu1 %v343_v55  ;;  %v3804_v54 = vld [vmem:[%s7102_s0 + $0x1b0] sm:$0xff]  ;;  %v3809_v55 = vld [vmem:[%s7102_s0 + $0x1b8] sm:$0xff] }
  0x5c   :  { %7353 = vst [vmem:[#allocation7_spill] sm:$0xff] %v3804_v54  ;;  %7354 = vst [vmem:[#allocation8_spill] sm:$0xff] %v3809_v55 }
  0x5f   :  { %347 = vmax.xlane.f32.xlu0 %v346_v62  ;;  %350 = vmax.xlane.f32.xlu1 %v349_v63  ;;  %v370_v62 = vsel %vm207_vm0, %v3804_v54, -inf  ;;  %v373_v63 = vsel %vm207_vm0, %v3809_v55, -inf }
  0x63   :  { %353 = vmax.xlane.f32.xlu0 %v352_v14  ;;  %356 = vmax.xlane.f32.xlu1 %v355_v15  ;;  %v3818_v14 = vld [vmem:[%s7102_s0 + $0x1c0] sm:$0xff]  ;;  %v3823_v15 = vld [vmem:[%s7102_s0 + $0x1c8] sm:$0xff] }
  0x64   :  { %7355 = vst [vmem:[#allocation9_spill] sm:$0xff] %v3818_v14  ;;  %7356 = vst [vmem:[#allocation10_spill] sm:$0xff] %v3823_v15 }
  0x67   :  { %359 = vmax.xlane.f32.xlu0 %v358_v30  ;;  %362 = vmax.xlane.f32.xlu1 %v361_v31  ;;  %v376_v30 = vsel %vm207_vm0, %v3818_v14, -inf  ;;  %v379_v31 = vsel %vm207_vm0, %v3823_v15, -inf  ;;  %v3846_v15 = vld [vmem:[%s7102_s0 + $0x1e0] sm:$0xff]  ;;  %v3851_v14 = vld [vmem:[%s7102_s0 + $0x1e8] sm:$0xff] }
  0x68   :  { %7359 = vst [vmem:[#allocation13_spill] sm:$0xff] %v3846_v15  ;;  %7360 = vst [vmem:[#allocation14_spill] sm:$0xff] %v3851_v14 }
  0x6b   :  { %365 = vmax.xlane.f32.xlu0 %v364_v46  ;;  %368 = vmax.xlane.f32.xlu1 %v367_v47  ;;  %v3832_v46 = vld [vmem:[%s7102_s0 + $0x1d0] sm:$0xff]  ;;  %v3837_v47 = vld [vmem:[%s7102_s0 + $0x1d8] sm:$0xff] }
  0x6c   :  { %7357 = vst [vmem:[#allocation11_spill] sm:$0xff] %v3832_v46  ;;  %7358 = vst [vmem:[#allocation12_spill] sm:$0xff] %v3837_v47 }
  0x6f   :  { %371 = vmax.xlane.f32.xlu0 %v370_v62  ;;  %374 = vmax.xlane.f32.xlu1 %v373_v63  ;;  %v382_v62 = vsel %vm207_vm0, %v3832_v46, -inf  ;;  %v385_v63 = vsel %vm207_vm0, %v3837_v47, -inf  ;;  %v3860_v47 = vld [vmem:[%s7102_s0 + $0x1f0] sm:$0xff]  ;;  %v3865_v46 = vld [vmem:[%s7102_s0 + $0x1f8] sm:$0xff] }
  0x70   :  { %7361 = vst [vmem:[#allocation15_spill] sm:$0xff] %v3860_v47  ;;  %7362 = vst [vmem:[#allocation16_spill] sm:$0xff] %v3865_v46 }
  0x73   :  { %377 = vmax.xlane.f32.xlu0 %v376_v30  ;;  %380 = vmax.xlane.f32.xlu1 %v379_v31  ;;  %v388_v30 = vsel %vm207_vm0, %v3846_v15, -inf  ;;  %v391_v31 = vsel %vm207_vm0, %v3851_v14, -inf }
  0x77   :  { %383 = vmax.xlane.f32.xlu0 %v382_v62  ;;  %386 = vmax.xlane.f32.xlu1 %v385_v63  ;;  %v394_v62 = vsel %vm207_vm0, %v3860_v47, -inf  ;;  %v397_v63 = vsel %vm207_vm0, %v3865_v46, -inf }
  0x7b   :  { %389 = vmax.xlane.f32.xlu0 %v388_v30  ;;  %392 = vmax.xlane.f32.xlu1 %v391_v31 }
  0x7f   :  { %395 = vmax.xlane.f32.xlu0 %v394_v62  ;;  %398 = vmax.xlane.f32.xlu1 %v397_v63 }
  0x8c   :  { %v3871_v14 = vpop.xlane.xlu0 %209  ;;  %v3873_v15 = vpop.xlane.xlu1 %215 }
  0x8d   :  { %7363 = vst [vmem:[#allocation17_spill] sm:$0xff] %v3871_v14  ;;  %v400_v55 = vsub.f32 %v3426_v0, %v3871_v14  ;;  %v402_v54 = vsub.f32 %v3431_v1, %v3873_v15 }
  0x8f   :  { %v464_v30 = vmul.f32 1.442695, %v400_v55  ;;  %v468_v31 = vmul.f32 1.442695, %v402_v54 }
  0x90   :  { %v3879_v39 = vpop.xlane.xlu0 %212  ;;  %v3881_v47 = vpop.xlane.xlu1 %218 }
  0x91   :  { %2889 = vpow2.f32 %v464_v30  ;;  %v401_v62 = vsub.f32 %v3436_v2, %v3879_v39  ;;  %v403_v63 = vsub.f32 %v3445_v5, %v3881_v47 }
  0x92   :  { %2891 = vpow2.f32 %v468_v31 }
  0x93   :  { %v466_v46 = vmul.f32 1.442695, %v401_v62  ;;  %v470_v38 = vmul.f32 1.442695, %v403_v63 }
  0x94   :  { %v3887_v0 = vpop.xlane.xlu0 %221  ;;  %v3889_v14 = vpop.xlane.xlu1 %224 }
  0x95   :  { %2893 = vpow2.f32 %v466_v46  ;;  %v404_v1 = vsub.f32 %v3454_v8, %v3887_v0  ;;  %v405_v54 = vsub.f32 %v3459_v9, %v3889_v14 }
  0x96   :  { %2895 = vpow2.f32 %v470_v38 }
  0x97   :  { %v472_v55 = vmul.f32 1.442695, %v404_v1  ;;  %v474_v2 = vmul.f32 1.442695, %v405_v54 }
  0x98   :  { %v3895_v30 = vpop.xlane.xlu0 %227  ;;  %v3897_v5 = vpop.xlane.xlu1 %230 }
  0x99   :  { %7364 = vst [vmem:[#allocation18_spill] sm:$0xff] %v3895_v30  ;;  %2897 = vpow2.f32 %v472_v55  ;;  %v406_v31 = vsub.f32 %v3468_v12, %v3895_v30  ;;  %v407_v46 = vsub.f32 %v3473_v13, %v3897_v5 }
  0x9a   :  { %2899 = vpow2.f32 %v474_v2 }
  0x9b   :  { %v476_v62 = vmul.f32 1.442695, %v406_v31  ;;  %v478_v8 = vmul.f32 1.442695, %v407_v46 }
  0x9c   :  { %v3903_v63 = vpop.xlane.xlu0 %233  ;;  %v3905_v9 = vpop.xlane.xlu1 %236 }
  0x9d   :  { %2901 = vpow2.f32 %v476_v62  ;;  %v408_v38 = vsub.f32 %v3482_v16, %v3903_v63  ;;  %v409_v1 = vsub.f32 %v3487_v17, %v3905_v9 }
  0x9e   :  { %v2890_v54 = vpop.eup %2889  ;;  %2903 = vpow2.f32 %v478_v8 }
  0x9f   :  { %v2892_v12 = vpop.eup %2891  ;;  %v480_v55 = vmul.f32 1.442695, %v408_v38  ;;  %v482_v30 = vmul.f32 1.442695, %v409_v1  ;;  %v592_v13 = vsel %vm207_vm0, %v2890_v54, 0.0 }
  0xa0   :  { %593 = vadd.xlane.f32.xlu0 %v592_v13  ;;  %v3912_v2 = vpop.xlane.xlu0 %239  ;;  %v3914_v31 = vpop.xlane.xlu1 %242  ;;  %v598_v17 = vsel %vm207_vm0, %v2892_v12, 0.0 }
  0xa1   :  { %2905 = vpow2.f32 %v480_v55  ;;  %v410_v46 = vsub.f32 %v3496_v20, %v3912_v2  ;;  %v411_v16 = vsub.f32 %v3501_v21, %v3914_v31 }
  0xa2   :  { %v2894_v62 = vpop.eup %2893  ;;  %2907 = vpow2.f32 %v482_v30 }
  0xa3   :  { %v2896_v8 = vpop.eup %2895  ;;  %v484_v38 = vmul.f32 1.442695, %v410_v46  ;;  %v486_v1 = vmul.f32 1.442695, %v411_v16  ;;  %v595_v54 = vsel %vm207_vm0, %v2894_v62, 0.0 }
  0xa4   :  { %599 = vadd.xlane.f32.xlu0 %v598_v17  ;;  %596 = vadd.xlane.f32.xlu1 %v595_v54  ;;  %v3922_v13 = vpop.xlane.xlu0 %245  ;;  %v3924_v55 = vpop.xlane.xlu1 %248  ;;  %v601_v30 = vsel %vm207_vm0, %v2896_v8, 0.0 }
  0xa5   :  { %2909 = vpow2.f32 %v484_v38  ;;  %v412_v20 = vsub.f32 %v3510_v24, %v3922_v13  ;;  %v413_v21 = vsub.f32 %v3515_v25, %v3924_v55 }
  0xa6   :  { %v2898_v12 = vpop.eup %2897  ;;  %2911 = vpow2.f32 %v486_v1 }
  0xa7   :  { %v2900_v46 = vpop.eup %2899  ;;  %v488_v16 = vmul.f32 1.442695, %v412_v20  ;;  %v490_v62 = vmul.f32 1.442695, %v413_v21  ;;  %v604_v17 = vsel %vm207_vm0, %v2898_v12, 0.0 }
  0xa8   :  { %602 = vadd.xlane.f32.xlu1 %v601_v30  ;;  %605 = vadd.xlane.f32.xlu0 %v604_v17  ;;  %v3932_v54 = vpop.xlane.xlu0 %251  ;;  %v3934_v38 = vpop.xlane.xlu1 %254  ;;  %v607_v8 = vsel %vm207_vm0, %v2900_v46, 0.0 }
  0xa9   :  { %2913 = vpow2.f32 %v488_v16  ;;  %v414_v24 = vsub.f32 %v3524_v28, %v3932_v54  ;;  %v415_v25 = vsub.f32 %v3529_v29, %v3934_v38 }
  0xaa   :  { %v2902_v1 = vpop.eup %2901  ;;  %2915 = vpow2.f32 %v490_v62 }
  0xab   :  { %v2904_v20 = vpop.eup %2903  ;;  %v492_v21 = vmul.f32 1.442695, %v414_v24  ;;  %v494_v12 = vmul.f32 1.442695, %v415_v25  ;;  %v610_v30 = vsel %vm207_vm0, %v2902_v1, 0.0 }
  0xac   :  { %608 = vadd.xlane.f32.xlu1 %v607_v8  ;;  %611 = vadd.xlane.f32.xlu0 %v610_v30  ;;  %v3942_v17 = vpop.xlane.xlu0 %257  ;;  %v3944_v16 = vpop.xlane.xlu1 %260  ;;  %v613_v46 = vsel %vm207_vm0, %v2904_v20, 0.0 }
  0xad   :  { %2917 = vpow2.f32 %v492_v21  ;;  %v416_v28 = vsub.f32 %v3538_v32, %v3942_v17  ;;  %v417_v29 = vsub.f32 %v3543_v33, %v3944_v16 }
  0xae   :  { %v2906_v62 = vpop.eup %2905  ;;  %2919 = vpow2.f32 %v494_v12  ;;  %v3400_v12 = vmov 0  }
  0xaf   :  { %v2908_v24 = vpop.eup %2907  ;;  %v496_v25 = vmul.f32 1.442695, %v416_v28  ;;  %v498_v1 = vmul.f32 1.442695, %v417_v29  ;;  %v616_v8 = vsel %vm207_vm0, %v2906_v62, 0.0  ;;  %2888 = vset.pattern.permute.xlu1 %v3400_v12  ;;  %2887 = vset.pattern.permute.xlu0 %v3400_v12 }
  0xb0   :  { %614 = vadd.xlane.f32.xlu1 %v613_v46  ;;  %617 = vadd.xlane.f32.xlu0 %v616_v8  ;;  %v3952_v30 = vpop.xlane.xlu0 %263  ;;  %v3954_v21 = vpop.xlane.xlu1 %266  ;;  %v619_v20 = vsel %vm207_vm0, %v2908_v24, 0.0 }
  0xb1   :  { %2921 = vpow2.f32 %v496_v25  ;;  %v418_v32 = vsub.f32 %v3552_v36, %v3952_v30  ;;  %v419_v33 = vsub.f32 %v3557_v37, %v3954_v21 }
  0xb2   :  { %v2910_v28 = vpop.eup %2909  ;;  %2923 = vpow2.f32 %v498_v1 }
  0xb3   :  { %v2912_v29 = vpop.eup %2911  ;;  %v500_v46 = vmul.f32 1.442695, %v418_v32  ;;  %v502_v62 = vmul.f32 1.442695, %v419_v33  ;;  %v622_v8 = vsel %vm207_vm0, %v2910_v28, 0.0 }
  0xb4   :  { %620 = vadd.xlane.f32.xlu1 %v619_v20  ;;  %623 = vadd.xlane.f32.xlu0 %v622_v8  ;;  %v3962_v25 = vpop.xlane.xlu0 %269  ;;  %v3964_v36 = vpop.xlane.xlu1 %272  ;;  %v625_v1 = vsel %vm207_vm0, %v2912_v29, 0.0 }
  0xb5   :  { %2925 = vpow2.f32 %v500_v46  ;;  %v420_v37 = vsub.f32 %v3566_v40, %v3962_v25  ;;  %v421_v24 = vsub.f32 %v3571_v41, %v3964_v36 }
  0xb6   :  { %v2914_v12 = vpop.eup %2913  ;;  %2927 = vpow2.f32 %v502_v62 }
  0xb7   :  { %v2916_v32 = vpop.eup %2915  ;;  %v504_v33 = vmul.f32 1.442695, %v420_v37  ;;  %v506_v28 = vmul.f32 1.442695, %v421_v24  ;;  %v628_v20 = vsel %vm207_vm0, %v2914_v12, 0.0 }
  0xb8   :  { %626 = vadd.xlane.f32.xlu1 %v625_v1  ;;  %629 = vadd.xlane.f32.xlu0 %v628_v20  ;;  %v3972_v8 = vpop.xlane.xlu0 %275  ;;  %v3974_v46 = vpop.xlane.xlu1 %278  ;;  %v631_v29 = vsel %vm207_vm0, %v2916_v32, 0.0 }
  0xb9   :  { %2929 = vpow2.f32 %v504_v33  ;;  %v422_v40 = vsub.f32 %v3580_v44, %v3972_v8  ;;  %v423_v41 = vsub.f32 %v3585_v45, %v3974_v46 }
  0xba   :  { %v2918_v62 = vpop.eup %2917  ;;  %2931 = vpow2.f32 %v506_v28 }
  0xbb   :  { %v2920_v37 = vpop.eup %2919  ;;  %v508_v24 = vmul.f32 1.442695, %v422_v40  ;;  %v510_v12 = vmul.f32 1.442695, %v423_v41  ;;  %v634_v1 = vsel %vm207_vm0, %v2918_v62, 0.0 }
  0xbc   :  { %632 = vadd.xlane.f32.xlu1 %v631_v29  ;;  %635 = vadd.xlane.f32.xlu0 %v634_v1  ;;  %v3982_v20 = vpop.xlane.xlu0 %281  ;;  %v3984_v33 = vpop.xlane.xlu1 %284  ;;  %v637_v32 = vsel %vm207_vm0, %v2920_v37, 0.0 }
  0xbd   :  { %7365 = vst [vmem:[#allocation19_spill] sm:$0xff] %v3984_v33  ;;  %2933 = vpow2.f32 %v508_v24  ;;  %v424_v44 = vsub.f32 %v3594_v48, %v3982_v20  ;;  %v425_v45 = vsub.f32 %v3599_v49, %v3984_v33 }
  0xbe   :  { %v2922_v28 = vpop.eup %2921  ;;  %2935 = vpow2.f32 %v510_v12 }
  0xbf   :  { %v2924_v40 = vpop.eup %2923  ;;  %v512_v41 = vmul.f32 1.442695, %v424_v44  ;;  %v514_v62 = vmul.f32 1.442695, %v425_v45  ;;  %v640_v29 = vsel %vm207_vm0, %v2922_v28, 0.0 }
  0xc0   :  { %638 = vadd.xlane.f32.xlu1 %v637_v32  ;;  %641 = vadd.xlane.f32.xlu0 %v640_v29  ;;  %v3992_v1 = vpop.xlane.xlu0 %287  ;;  %v3994_v24 = vpop.xlane.xlu1 %290  ;;  %v643_v37 = vsel %vm207_vm0, %v2924_v40, 0.0 }
  0xc1   :  { %7366 = vst [vmem:[#allocation20_spill] sm:$0xff] %v3992_v1  ;;  %7367 = vst [vmem:[#allocation21_spill] sm:$0xff] %v3994_v24  ;;  %2937 = vpow2.f32 %v512_v41  ;;  %v426_v48 = vsub.f32 %v3608_v52, %v3992_v1  ;;  %v427_v49 = vsub.f32 %v3613_v53, %v3994_v24 }
  0xc2   :  { %v2926_v12 = vpop.eup %2925  ;;  %2939 = vpow2.f32 %v514_v62 }
  0xc3   :  { %v2928_v44 = vpop.eup %2927  ;;  %v516_v45 = vmul.f32 1.442695, %v426_v48  ;;  %v518_v28 = vmul.f32 1.442695, %v427_v49  ;;  %v646_v32 = vsel %vm207_vm0, %v2926_v12, 0.0 }
  0xc4   :  { %644 = vadd.xlane.f32.xlu1 %v643_v37  ;;  %647 = vadd.xlane.f32.xlu0 %v646_v32  ;;  %v4002_v29 = vpop.xlane.xlu0 %293  ;;  %v4004_v41 = vpop.xlane.xlu1 %296  ;;  %v649_v40 = vsel %vm207_vm0, %v2928_v44, 0.0 }
  0xc5   :  { %7368 = vst [vmem:[#allocation22_spill] sm:$0xff] %v4002_v29  ;;  %7369 = vst [vmem:[#allocation23_spill] sm:$0xff] %v4004_v41  ;;  %2941 = vpow2.f32 %v516_v45  ;;  %v428_v52 = vsub.f32 %v3622_v56, %v4002_v29  ;;  %v429_v53 = vsub.f32 %v3627_v57, %v4004_v41 }
  0xc6   :  { %v2930_v62 = vpop.eup %2929  ;;  %2943 = vpow2.f32 %v518_v28 }
  0xc7   :  { %v2932_v48 = vpop.eup %2931  ;;  %v520_v49 = vmul.f32 1.442695, %v428_v52  ;;  %v522_v12 = vmul.f32 1.442695, %v429_v53  ;;  %v652_v37 = vsel %vm207_vm0, %v2930_v62, 0.0 }
  0xc8   :  { %650 = vadd.xlane.f32.xlu1 %v649_v40  ;;  %653 = vadd.xlane.f32.xlu0 %v652_v37  ;;  %v4012_v32 = vpop.xlane.xlu0 %299  ;;  %v4014_v45 = vpop.xlane.xlu1 %302  ;;  %v655_v44 = vsel %vm207_vm0, %v2932_v48, 0.0 }
  0xc9   :  { %7370 = vst [vmem:[#allocation24_spill] sm:$0xff] %v4012_v32  ;;  %7371 = vst [vmem:[#allocation25_spill] sm:$0xff] %v4014_v45  ;;  %2945 = vpow2.f32 %v520_v49  ;;  %v430_v56 = vsub.f32 %v3636_v60, %v4012_v32  ;;  %v431_v57 = vsub.f32 %v3641_v61, %v4014_v45 }
  0xca   :  { %v2934_v28 = vpop.eup %2933  ;;  %2947 = vpow2.f32 %v522_v12 }
  0xcb   :  { %v2936_v52 = vpop.eup %2935  ;;  %v524_v53 = vmul.f32 1.442695, %v430_v56  ;;  %v526_v62 = vmul.f32 1.442695, %v431_v57  ;;  %v658_v40 = vsel %vm207_vm0, %v2934_v28, 0.0 }
  0xcc   :  { %656 = vadd.xlane.f32.xlu1 %v655_v44  ;;  %659 = vadd.xlane.f32.xlu0 %v658_v40  ;;  %v4022_v37 = vpop.xlane.xlu0 %305  ;;  %v4024_v49 = vpop.xlane.xlu1 %308  ;;  %v661_v48 = vsel %vm207_vm0, %v2936_v52, 0.0 }
  0xcd   :  { %7372 = vst [vmem:[#allocation26_spill] sm:$0xff] %v4022_v37  ;;  %7373 = vst [vmem:[#allocation27_spill] sm:$0xff] %v4024_v49  ;;  %2949 = vpow2.f32 %v524_v53  ;;  %v432_v60 = vsub.f32 %v3650_v3, %v4022_v37  ;;  %v433_v61 = vsub.f32 %v3655_v4, %v4024_v49  ;;  %v104_v37 = vld [vmem:[%s7103_s1 + $0xc8] sm:$0xff] }
  0xce   :  { %v2938_v12 = vpop.eup %2937  ;;  %2951 = vpow2.f32 %v526_v62 }
  0xcf   :  { %v2940_v56 = vpop.eup %2939  ;;  %v528_v57 = vmul.f32 1.442695, %v432_v60  ;;  %v530_v28 = vmul.f32 1.442695, %v433_v61  ;;  %v664_v44 = vsel %vm207_vm0, %v2938_v12, 0.0 }
  0xd0   :  { %662 = vadd.xlane.f32.xlu1 %v661_v48  ;;  %665 = vadd.xlane.f32.xlu0 %v664_v44  ;;  %v4032_v40 = vpop.xlane.xlu0 %311  ;;  %v4034_v53 = vpop.xlane.xlu1 %314  ;;  %v667_v52 = vsel %vm207_vm0, %v2940_v56, 0.0 }
  0xd1   :  { %7374 = vst [vmem:[#allocation28_spill] sm:$0xff] %v4032_v40  ;;  %7375 = vst [vmem:[#allocation29_spill] sm:$0xff] %v4034_v53  ;;  %2953 = vpow2.f32 %v528_v57  ;;  %v434_v3 = vsub.f32 %v3664_v10, %v4032_v40  ;;  %v435_v4 = vsub.f32 %v3669_v11, %v4034_v53  ;;  %v102_v53 = vld [vmem:[%s7103_s1 + $0xb8] sm:$0xff] }
  0xd2   :  { %v2942_v62 = vpop.eup %2941  ;;  %2955 = vpow2.f32 %v530_v28 }
  0xd3   :  { %v2944_v60 = vpop.eup %2943  ;;  %v532_v61 = vmul.f32 1.442695, %v434_v3  ;;  %v534_v12 = vmul.f32 1.442695, %v435_v4  ;;  %v670_v48 = vsel %vm207_vm0, %v2942_v62, 0.0 }
  0xd4   :  { %668 = vadd.xlane.f32.xlu1 %v667_v52  ;;  %671 = vadd.xlane.f32.xlu0 %v670_v48  ;;  %v4042_v44 = vpop.xlane.xlu0 %317  ;;  %v4044_v57 = vpop.xlane.xlu1 %320  ;;  %v673_v56 = vsel %vm207_vm0, %v2944_v60, 0.0 }
  0xd5   :  { %7376 = vst [vmem:[#allocation30_spill] sm:$0xff] %v4042_v44  ;;  %7377 = vst [vmem:[#allocation31_spill] sm:$0xff] %v4044_v57  ;;  %2957 = vpow2.f32 %v532_v61  ;;  %v436_v10 = vsub.f32 %v3678_v18, %v4042_v44  ;;  %v437_v11 = vsub.f32 %v3683_v19, %v4044_v57 }
  0xd6   :  { %v2946_v28 = vpop.eup %2945  ;;  %2959 = vpow2.f32 %v534_v12 }
  0xd7   :  { %v2948_v3 = vpop.eup %2947  ;;  %v536_v4 = vmul.f32 1.442695, %v436_v10  ;;  %v538_v62 = vmul.f32 1.442695, %v437_v11  ;;  %v676_v52 = vsel %vm207_vm0, %v2946_v28, 0.0 }
  0xd8   :  { %674 = vadd.xlane.f32.xlu1 %v673_v56  ;;  %677 = vadd.xlane.f32.xlu0 %v676_v52  ;;  %v4052_v48 = vpop.xlane.xlu0 %323  ;;  %v4054_v61 = vpop.xlane.xlu1 %326  ;;  %v679_v60 = vsel %vm207_vm0, %v2948_v3, 0.0 }
  0xd9   :  { %7378 = vst [vmem:[#allocation32_spill] sm:$0xff] %v4052_v48  ;;  %7379 = vst [vmem:[#allocation33_spill] sm:$0xff] %v4054_v61  ;;  %2961 = vpow2.f32 %v536_v4  ;;  %v438_v18 = vsub.f32 %v3692_v26, %v4052_v48  ;;  %v439_v19 = vsub.f32 %v3697_v27, %v4054_v61  ;;  %v100_v48 = vld [vmem:[%s7103_s1 + $0xa8] sm:$0xff] }
  0xda   :  { %v2950_v12 = vpop.eup %2949  ;;  %2963 = vpow2.f32 %v538_v62 }
  0xdb   :  { %v2952_v10 = vpop.eup %2951  ;;  %v540_v11 = vmul.f32 1.442695, %v438_v18  ;;  %v542_v28 = vmul.f32 1.442695, %v439_v19  ;;  %v682_v56 = vsel %vm207_vm0, %v2950_v12, 0.0 }
  0xdc   :  { %680 = vadd.xlane.f32.xlu1 %v679_v60  ;;  %683 = vadd.xlane.f32.xlu0 %v682_v56  ;;  %v4062_v52 = vpop.xlane.xlu0 %329  ;;  %v4064_v4 = vpop.xlane.xlu1 %332  ;;  %v685_v3 = vsel %vm207_vm0, %v2952_v10, 0.0 }
  0xdd   :  { %7380 = vst [vmem:[#allocation34_spill] sm:$0xff] %v4062_v52  ;;  %7381 = vst [vmem:[#allocation35_spill] sm:$0xff] %v4064_v4  ;;  %2965 = vpow2.f32 %v540_v11  ;;  %v440_v26 = vsub.f32 %v3706_v34, %v4062_v52  ;;  %v441_v27 = vsub.f32 %v3711_v35, %v4064_v4  ;;  %v98_v4 = vld [vmem:[%s7103_s1 + $0x98] sm:$0xff] }
  0xde   :  { %v2954_v62 = vpop.eup %2953  ;;  %2967 = vpow2.f32 %v542_v28 }
  0xdf   :  { %v2956_v18 = vpop.eup %2955  ;;  %v544_v19 = vmul.f32 1.442695, %v440_v26  ;;  %v546_v12 = vmul.f32 1.442695, %v441_v27  ;;  %v688_v60 = vsel %vm207_vm0, %v2954_v62, 0.0 }
  0xe0   :  { %686 = vadd.xlane.f32.xlu1 %v685_v3  ;;  %689 = vadd.xlane.f32.xlu0 %v688_v60  ;;  %v4072_v56 = vpop.xlane.xlu0 %335  ;;  %v4074_v11 = vpop.xlane.xlu1 %338  ;;  %v691_v10 = vsel %vm207_vm0, %v2956_v18, 0.0 }
  0xe1   :  { %7382 = vst [vmem:[#allocation36_spill] sm:$0xff] %v4072_v56  ;;  %7383 = vst [vmem:[#allocation37_spill] sm:$0xff] %v4074_v11  ;;  %2969 = vpow2.f32 %v544_v19  ;;  %v442_v34 = vsub.f32 %v3720_v42, %v4072_v56  ;;  %v443_v35 = vsub.f32 %v3725_v43, %v4074_v11 }
  0xe2   :  { %v2958_v28 = vpop.eup %2957  ;;  %2971 = vpow2.f32 %v546_v12 }
  0xe3   :  { %v2960_v26 = vpop.eup %2959  ;;  %v548_v27 = vmul.f32 1.442695, %v442_v34  ;;  %v550_v62 = vmul.f32 1.442695, %v443_v35  ;;  %v694_v3 = vsel %vm207_vm0, %v2958_v28, 0.0 }
  0xe4   :  { %692 = vadd.xlane.f32.xlu1 %v691_v10  ;;  %695 = vadd.xlane.f32.xlu0 %v694_v3  ;;  %v4082_v60 = vpop.xlane.xlu0 %341  ;;  %v4084_v19 = vpop.xlane.xlu1 %344  ;;  %v697_v18 = vsel %vm207_vm0, %v2960_v26, 0.0 }
  0xe5   :  { %7384 = vst [vmem:[#allocation38_spill] sm:$0xff] %v4082_v60  ;;  %7385 = vst [vmem:[#allocation39_spill] sm:$0xff] %v4084_v19  ;;  %2973 = vpow2.f32 %v548_v27  ;;  %v444_v42 = vsub.f32 %v3734_v50, %v4082_v60  ;;  %v445_v43 = vsub.f32 %v3739_v51, %v4084_v19  ;;  %v96_v60 = vld [vmem:[%s7103_s1 + $0x88] sm:$0xff] }
  0xe6   :  { %v2962_v12 = vpop.eup %2961  ;;  %2975 = vpow2.f32 %v550_v62 }
  0xe7   :  { %v2964_v34 = vpop.eup %2963  ;;  %v552_v35 = vmul.f32 1.442695, %v444_v42  ;;  %v554_v28 = vmul.f32 1.442695, %v445_v43  ;;  %v700_v10 = vsel %vm207_vm0, %v2962_v12, 0.0 }
  0xe8   :  { %698 = vadd.xlane.f32.xlu1 %v697_v18  ;;  %701 = vadd.xlane.f32.xlu0 %v700_v10  ;;  %v4092_v3 = vpop.xlane.xlu0 %347  ;;  %v4094_v27 = vpop.xlane.xlu1 %350  ;;  %v703_v26 = vsel %vm207_vm0, %v2964_v34, 0.0 }
  0xe9   :  { %7386 = vst [vmem:[#allocation40_spill] sm:$0xff] %v4092_v3  ;;  %7387 = vst [vmem:[#allocation41_spill] sm:$0xff] %v4094_v27  ;;  %2977 = vpow2.f32 %v552_v35  ;;  %v446_v50 = vsub.f32 %v3748_v58, %v4092_v3  ;;  %v447_v51 = vsub.f32 %v3753_v59, %v4094_v27  ;;  %v94_v27 = vld [vmem:[%s7103_s1 + $0x78] sm:$0xff] }
  0xea   :  { %v2966_v62 = vpop.eup %2965  ;;  %2979 = vpow2.f32 %v554_v28 }
  0xeb   :  { %v2968_v42 = vpop.eup %2967  ;;  %v556_v43 = vmul.f32 1.442695, %v446_v50  ;;  %v558_v12 = vmul.f32 1.442695, %v447_v51  ;;  %v706_v18 = vsel %vm207_vm0, %v2966_v62, 0.0 }
  0xec   :  { %704 = vadd.xlane.f32.xlu1 %v703_v26  ;;  %707 = vadd.xlane.f32.xlu0 %v706_v18  ;;  %v4102_v10 = vpop.xlane.xlu0 %353  ;;  %v4104_v35 = vpop.xlane.xlu1 %356  ;;  %v709_v34 = vsel %vm207_vm0, %v2968_v42, 0.0 }
  0xed   :  { %7388 = vst [vmem:[#allocation42_spill] sm:$0xff] %v4102_v10  ;;  %7389 = vst [vmem:[#allocation43_spill] sm:$0xff] %v4104_v35  ;;  %2981 = vpow2.f32 %v556_v43  ;;  %v448_v58 = vsub.f32 %v3762_v6, %v4102_v10  ;;  %v449_v59 = vsub.f32 %v3767_v7, %v4104_v35 }
  0xee   :  { %v2970_v28 = vpop.eup %2969  ;;  %2983 = vpow2.f32 %v558_v12 }
  0xef   :  { %v2972_v50 = vpop.eup %2971  ;;  %v560_v51 = vmul.f32 1.442695, %v448_v58  ;;  %v562_v62 = vmul.f32 1.442695, %v449_v59  ;;  %v712_v26 = vsel %vm207_vm0, %v2970_v28, 0.0 }
  0xf0   :  { %710 = vadd.xlane.f32.xlu1 %v709_v34  ;;  %713 = vadd.xlane.f32.xlu0 %v712_v26  ;;  %v4112_v18 = vpop.xlane.xlu0 %359  ;;  %v4114_v43 = vpop.xlane.xlu1 %362  ;;  %v715_v42 = vsel %vm207_vm0, %v2972_v50, 0.0 }
  0xf1   :  { %7390 = vst [vmem:[#allocation44_spill] sm:$0xff] %v4112_v18  ;;  %7391 = vst [vmem:[#allocation45_spill] sm:$0xff] %v4114_v43  ;;  %2985 = vpow2.f32 %v560_v51  ;;  %v450_v6 = vsub.f32 %v3776_v22, %v4112_v18  ;;  %v451_v7 = vsub.f32 %v3781_v23, %v4114_v43  ;;  %v7394_v22 = vld [vmem:[#allocation5_spill] sm:$0xff]  ;;  %v7395_v23 = vld [vmem:[#allocation6_spill] sm:$0xff] }
  0xf2   :  { %v2974_v12 = vpop.eup %2973  ;;  %2987 = vpow2.f32 %v562_v62 }
  0xf3   :  { %v2976_v58 = vpop.eup %2975  ;;  %v564_v59 = vmul.f32 1.442695, %v450_v6  ;;  %v566_v28 = vmul.f32 1.442695, %v451_v7  ;;  %v718_v34 = vsel %vm207_vm0, %v2974_v12, 0.0 }
  0xf4   :  { %716 = vadd.xlane.f32.xlu1 %v715_v42  ;;  %719 = vadd.xlane.f32.xlu0 %v718_v34  ;;  %v4122_v26 = vpop.xlane.xlu0 %365  ;;  %v4124_v51 = vpop.xlane.xlu1 %368  ;;  %v721_v62 = vsel %vm207_vm0, %v2976_v58, 0.0 }
  0xf5   :  { %7392 = vst [vmem:[#allocation46_spill] sm:$0xff] %v4122_v26  ;;  %7393 = vst [vmem:[#allocation47_spill] sm:$0xff] %v4124_v51  ;;  %2989 = vpow2.f32 %v564_v59  ;;  %v452_v18 = vsub.f32 %v7394_v22, %v4122_v26  ;;  %v453_v50 = vsub.f32 %v7395_v23, %v4124_v51  ;;  %v7398_v22 = vld [vmem:[#allocation7_spill] sm:$0xff]  ;;  %v7399_v23 = vld [vmem:[#allocation8_spill] sm:$0xff] }
  0xf6   :  { %v2978_v43 = vpop.eup %2977  ;;  %2991 = vpow2.f32 %v566_v28 }
  0xf7   :  { %v2980_v6 = vpop.eup %2979  ;;  %v568_v7 = vmul.f32 1.442695, %v452_v18  ;;  %v570_v12 = vmul.f32 1.442695, %v453_v50  ;;  %v724_v42 = vsel %vm207_vm0, %v2978_v43, 0.0 }
  0xf8   :  { %722 = vadd.xlane.f32.xlu1 %v721_v62  ;;  %725 = vadd.xlane.f32.xlu0 %v724_v42  ;;  %v4132_v34 = vpop.xlane.xlu0 %371  ;;  %v4134_v59 = vpop.xlane.xlu1 %374  ;;  %v727_v28 = vsel %vm207_vm0, %v2980_v6, 0.0 }
  0xf9   :  { %7396 = vst [vmem:[#allocation5_spill] sm:$0xff] %v4132_v34  ;;  %7397 = vst [vmem:[#allocation6_spill] sm:$0xff] %v4134_v59  ;;  %2993 = vpow2.f32 %v568_v7  ;;  %v454_v26 = vsub.f32 %v7398_v22, %v4132_v34  ;;  %v455_v58 = vsub.f32 %v7399_v23, %v4134_v59  ;;  %v7402_v22 = vld [vmem:[#allocation9_spill] sm:$0xff]  ;;  %v7403_v23 = vld [vmem:[#allocation10_spill] sm:$0xff] }
  0xfa   :  { %v2982_v51 = vpop.eup %2981  ;;  %2995 = vpow2.f32 %v570_v12 }
  0xfb   :  { %v2984_v18 = vpop.eup %2983  ;;  %v572_v50 = vmul.f32 1.442695, %v454_v26  ;;  %v574_v43 = vmul.f32 1.442695, %v455_v58  ;;  %v730_v62 = vsel %vm207_vm0, %v2982_v51, 0.0 }
  0xfc   :  { %728 = vadd.xlane.f32.xlu1 %v727_v28  ;;  %731 = vadd.xlane.f32.xlu0 %v730_v62  ;;  %v4142_v42 = vpop.xlane.xlu0 %377  ;;  %v4144_v7 = vpop.xlane.xlu1 %380  ;;  %v733_v12 = vsel %vm207_vm0, %v2984_v18, 0.0 }
  0xfd   :  { %7400 = vst [vmem:[#allocation7_spill] sm:$0xff] %v4142_v42  ;;  %7401 = vst [vmem:[#allocation8_spill] sm:$0xff] %v4144_v7  ;;  %2997 = vpow2.f32 %v572_v50  ;;  %v456_v34 = vsub.f32 %v7402_v22, %v4142_v42  ;;  %v457_v6 = vsub.f32 %v7403_v23, %v4144_v7  ;;  %v7406_v22 = vld [vmem:[#allocation11_spill] sm:$0xff]  ;;  %v7407_v23 = vld [vmem:[#allocation12_spill] sm:$0xff] }
  0xfe   :  { %v2986_v59 = vpop.eup %2985  ;;  %2999 = vpow2.f32 %v574_v43 }
  0xff   :  { %v2988_v26 = vpop.eup %2987  ;;  %v576_v58 = vmul.f32 1.442695, %v456_v34  ;;  %v578_v51 = vmul.f32 1.442695, %v457_v6  ;;  %v736_v28 = vsel %vm207_vm0, %v2986_v59, 0.0 }
 0x100   :  { %734 = vadd.xlane.f32.xlu1 %v733_v12  ;;  %737 = vadd.xlane.f32.xlu0 %v736_v28  ;;  %v4152_v62 = vpop.xlane.xlu0 %383  ;;  %v4154_v50 = vpop.xlane.xlu1 %386  ;;  %v739_v43 = vsel %vm207_vm0, %v2988_v26, 0.0 }
 0x101   :  { %7404 = vst [vmem:[#allocation9_spill] sm:$0xff] %v4152_v62  ;;  %7405 = vst [vmem:[#allocation10_spill] sm:$0xff] %v4154_v50  ;;  %3001 = vpow2.f32 %v576_v58  ;;  %v458_v42 = vsub.f32 %v7406_v22, %v4152_v62  ;;  %v459_v18 = vsub.f32 %v7407_v23, %v4154_v50  ;;  %v7410_v22 = vld [vmem:[#allocation13_spill] sm:$0xff]  ;;  %v7411_v23 = vld [vmem:[#allocation14_spill] sm:$0xff] }
 0x102   :  { %v2990_v7 = vpop.eup %2989  ;;  %3003 = vpow2.f32 %v578_v51 }
 0x103   :  { %v2992_v34 = vpop.eup %2991  ;;  %v580_v6 = vmul.f32 1.442695, %v458_v42  ;;  %v582_v59 = vmul.f32 1.442695, %v459_v18  ;;  %v742_v12 = vsel %vm207_vm0, %v2990_v7, 0.0 }
 0x104   :  { %740 = vadd.xlane.f32.xlu1 %v739_v43  ;;  %743 = vadd.xlane.f32.xlu0 %v742_v12  ;;  %v4162_v28 = vpop.xlane.xlu0 %389  ;;  %v4164_v58 = vpop.xlane.xlu1 %392  ;;  %v745_v51 = vsel %vm207_vm0, %v2992_v34, 0.0 }
 0x105   :  { %7408 = vst [vmem:[#allocation11_spill] sm:$0xff] %v4162_v28  ;;  %7409 = vst [vmem:[#allocation12_spill] sm:$0xff] %v4164_v58  ;;  %3005 = vpow2.f32 %v580_v6  ;;  %v460_v62 = vsub.f32 %v7410_v22, %v4162_v28  ;;  %v461_v26 = vsub.f32 %v7411_v23, %v4164_v58  ;;  %v7414_v22 = vld [vmem:[#allocation15_spill] sm:$0xff]  ;;  %v7415_v23 = vld [vmem:[#allocation16_spill] sm:$0xff] }
 0x106   :  { %v2994_v50 = vpop.eup %2993  ;;  %3007 = vpow2.f32 %v582_v59 }
 0x107   :  { %v2996_v42 = vpop.eup %2995  ;;  %v584_v18 = vmul.f32 1.442695, %v460_v62  ;;  %v586_v7 = vmul.f32 1.442695, %v461_v26  ;;  %v748_v43 = vsel %vm207_vm0, %v2994_v50, 0.0 }
 0x108   :  { %746 = vadd.xlane.f32.xlu1 %v745_v51  ;;  %749 = vadd.xlane.f32.xlu0 %v748_v43  ;;  %v4172_v12 = vpop.xlane.xlu0 %395  ;;  %v4174_v6 = vpop.xlane.xlu1 %398  ;;  %v751_v59 = vsel %vm207_vm0, %v2996_v42, 0.0 }
 0x109   :  { %7412 = vst [vmem:[#allocation13_spill] sm:$0xff] %v4172_v12  ;;  %7413 = vst [vmem:[#allocation14_spill] sm:$0xff] %v4174_v6  ;;  %3009 = vpow2.f32 %v584_v18  ;;  %v462_v28 = vsub.f32 %v7414_v22, %v4172_v12  ;;  %v463_v34 = vsub.f32 %v7415_v23, %v4174_v6  ;;  %v92_v6 = vld [vmem:[%s7103_s1 + $0x68] sm:$0xff] }
 0x10a   :  { %v2998_v58 = vpop.eup %2997  ;;  %3011 = vpow2.f32 %v586_v7 }
 0x10b   :  { %v3000_v62 = vpop.eup %2999  ;;  %v588_v26 = vmul.f32 1.442695, %v462_v28  ;;  %v590_v50 = vmul.f32 1.442695, %v463_v34  ;;  %v754_v51 = vsel %vm207_vm0, %v2998_v58, 0.0 }
 0x10c   :  { %752 = vadd.xlane.f32.xlu1 %v751_v59  ;;  %755 = vadd.xlane.f32.xlu0 %v754_v51  ;;  %v757_v18 = vsel %vm207_vm0, %v3000_v62, 0.0 }
 0x10d   :  { %3013 = vpow2.f32 %v588_v26 }
 0x10e   :  { %v3002_v43 = vpop.eup %3001  ;;  %3015 = vpow2.f32 %v590_v50 }
 0x10f   :  { %v3004_v22 = vpop.eup %3003  ;;  %v760_v12 = vsel %vm207_vm0, %v3002_v43, 0.0 }
 0x110   :  { %758 = vadd.xlane.f32.xlu1 %v757_v18  ;;  %761 = vadd.xlane.f32.xlu0 %v760_v12  ;;  %v763_v42 = vsel %vm207_vm0, %v3004_v22, 0.0 }
 0x112   :  { %v3006_v7 = vpop.eup %3005 }
 0x113   :  { %v3008_v23 = vpop.eup %3007  ;;  %v766_v28 = vsel %vm207_vm0, %v3006_v7, 0.0  ;;  %v4200_v7 = vld [vmem:[%s7103_s1 + $0x8] sm:$0xff] }
 0x114   :  { %764 = vadd.xlane.f32.xlu1 %v763_v42  ;;  %767 = vadd.xlane.f32.xlu0 %v766_v28  ;;  %v769_v58 = vsel %vm207_vm0, %v3008_v23, 0.0  ;;  %7416 = vst [vmem:[#allocation15_spill] sm:$0xff] %v4200_v7  ;;  %v4205_v23 = vld [vmem:[%s7103_s1] sm:$0xff] }
 0x115   :  { %7417 = vst [vmem:[#allocation16_spill] sm:$0xff] %v4205_v23 }
 0x116   :  { %v3010_v34 = vpop.eup %3009 }
 0x117   :  { %v3012_v59 = vpop.eup %3011  ;;  %v772_v62 = vsel %vm207_vm0, %v3010_v34, 0.0  ;;  %v4216_v34 = vld [vmem:[%s7103_s1 + $0x10] sm:$0xff] }
 0x118   :  { %770 = vadd.xlane.f32.xlu1 %v769_v58  ;;  %773 = vadd.xlane.f32.xlu0 %v772_v62  ;;  %v775_v26 = vsel %vm207_vm0, %v3012_v59, 0.0  ;;  %7418 = vst [vmem:[#allocation48_spill] sm:$0xff] %v4216_v34  ;;  %v88_v59 = vld [vmem:[%s7103_s1 + $0x48] sm:$0xff] }
 0x11a   :  { %v3014_v50 = vpop.eup %3013 }
 0x11b   :  { %v3016_v12 = vpop.eup %3015  ;;  %v778_v51 = vsel %vm207_vm0, %v3014_v50, 0.0  ;;  %v4229_v50 = vld [vmem:[%s7103_s1 + $0x18] sm:$0xff] }
 0x11c   :  { %776 = vadd.xlane.f32.xlu1 %v775_v26  ;;  %779 = vadd.xlane.f32.xlu0 %v778_v51  ;;  %v781_v18 = vsel %vm207_vm0, %v3016_v12, 0.0  ;;  %7419 = vst [vmem:[#allocation49_spill] sm:$0xff] %v4229_v50  ;;  %v90_v12 = vld [vmem:[%s7103_s1 + $0x58] sm:$0xff] }
 0x120   :  { %782 = vadd.xlane.f32.xlu1 %v781_v18 }
 0x129   :  { %v4191_v43 = vpop.xlane.xlu0 %593 }
 0x12a   :  { %3017 = vlog2.f32 %v4191_v43 }
 0x12d   :  { %v4193_v22 = vpop.xlane.xlu1 %596  ;;  %v4195_v42 = vpop.xlane.xlu0 %599 }
 0x12e   :  { %3019 = vlog2.f32 %v4193_v22 }
 0x12f   :  { %3021 = vlog2.f32 %v4195_v42 }
 0x131   :  { %1046 = vperm.xlu1 %2888, %v4200_v7   ;;  %v4208_v28 = vpop.xlane.xlu1 %602  ;;  %v4210_v58 = vpop.xlane.xlu0 %605  ;;  %v103_v7 = vld [vmem:[%s7103_s1 + $0xc0] sm:$0xff] }
 0x132   :  { %1043 = vperm.xlu0 %2887, %v4205_v23   ;;  %3023 = vlog2.f32 %v4208_v28  ;;  %v1040_v28 = vlaneseq }
 0x133   :  { %3025 = vlog2.f32 %v4210_v58 }
 0x135   :  { %1049 = vperm.xlu1 %2888, %v4216_v34   ;;  %v4222_v62 = vpop.xlane.xlu1 %608  ;;  %v4224_v26 = vpop.xlane.xlu0 %611 }
 0x136   :  { %1070 = vperm.xlu0 %2887, %v88_v59   ;;  %v4242_v59 = vld [vmem:[%s7103_s1 + $0x20] sm:$0xff]  ;;  %3027 = vlog2.f32 %v4222_v62 }
 0x137   :  { %7420 = vst [vmem:[#allocation50_spill] sm:$0xff] %v4242_v59  ;;  %3029 = vlog2.f32 %v4224_v26 }
 0x139   :  { %1052 = vperm.xlu1 %2888, %v4229_v50   ;;  %v4235_v51 = vpop.xlane.xlu1 %614  ;;  %v4237_v18 = vpop.xlane.xlu0 %617  ;;  %v99_v50 = vld [vmem:[%s7103_s1 + $0xa0] sm:$0xff] }
 0x13a   :  { %1076 = vperm.xlu0 %2887, %v90_v12   ;;  %v4255_v12 = vld [vmem:[%s7103_s1 + $0x28] sm:$0xff]  ;;  %3031 = vlog2.f32 %v4235_v51 }
 0x13b   :  { %7421 = vst [vmem:[#allocation51_spill] sm:$0xff] %v4255_v12 }
 0x13d   :  { %1055 = vperm.xlu1 %2888, %v4242_v59   ;;  %v4248_v35 = vpop.xlane.xlu1 %620  ;;  %v4250_v10 = vpop.xlane.xlu0 %623 }
 0x13e   :  { %1082 = vperm.xlu0 %2887, %v92_v6   ;;  %v4268_v6 = vld [vmem:[%s7103_s1 + $0x30] sm:$0xff]  ;;  %3033 = vlog2.f32 %v4248_v35 }
 0x13f   :  { %7422 = vst [vmem:[#allocation52_spill] sm:$0xff] %v4268_v6  ;;  %3035 = vlog2.f32 %v4237_v18  ;;  %v3275_v35 = vld [vmem:[%s7102_s0 + $0x10] sm:$0xff] }
 0x141   :  { %1058 = vperm.xlu1 %2888, %v4255_v12   ;;  %v4261_v3 = vpop.xlane.xlu1 %626  ;;  %v4263_v19 = vpop.xlane.xlu0 %629 }
 0x142   :  { %1088 = vperm.xlu0 %2887, %v94_v27   ;;  %v4281_v27 = vld [vmem:[%s7103_s1 + $0x38] sm:$0xff]  ;;  %3037 = vlog2.f32 %v4261_v3 }
 0x143   :  { %7423 = vst [vmem:[#allocation53_spill] sm:$0xff] %v4281_v27  ;;  %3039 = vlog2.f32 %v4250_v10 }
 0x144   :  { %3041 = vlog2.f32 %v4263_v19 }
 0x145   :  { %1061 = vperm.xlu1 %2888, %v4268_v6   ;;  %v4274_v11 = vpop.xlane.xlu1 %632  ;;  %v4276_v56 = vpop.xlane.xlu0 %635 }
 0x146   :  { %1094 = vperm.xlu0 %2887, %v96_v60   ;;  %v4294_v60 = vld [vmem:[%s7103_s1 + $0x40] sm:$0xff]  ;;  %3043 = vlog2.f32 %v4274_v11 }
 0x147   :  { %7424 = vst [vmem:[#allocation54_spill] sm:$0xff] %v4294_v60  ;;  %3045 = vlog2.f32 %v4276_v56  ;;  %v3282_v56 = vld [vmem:[%s7102_s0 + $0x40] sm:$0xff] }
 0x149   :  { %1064 = vperm.xlu1 %2888, %v4281_v27   ;;  %v4287_v52 = vpop.xlane.xlu1 %638  ;;  %v4289_v61 = vpop.xlane.xlu0 %641 }
 0x14a   :  { %1100 = vperm.xlu0 %2887, %v98_v4   ;;  %v4307_v4 = vld [vmem:[%s7103_s1 + $0x50] sm:$0xff]  ;;  %3047 = vlog2.f32 %v4287_v52 }
 0x14b   :  { %7425 = vst [vmem:[#allocation55_spill] sm:$0xff] %v4307_v4 }
 0x14d   :  { %1067 = vperm.xlu1 %2888, %v4294_v60   ;;  %v4300_v57 = vpop.xlane.xlu1 %644  ;;  %v4302_v44 = vpop.xlane.xlu0 %647 }
 0x14e   :  { %1106 = vperm.xlu0 %2887, %v100_v48   ;;  %v91_v48 = vld [vmem:[%s7103_s1 + $0x60] sm:$0xff] }
 0x151   :  { %1073 = vperm.xlu1 %2888, %v4307_v4   ;;  %v4313_v40 = vpop.xlane.xlu1 %650  ;;  %v4315_v49 = vpop.xlane.xlu0 %653  ;;  %v93_v4 = vld [vmem:[%s7103_s1 + $0x70] sm:$0xff] }
 0x152   :  { %1112 = vperm.xlu0 %2887, %v102_v53   ;;  %v106_v53 = vld [vmem:[%s7103_s1 + $0xd8] sm:$0xff] }
 0x155   :  { %1079 = vperm.xlu1 %2888, %v91_v48   ;;  %v4323_v45 = vpop.xlane.xlu1 %656  ;;  %v4325_v32 = vpop.xlane.xlu0 %659  ;;  %v95_v48 = vld [vmem:[%s7103_s1 + $0x80] sm:$0xff] }
 0x156   :  { %1118 = vperm.xlu0 %2887, %v104_v37   ;;  %v108_v37 = vld [vmem:[%s7103_s1 + $0xe8] sm:$0xff] }
 0x159   :  { %1085 = vperm.xlu1 %2888, %v93_v4   ;;  %v4333_v60 = vpop.xlane.xlu1 %662  ;;  %v4335_v27 = vpop.xlane.xlu0 %665  ;;  %v97_v4 = vld [vmem:[%s7103_s1 + $0x90] sm:$0xff] }
 0x15a   :  { %1124 = vperm.xlu0 %2887, %v106_v53  }
 0x15d   :  { %1091 = vperm.xlu1 %2888, %v95_v48   ;;  %v4343_v6 = vpop.xlane.xlu1 %668  ;;  %v4345_v12 = vpop.xlane.xlu0 %671 }
 0x15e   :  { %1130 = vperm.xlu0 %2887, %v108_v37   ;;  %v101_v37 = vld [vmem:[%s7103_s1 + $0xb0] sm:$0xff] }
 0x161   :  { %1097 = vperm.xlu1 %2888, %v97_v4   ;;  %v4350_v53 = vpop.xlane.xlu1 %674  ;;  %v4352_v59 = vpop.xlane.xlu0 %677 }
 0x165   :  { %1103 = vperm.xlu1 %2888, %v99_v50   ;;  %v4357_v48 = vpop.xlane.xlu1 %680  ;;  %v4359_v34 = vpop.xlane.xlu0 %683 }
 0x166   :  { %7426 = vst [vmem:[#allocation56_spill] sm:$0xff] %v4359_v34  ;;  %v105_v34 = vld [vmem:[%s7103_s1 + $0xd0] sm:$0xff] }
 0x169   :  { %1109 = vperm.xlu1 %2888, %v101_v37   ;;  %v4364_v23 = vpop.xlane.xlu1 %686  ;;  %v4366_v4 = vpop.xlane.xlu0 %689 }
 0x16a   :  { %7427 = vst [vmem:[#allocation57_spill] sm:$0xff] %v4364_v23  ;;  %7428 = vst [vmem:[#allocation58_spill] sm:$0xff] %v4366_v4  ;;  %v107_v4 = vld [vmem:[%s7103_s1 + $0xe0] sm:$0xff] }
 0x16d   :  { %1115 = vperm.xlu1 %2888, %v103_v7   ;;  %v4371_v41 = vpop.xlane.xlu1 %692  ;;  %v4373_v50 = vpop.xlane.xlu0 %695 }
 0x16e   :  { %7429 = vst [vmem:[#allocation59_spill] sm:$0xff] %v4371_v41  ;;  %7430 = vst [vmem:[#allocation60_spill] sm:$0xff] %v4373_v50 }
 0x171   :  { %1121 = vperm.xlu1 %2888, %v105_v34   ;;  %v4378_v29 = vpop.xlane.xlu1 %698  ;;  %v4380_v37 = vpop.xlane.xlu0 %701 }
 0x172   :  { %7431 = vst [vmem:[#allocation61_spill] sm:$0xff] %v4378_v29  ;;  %7432 = vst [vmem:[#allocation62_spill] sm:$0xff] %v4380_v37 }
 0x175   :  { %1127 = vperm.xlu1 %2888, %v107_v4   ;;  %v4385_v23 = vpop.xlane.xlu1 %704  ;;  %v4387_v7 = vpop.xlane.xlu0 %707 }
 0x176   :  { %7433 = vst [vmem:[#allocation63_spill] sm:$0xff] %v4385_v23  ;;  %7434 = vst [vmem:[#allocation64_spill] sm:$0xff] %v4387_v7 }
 0x179   :  { %v4389_v41 = vpop.xlane.xlu1 %710  ;;  %v4391_v50 = vpop.xlane.xlu0 %713 }
 0x17a   :  { %7435 = vst [vmem:[#allocation65_spill] sm:$0xff] %v4389_v41  ;;  %7436 = vst [vmem:[#allocation66_spill] sm:$0xff] %v4391_v50 }
 0x17d   :  { %v4393_v24 = vpop.xlane.xlu1 %716  ;;  %v4395_v34 = vpop.xlane.xlu0 %719 }
 0x17e   :  { %7437 = vst [vmem:[#allocation67_spill] sm:$0xff] %v4393_v24 }
 0x181   :  { %v4397_v29 = vpop.xlane.xlu1 %722  ;;  %v4399_v37 = vpop.xlane.xlu0 %725 }
 0x182   :  { %7438 = vst [vmem:[#allocation68_spill] sm:$0xff] %v4399_v37 }
 0x185   :  { %v4401_v1 = vpop.xlane.xlu1 %728  ;;  %v4403_v33 = vpop.xlane.xlu0 %731 }
 0x186   :  { %7439 = vst [vmem:[#allocation69_spill] sm:$0xff] %v4401_v1  ;;  %7440 = vst [vmem:[#allocation70_spill] sm:$0xff] %v4403_v33 }
 0x189   :  { %v4405_v4 = vpop.xlane.xlu1 %734  ;;  %v4407_v23 = vpop.xlane.xlu0 %737 }
 0x18a   :  { %7441 = vst [vmem:[#allocation71_spill] sm:$0xff] %v4405_v4  ;;  %7442 = vst [vmem:[#allocation72_spill] sm:$0xff] %v4407_v23 }
 0x18d   :  { %v4409_v7 = vpop.xlane.xlu1 %740  ;;  %v4411_v41 = vpop.xlane.xlu0 %743 }
 0x18e   :  { %7443 = vst [vmem:[#allocation73_spill] sm:$0xff] %v4409_v7  ;;  %7444 = vst [vmem:[#allocation74_spill] sm:$0xff] %v4411_v41 }
 0x191   :  { %v4413_v50 = vpop.xlane.xlu1 %746  ;;  %v4415_v24 = vpop.xlane.xlu0 %749 }
 0x192   :  { %7445 = vst [vmem:[#allocation75_spill] sm:$0xff] %v4413_v50  ;;  %7446 = vst [vmem:[#allocation76_spill] sm:$0xff] %v4415_v24  ;;  %v3018_v24 = vpop.eup %3017  ;;  %3049 = vlog2.f32 %v4289_v61 }
 0x193   :  { %v3020_v22 = vpop.eup %3019  ;;  %3051 = vlog2.f32 %v4300_v57 }
 0x194   :  { %v787_v42 = vmul.f32 0.6931472, %v3020_v22 }
 0x195   :  { %v4419_v37 = vpop.xlane.xlu1 %752  ;;  %v4421_v1 = vpop.xlane.xlu0 %755 }
 0x196   :  { %7447 = vst [vmem:[#allocation77_spill] sm:$0xff] %v4419_v37  ;;  %7448 = vst [vmem:[#allocation78_spill] sm:$0xff] %v4421_v1  ;;  %v785_v1 = vmul.f32 0.6931472, %v3018_v24  ;;  %v913_v58 = vadd.f32 %v787_v42, %v3879_v39  ;;  %v4448_v24 = vand.u32 127, %v1040_v28  ;;  %v3274_v39 = vld [vmem:[%s7102_s0] sm:$0xff] }
 0x199   :  { %v4424_v4 = vpop.xlane.xlu1 %758  ;;  %v4426_v23 = vpop.xlane.xlu0 %761 }
 0x19a   :  { %7449 = vst [vmem:[#allocation79_spill] sm:$0xff] %v4424_v4  ;;  %7450 = vst [vmem:[#allocation80_spill] sm:$0xff] %v4426_v23  ;;  %v3022_v23 = vpop.eup %3021  ;;  %3053 = vlog2.f32 %v4302_v44 }
 0x19b   :  { %v789_v7 = vmul.f32 0.6931472, %v3022_v23  ;;  %v3273_v23 = vld [vmem:[%s7102_s0 + $0x8] sm:$0xff] }
 0x19c   :  { %v977_v26 = vsub.f32 %v3273_v23, %v913_v58 }
 0x19d   :  { %v4429_v41 = vpop.xlane.xlu1 %764  ;;  %v4431_v50 = vpop.xlane.xlu0 %767 }
 0x19e   :  { %7451 = vst [vmem:[#allocation81_spill] sm:$0xff] %v4429_v41  ;;  %7452 = vst [vmem:[#allocation82_spill] sm:$0xff] %v4431_v50 }
 0x1a1   :  { %v4434_v43 = vpop.xlane.xlu1 %770  ;;  %v4436_v37 = vpop.xlane.xlu0 %773 }
 0x1a2   :  { %7453 = vst [vmem:[#allocation83_spill] sm:$0xff] %v4434_v43  ;;  %7454 = vst [vmem:[#allocation84_spill] sm:$0xff] %v4436_v37  ;;  %v7456_v43 = vld [vmem:[#allocation17_spill] sm:$0xff]  ;;  %v3024_v37 = vpop.eup %3023  ;;  %3055 = vlog2.f32 %v4313_v40 }
 0x1a3   :  { %v912_v33 = vadd.f32 %v785_v1, %v7456_v43  ;;  %7457 = vst [vmem:[#allocation17_spill] sm:$0xff] %v4448_v24  ;;  %v791_v62 = vmul.f32 0.6931472, %v3024_v37  ;;  %v914_v43 = vadd.f32 %v789_v7, %v3873_v15  ;;  %v3026_v42 = vpop.eup %3025  ;;  %3057 = vlog2.f32 %v4315_v49 }
 0x1a4   :  { %v793_v7 = vmul.f32 0.6931472, %v3026_v42 }
 0x1a5   :  { %v4439_v4 = vpop.xlane.xlu1 %776  ;;  %v4442_v50 = vpop.xlane.xlu0 %779  ;;  %v976_v1 = vsub.f32 %v3274_v39, %v912_v33  ;;  %v978_v58 = vsub.f32 %v3275_v35, %v914_v43  ;;  %v915_v23 = vadd.f32 %v791_v62, %v3881_v47  ;;  %v3276_v47 = vld [vmem:[%s7102_s0 + $0x18] sm:$0xff]  ;;  %v3277_v35 = vld [vmem:[%s7102_s0 + $0x20] sm:$0xff] }
 0x1a6   :  { %7455 = vst [vmem:[#allocation85_spill] sm:$0xff] %v4439_v4  ;;  %v916_v43 = vadd.f32 %v793_v7, %v3887_v0 }
 0x1a7   :  { %v979_v62 = vsub.f32 %v3276_v47, %v915_v23 }
 0x1a8   :  { %v980_v0 = vsub.f32 %v3277_v35, %v916_v43 }
 0x1a9   :  { %v4444_v41 = vpop.xlane.xlu1 %782 }
 0x1ad   :  { %v4451_v22 = vpop.permute.xlu1 %1046  ;;  %v4453_v4 = vpop.permute.xlu0 %1043 }
 0x1ae   :  { %vm1235_vm1 = vcmp.eq.s32.totalorder %v4448_v24, %v4451_v22  ;;  %vm1234_vm2 = vcmp.eq.s32.totalorder %v4448_v24, %v4453_v4  ;;  %v3286_v4 = vld [vmem:[%s7102_s0 + $0x68] sm:$0xff] }
 0x1af   :  { %v1299_v51 = vsel %vm1235_vm1, %v977_v26, 0.0  ;;  %v1298_v37 = vsel %vm1234_vm2, %v976_v1, 0.0  ;;  %v3028_v26 = vpop.eup %3027  ;;  %3059 = vlog2.f32 %v4323_v45 }
 0x1b0   :  { %v1365_v33 = vsel %vm207_vm0, %v1299_v51, 0.0  ;;  %v1362_v15 = vsel %vm207_vm0, %v1298_v37, 0.0  ;;  %v795_v1 = vmul.f32 0.6931472, %v3028_v26  ;;  %v3030_v3 = vpop.eup %3029  ;;  %3061 = vlog2.f32 %v4325_v32 }
 0x1b1   :  { %1366 = vadd.xlane.f32.xlu1 %v1365_v33  ;;  %v4476_v28 = vpop.permute.xlu1 %1049  ;;  %1363 = vadd.xlane.f32.xlu0 %v1362_v15  ;;  %v3032_v37 = vpop.eup %3031  ;;  %v797_v33 = vmul.f32 0.6931472, %v3030_v3  ;;  %3063 = vlog2.f32 %v4333_v60 }
 0x1b2   :  { %vm1236_vm3 = vcmp.eq.s32.totalorder %v4448_v24, %v4476_v28  ;;  %v917_v7 = vadd.f32 %v795_v1, %v3889_v14  ;;  %v3034_v23 = vpop.eup %3033  ;;  %v3278_v14 = vld [vmem:[%s7102_s0 + $0x28] sm:$0xff]  ;;  %3065 = vlog2.f32 %v4335_v27 }
 0x1b3   :  { %v1300_v18 = vsel %vm1236_vm3, %v978_v58, 0.0  ;;  %v7458_v1 = vld [vmem:[#allocation18_spill] sm:$0xff]  ;;  %v803_v11 = vmul.f32 0.6931472, %v3034_v23 }
 0x1b4   :  { %v1368_v39 = vsel %vm207_vm0, %v1300_v18, 0.0  ;;  %v799_v18 = vmul.f32 0.6931472, %v3032_v37  ;;  %v981_v19 = vsub.f32 %v3278_v14, %v917_v7  ;;  %v918_v47 = vadd.f32 %v797_v33, %v7458_v1  ;;  %v4528_v37 = vpop.permute.xlu0 %1070  ;;  %v3279_v33 = vld [vmem:[%s7102_s0 + $0x30] sm:$0xff] }
 0x1b5   :  { %v4490_v42 = vpop.permute.xlu1 %1052  ;;  %1369 = vadd.xlane.f32.xlu0 %v1368_v39  ;;  %v921_v14 = vadd.f32 %v803_v11, %v3905_v9  ;;  %vm1243_vm8 = vcmp.eq.s32.totalorder %v4448_v24, %v4528_v37 }
 0x1b6   :  { %vm1237_vm4 = vcmp.eq.s32.totalorder %v4448_v24, %v4490_v42  ;;  %v919_v7 = vadd.f32 %v799_v18, %v3897_v5  ;;  %v3280_v5 = vld [vmem:[%s7102_s0 + $0x38] sm:$0xff] }
 0x1b7   :  { %v1301_v51 = vsel %vm1237_vm4, %v979_v62, 0.0  ;;  %v3036_v62 = vpop.eup %3035  ;;  %3067 = vlog2.f32 %v4343_v6 }
 0x1b8   :  { %v1371_v10 = vsel %vm207_vm0, %v1301_v51, 0.0  ;;  %v3038_v3 = vpop.eup %3037  ;;  %v983_v18 = vsub.f32 %v3280_v5, %v919_v7  ;;  %v4554_v11 = vpop.permute.xlu0 %1076  ;;  %3069 = vlog2.f32 %v4345_v12 }
 0x1b9   :  { %v4502_v15 = vpop.permute.xlu1 %1055  ;;  %1372 = vadd.xlane.f32.xlu0 %v1371_v10  ;;  %v801_v10 = vmul.f32 0.6931472, %v3036_v62  ;;  %v807_v23 = vmul.f32 0.6931472, %v3038_v3  ;;  %v3281_v3 = vld [vmem:[%s7102_s0 + $0x48] sm:$0xff]  ;;  %vm1245_vm10 = vcmp.eq.s32.totalorder %v4448_v24, %v4554_v11 }
 0x1ba   :  { %vm1238_vm5 = vcmp.eq.s32.totalorder %v4448_v24, %v4502_v15 }
 0x1bb   :  { %v1302_v58 = vsel %vm1238_vm5, %v980_v0, 0.0  ;;  %v982_v0 = vsub.f32 %v3279_v33, %v918_v47  ;;  %v920_v47 = vadd.f32 %v801_v10, %v3903_v63  ;;  %v985_v63 = vsub.f32 %v3281_v3, %v921_v14  ;;  %v4598_v3 = vld [vmem:[%s7104_s2] ss:$0 sm:$0xff] }
 0x1bc   :  { %v1374_v26 = vsel %vm207_vm0, %v1302_v58, 0.0  ;;  %v3040_v58 = vpop.eup %3039  ;;  %v1945_v52 = vsel %vm1234_vm2, %v4598_v3, 0.0  ;;  %v1948_v28 = vsel %vm1237_vm4, %v4598_v3, 0.0  ;;  %v1954_v45 = vsel %vm1243_vm8, %v4598_v3, 0.0 }
 0x1bd   :  { %v4516_v39 = vpop.permute.xlu1 %1058  ;;  %1375 = vadd.xlane.f32.xlu1 %v1374_v26  ;;  %v805_v1 = vmul.f32 0.6931472, %v3040_v58  ;;  %v3042_v9 = vpop.eup %3041  ;;  %v984_v7 = vsub.f32 %v3282_v56, %v920_v47  ;;  %v1307_v58 = vsel %vm1243_vm8, %v985_v63, 0.0  ;;  %v3284_v47 = vld [vmem:[%s7102_s0 + $0x50] sm:$0xff]  ;;  %v2018_v42 = vsel %vm207_vm0, %v1948_v28, 0.0 }
 0x1be   :  { %vm1239_vm6 = vcmp.eq.s32.totalorder %v4448_v24, %v4516_v39  ;;  %v3044_v10 = vpop.eup %3043  ;;  %v4601_v63 = vpop.permute.xlu0 %1082  ;;  %v3287_v39 = vld [vmem:[%s7102_s0 + $0x70] sm:$0xff]  ;;  %v1956_v60 = vsel %vm1245_vm10, %v4598_v3, 0.0  ;;  %3071 = vlog2.f32 %v4350_v53 }
 0x1bf   :  { %v1303_v43 = vsel %vm1239_vm6, %v981_v19, 0.0  ;;  %vm1247_vm13 = vcmp.eq.s32.totalorder %v4448_v24, %v4601_v63  ;;  %v3046_v22 = vpop.eup %3045  ;;  %3073 = vlog2.f32 %v4352_v59 }
 0x1c0   :  { %v1377_v51 = vsel %vm207_vm0, %v1303_v43, 0.0  ;;  %v1958_v6 = vsel %vm1247_vm13, %v4598_v3, 0.0  ;;  %3075 = vlog2.f32 %v4357_v48 }
 0x1c1   :  { %v4530_v35 = vpop.permute.xlu1 %1061  ;;  %1378 = vadd.xlane.f32.xlu0 %v1377_v51  ;;  %v923_v51 = vadd.f32 %v807_v23, %v3914_v31  ;;  %v809_v31 = vmul.f32 0.6931472, %v3042_v9  ;;  %v811_v23 = vmul.f32 0.6931472, %v3044_v10 }
 0x1c2   :  { %vm1240_vm7 = vcmp.eq.s32.totalorder %v4448_v24, %v4530_v35 }
 0x1c3   :  { %v1304_v26 = vsel %vm1240_vm7, %v982_v0, 0.0  ;;  %v924_v10 = vadd.f32 %v809_v31, %v3922_v13  ;;  %v1946_v13 = vsel %vm1235_vm1, %v4598_v3, 0.0  ;;  %v1951_v44 = vsel %vm1240_vm7, %v4598_v3, 0.0 }
 0x1c4   :  { %v1380_v19 = vsel %vm207_vm0, %v1304_v26, 0.0  ;;  %v922_v26 = vadd.f32 %v805_v1, %v3912_v2  ;;  %v1389_v2 = vsel %vm207_vm0, %v1307_v58, 0.0 }
 0x1c5   :  { %v4543_v62 = vpop.permute.xlu1 %1064  ;;  %1381 = vadd.xlane.f32.xlu1 %v1380_v19  ;;  %v3283_v19 = vld [vmem:[%s7102_s0 + $0x58] sm:$0xff] }
 0x1c6   :  { %vm1241_vm9 = vcmp.eq.s32.totalorder %v4448_v24, %v4543_v62  ;;  %v987_v5 = vsub.f32 %v3283_v19, %v923_v51  ;;  %v986_v9 = vsub.f32 %v3284_v47, %v922_v26  ;;  %v1947_v47 = vsel %vm1236_vm3, %v4598_v3, 0.0 }
 0x1c7   :  { %v1305_v43 = vsel %vm1241_vm9, %v983_v18, 0.0  ;;  %v1952_v40 = vsel %vm1241_vm9, %v4598_v3, 0.0  ;;  %v1949_v62 = vsel %vm1238_vm5, %v4598_v3, 0.0 }
 0x1c8   :  { %v1383_v33 = vsel %vm207_vm0, %v1305_v43, 0.0  ;;  %v1309_v43 = vsel %vm1245_vm10, %v987_v5, 0.0  ;;  %v813_v5 = vmul.f32 0.6931472, %v3046_v22  ;;  %v2030_v22 = vsel %vm207_vm0, %v1952_v40, 0.0 }
 0x1c9   :  { %v4564_v0 = vpop.permute.xlu1 %1067  ;;  %1384 = vadd.xlane.f32.xlu0 %v1383_v33  ;;  %v925_v33 = vadd.f32 %v811_v23, %v3924_v55  ;;  %v3285_v55 = vld [vmem:[%s7102_s0 + $0x60] sm:$0xff]  ;;  %v2009_v23 = vsel %vm207_vm0, %v1945_v52, 0.0  ;;  %v2027_v52 = vsel %vm207_vm0, %v1951_v44, 0.0  ;;  %v3290_v44 = vld [vmem:[%s7102_s0 + $0x88] sm:$0xff] }
 0x1ca   :  { %vm1242_vm11 = vcmp.eq.s32.totalorder %v4448_v24, %v4564_v0  ;;  %v988_v26 = vsub.f32 %v3285_v55, %v924_v10  ;;  %v926_v57 = vadd.f32 %v813_v5, %v3932_v54  ;;  %v2015_v10 = vsel %vm207_vm0, %v1947_v47, 0.0  ;;  %v4680_v55 = vpop.permute.xlu0 %1088  ;;  %v3289_v47 = vld [vmem:[%s7102_s0 + $0x80] sm:$0xff] }
 0x1cb   :  { %v1306_v14 = vsel %vm1242_vm11, %v984_v7, 0.0  ;;  %v1395_v7 = vsel %vm207_vm0, %v1309_v43, 0.0  ;;  %v989_v31 = vsub.f32 %v3286_v4, %v925_v33  ;;  %v1953_v49 = vsel %vm1242_vm11, %v4598_v3, 0.0 }
 0x1cc   :  { %v1386_v18 = vsel %vm207_vm0, %v1306_v14, 0.0  ;;  %v2012_v14 = vsel %vm207_vm0, %v1946_v13, 0.0  ;;  %vm1249_vm1 = vcmp.eq.s32.totalorder %v4448_v24, %v4680_v55  ;;  %v2021_v5 = vsel %vm207_vm0, %v1949_v62, 0.0  ;;  %v3292_v62 = vld [vmem:[%s7102_s0 + $0x98] sm:$0xff] }
 0x1cd   :  { %v4585_v1 = vpop.permute.xlu1 %1073  ;;  %1387 = vadd.xlane.f32.xlu1 %v1386_v18  ;;  %1390 = vadd.xlane.f32.xlu0 %v1389_v2  ;;  %v1311_v19 = vsel %vm1247_vm13, %v989_v31, 0.0  ;;  %v2033_v0 = vsel %vm207_vm0, %v1953_v49, 0.0  ;;  %v1960_v53 = vsel %vm1249_vm1, %v4598_v3, 0.0 }
 0x1ce   :  { %vm1244_vm12 = vcmp.eq.s32.totalorder %v4448_v24, %v4585_v1  ;;  %v1401_v2 = vsel %vm207_vm0, %v1311_v19, 0.0 }
 0x1cf   :  { %v1308_v51 = vsel %vm1244_vm12, %v986_v9, 0.0  ;;  %v1950_v9 = vsel %vm1239_vm6, %v4598_v3, 0.0  ;;  %v1955_v32 = vsel %vm1244_vm12, %v4598_v3, 0.0 }
 0x1d0   :  { %v1392_v56 = vsel %vm207_vm0, %v1308_v51, 0.0  ;;  %v3048_v51 = vpop.eup %3047  ;;  %v2024_v33 = vsel %vm207_vm0, %v1950_v9, 0.0 }
 0x1d1   :  { %v4610_v58 = vpop.permute.xlu1 %1079  ;;  %1393 = vadd.xlane.f32.xlu0 %v1392_v56  ;;  %1396 = vadd.xlane.f32.xlu1 %v1395_v7  ;;  %v815_v54 = vmul.f32 0.6931472, %v3048_v51  ;;  %v990_v56 = vsub.f32 %v3287_v39, %v926_v57  ;;  %v3050_v7 = vpop.eup %3049  ;;  %v2036_v51 = vsel %vm207_vm0, %v1954_v45, 0.0 }
 0x1d2   :  { %vm1246_vm14 = vcmp.eq.s32.totalorder %v4448_v24, %v4610_v58  ;;  %v817_v13 = vmul.f32 0.6931472, %v3050_v7  ;;  %v3052_v4 = vpop.eup %3051 }
 0x1d3   :  { %v1310_v61 = vsel %vm1246_vm14, %v988_v26, 0.0  ;;  %v927_v26 = vadd.f32 %v815_v54, %v3934_v38  ;;  %v819_v38 = vmul.f32 0.6931472, %v3052_v4  ;;  %v3054_v19 = vpop.eup %3053  ;;  %v1957_v27 = vsel %vm1246_vm14, %v4598_v3, 0.0 }
 0x1d4   :  { %v1398_v18 = vsel %vm207_vm0, %v1310_v61, 0.0  ;;  %v928_v15 = vadd.f32 %v817_v13, %v3942_v17  ;;  %v821_v17 = vmul.f32 0.6931472, %v3054_v19  ;;  %v3056_v57 = vpop.eup %3055 }
 0x1d5   :  { %2010 = vadd.xlane.f32.xlu0 %v2009_v23  ;;  %2013 = vadd.xlane.f32.xlu1 %v2012_v14  ;;  %v4651_v43 = vpop.permute.xlu1 %1085  ;;  %v3288_v14 = vld [vmem:[%s7102_s0 + $0x78] sm:$0xff]  ;;  %v929_v37 = vadd.f32 %v819_v38, %v3944_v16  ;;  %v823_v16 = vmul.f32 0.6931472, %v3056_v57  ;;  %v3058_v39 = vpop.eup %3057 }
 0x1d6   :  { %vm1248_vm15 = vcmp.eq.s32.totalorder %v4448_v24, %v4651_v43  ;;  %v991_v61 = vsub.f32 %v3288_v14, %v927_v26  ;;  %v992_v9 = vsub.f32 %v3289_v47, %v928_v15  ;;  %v930_v1 = vadd.f32 %v821_v17, %v3952_v30  ;;  %v3060_v13 = vpop.eup %3059 }
 0x1d7   :  { %v1312_v35 = vsel %vm1248_vm15, %v990_v56, 0.0  ;;  %v993_v54 = vsub.f32 %v3290_v44, %v929_v37  ;;  %v2039_v56 = vsel %vm207_vm0, %v1955_v32, 0.0  ;;  %v825_v30 = vmul.f32 0.6931472, %v3058_v39  ;;  %v3062_v38 = vpop.eup %3061  ;;  %v3294_v37 = vld [vmem:[%s7102_s0 + $0xa8] sm:$0xff]  ;;  %v3295_v44 = vld [vmem:[%s7102_s0 + $0xb0] sm:$0xff] }
 0x1d8   :  { %v1404_v31 = vsel %vm207_vm0, %v1312_v35, 0.0  ;;  %v3291_v35 = vld [vmem:[%s7102_s0 + $0x90] sm:$0xff]  ;;  %v931_v11 = vadd.f32 %v823_v16, %v3954_v21  ;;  %v2042_v26 = vsel %vm207_vm0, %v1956_v60, 0.0  ;;  %v827_v21 = vmul.f32 0.6931472, %v3060_v13  ;;  %v3064_v45 = vpop.eup %3063 }
 0x1d9   :  { %1399 = vadd.xlane.f32.xlu0 %v1398_v18  ;;  %1402 = vadd.xlane.f32.xlu1 %v1401_v2  ;;  %v4696_v23 = vpop.permute.xlu1 %1091  ;;  %v1313_v18 = vsel %vm1249_vm1, %v991_v61, 0.0  ;;  %v4714_v2 = vpop.permute.xlu0 %1094  ;;  %v994_v40 = vsub.f32 %v3291_v35, %v930_v1  ;;  %v932_v58 = vadd.f32 %v825_v30, %v3962_v25  ;;  %v2045_v14 = vsel %vm207_vm0, %v1957_v27, 0.0 }
 0x1da   :  { %vm1250_vm2 = vcmp.eq.s32.totalorder %v4448_v24, %v4696_v23  ;;  %vm1251_vm3 = vcmp.eq.s32.totalorder %v4448_v24, %v4714_v2  ;;  %v995_v49 = vsub.f32 %v3292_v62, %v931_v11  ;;  %v829_v25 = vmul.f32 0.6931472, %v3062_v38 }
 0x1db   :  { %v933_v63 = vadd.f32 %v827_v21, %v3964_v36  ;;  %v1959_v12 = vsel %vm1248_vm15, %v4598_v3, 0.0  ;;  %v831_v36 = vmul.f32 0.6931472, %v3064_v45  ;;  %v2054_v39 = vsel %vm207_vm0, %v1960_v53, 0.0  ;;  %v3300_v53 = vld [vmem:[%s7102_s0 + $0xd8] sm:$0xff] }
 0x1dc   :  { %v934_v43 = vadd.f32 %v829_v25, %v3972_v8  ;;  %v1961_v59 = vsel %vm1250_vm2, %v4598_v3, 0.0  ;;  %v1962_v48 = vsel %vm1251_vm3, %v4598_v3, 0.0  ;;  %v7463_v25 = vld [vmem:[#allocation20_spill] sm:$0xff] }
 0x1dd   :  { %2016 = vadd.xlane.f32.xlu0 %v2015_v10  ;;  %2025 = vadd.xlane.f32.xlu1 %v2024_v33  ;;  %v1407_v10 = vsel %vm207_vm0, %v1313_v18, 0.0  ;;  %v1314_v33 = vsel %vm1250_vm2, %v992_v9, 0.0  ;;  %v4732_v28 = vpop.permute.xlu1 %1097  ;;  %v2048_v18 = vsel %vm207_vm0, %v1958_v6, 0.0  ;;  %v997_v57 = vsub.f32 %v3294_v37, %v933_v63  ;;  %v3298_v6 = vld [vmem:[%s7102_s0 + $0xc8] sm:$0xff] }
 0x1de   :  { %v1410_v7 = vsel %vm207_vm0, %v1314_v33, 0.0  ;;  %vm1252_vm4 = vcmp.eq.s32.totalorder %v4448_v24, %v4732_v28  ;;  %v935_v55 = vadd.f32 %v831_v36, %v3974_v46  ;;  %v2060_v2 = vsel %vm207_vm0, %v1962_v48, 0.0  ;;  %v7465_v36 = vld [vmem:[#allocation21_spill] sm:$0xff] }
 0x1df   :  { %v4939_v48 = vld [vmem:[%s7103_s1 + $0x100] sm:$0xff] }
 0x1e0   :  { %7471 = vst [vmem:[#allocation87_spill] sm:$0xff] %v4939_v48 }
 0x1e1   :  { %2019 = vadd.xlane.f32.xlu0 %v2018_v42  ;;  %2028 = vadd.xlane.f32.xlu1 %v2027_v52  ;;  %v1315_v42 = vsel %vm1251_vm3, %v993_v54, 0.0  ;;  %v4750_v52 = vpop.permute.xlu0 %1100  ;;  %v998_v54 = vsub.f32 %v3295_v44, %v934_v43  ;;  %vm2393_vm3 = vcmask 7168  }
 0x1e2   :  { %v1413_v4 = vsel %vm207_vm0, %v1315_v42, 0.0  ;;  %vm1253_vm5 = vcmp.eq.s32.totalorder %v4448_v24, %v4750_v52  ;;  %v3296_v42 = vld [vmem:[%s7102_s0 + $0xb8] sm:$0xff] }
 0x1e3   :  { %v1317_v15 = vsel %vm1253_vm5, %v995_v49, 0.0  ;;  %v999_v30 = vsub.f32 %v3296_v42, %v935_v55 }
 0x1e4   :  { %v1419_v17 = vsel %vm207_vm0, %v1317_v15, 0.0 }
 0x1e5   :  { %1405 = vadd.xlane.f32.xlu0 %v1404_v31  ;;  %2031 = vadd.xlane.f32.xlu1 %v2030_v22  ;;  %v1316_v31 = vsel %vm1252_vm4, %v994_v40, 0.0  ;;  %v4768_v22 = vpop.permute.xlu1 %1103  ;;  %v4786_v19 = vpop.permute.xlu0 %1106  ;;  %v2057_v40 = vsel %vm207_vm0, %v1961_v59, 0.0  ;;  %v7469_v59 = vld [vmem:[#allocation23_spill] sm:$0xff] }
 0x1e6   :  { %v1416_v61 = vsel %vm207_vm0, %v1316_v31, 0.0  ;;  %vm1254_vm6 = vcmp.eq.s32.totalorder %v4448_v24, %v4768_v22  ;;  %vm1255_vm7 = vcmp.eq.s32.totalorder %v4448_v24, %v4786_v19  ;;  %v7461_v31 = vld [vmem:[#allocation19_spill] sm:$0xff] }
 0x1e7   :  { %v1319_v33 = vsel %vm1255_vm7, %v997_v57, 0.0  ;;  %v7551_v22 = vld [vmem:[#allocation63_spill] sm:$0xff] }
 0x1e9   :  { %2022 = vadd.xlane.f32.xlu0 %v2021_v5  ;;  %2034 = vadd.xlane.f32.xlu1 %v2033_v0  ;;  %v3293_v5 = vld [vmem:[%s7102_s0 + $0xa0] sm:$0xff]  ;;  %v4804_v9 = vpop.permute.xlu1 %1109  ;;  %v4822_v16 = vpop.permute.xlu0 %1112 }
 0x1ea   :  { %v996_v0 = vsub.f32 %v3293_v5, %v932_v58  ;;  %vm1256_vm8 = vcmp.eq.s32.totalorder %v4448_v24, %v4804_v9  ;;  %vm1257_vm9 = vcmp.eq.s32.totalorder %v4448_v24, %v4822_v16  ;;  %v1963_v58 = vsel %vm1252_vm4, %v4598_v3, 0.0  ;;  %v5929_v16 = vld [vmem:[%s7102_s0 + $0x1c8] sm:$0xff] }
 0x1eb   :  { %v1321_v13 = vsel %vm1257_vm9, %v999_v30, 0.0  ;;  %v2063_v28 = vsel %vm207_vm0, %v1963_v58, 0.0  ;;  %v4926_v30 = vld [vmem:[%s7103_s1 + $0xf0] sm:$0xff]  ;;  %v7475_v58 = vld [vmem:[#allocation48_spill] sm:$0xff] }
 0x1ec   :  { %v1318_v47 = vsel %vm1254_vm6, %v996_v0, 0.0  ;;  %v1431_v49 = vsel %vm207_vm0, %v1321_v13, 0.0  ;;  %7470 = vst [vmem:[#allocation23_spill] sm:$0xff] %v4926_v30  ;;  %vm7180_vm4 = vcmp.ne.s32.totalorder %v7475_v58, 4294967196 }
 0x1ed   :  { %2037 = vadd.xlane.f32.xlu1 %v2036_v51  ;;  %1408 = vadd.xlane.f32.xlu0 %v1407_v10  ;;  %v3066_v51 = vpop.eup %3065  ;;  %v2051_v10 = vsel %vm207_vm0, %v1959_v12, 0.0  ;;  %v1422_v32 = vsel %vm207_vm0, %v1318_v47, 0.0  ;;  %v4840_v60 = vpop.permute.xlu1 %1115  ;;  %v3299_v12 = vld [vmem:[%s7102_s0 + $0xd0] sm:$0xff] }
 0x1ee   :  { %v833_v8 = vmul.f32 0.6931472, %v3066_v51  ;;  %v3068_v1 = vpop.eup %3067  ;;  %7459 = vst [vmem:[#allocation18_spill] sm:$0xff] %v4840_v60  ;;  %vm1258_vm10 = vcmp.eq.s32.totalorder %v4448_v24, %v4840_v60 }
 0x1ef   :  { %v835_v46 = vmul.f32 0.6931472, %v3068_v1  ;;  %v3070_v35 = vpop.eup %3069 }
 0x1f0   :  { %v936_v23 = vadd.f32 %v833_v8, %v3982_v20  ;;  %v837_v20 = vmul.f32 0.6931472, %v3070_v35  ;;  %v3072_v62 = vpop.eup %3071  ;;  %v7467_v8 = vld [vmem:[#allocation22_spill] sm:$0xff] }
 0x1f1   :  { %2040 = vadd.xlane.f32.xlu1 %v2039_v56  ;;  %1411 = vadd.xlane.f32.xlu0 %v1410_v7  ;;  %v1425_v56 = vsel %vm207_vm0, %v1319_v33, 0.0  ;;  %v1320_v7 = vsel %vm1256_vm8, %v998_v54, 0.0  ;;  %v937_v21 = vadd.f32 %v835_v46, %v7461_v31  ;;  %v3074_v0 = vpop.eup %3073 }
 0x1f2   :  { %v1428_v11 = vsel %vm207_vm0, %v1320_v7, 0.0  ;;  %v938_v5 = vadd.f32 %v837_v20, %v7463_v25  ;;  %v3076_v57 = vpop.eup %3075  ;;  %v7472_v20 = vld [vmem:[#allocation15_spill] sm:$0xff]  ;;  %v7477_v25 = vld [vmem:[#allocation49_spill] sm:$0xff] }
 0x1f3   :  { %v1001_v15 = vsub.f32 %v3298_v6, %v937_v21  ;;  %vm144_vm1 = vcmp.ne.s32.totalorder %v7472_v20, 4294967196 }
 0x1f4   :  { %v1002_v47 = vsub.f32 %v3299_v12, %v938_v5  ;;  %v4988_v12 = vld [vmem:[%s7103_s1 + $0x140] sm:$0xff] }
 0x1f5   :  { %2043 = vadd.xlane.f32.xlu1 %v2042_v26  ;;  %1414 = vadd.xlane.f32.xlu0 %v1413_v4  ;;  %v4857_v26 = vpop.permute.xlu0 %1118  ;;  %v3297_v4 = vld [vmem:[%s7102_s0 + $0xc0] sm:$0xff]  ;;  %7480 = vst [vmem:[#allocation91_spill] sm:$0xff] %v4988_v12 }
 0x1f6   :  { %7460 = vst [vmem:[#allocation86_spill] sm:$0xff] %v4857_v26  ;;  %v1000_v27 = vsub.f32 %v3297_v4, %v936_v23  ;;  %vm1259_vm11 = vcmp.eq.s32.totalorder %v4448_v24, %v4857_v26  ;;  %v3302_v23 = vld [vmem:[%s7102_s0 + $0xe8] sm:$0xff]  ;;  %v7473_v4 = vld [vmem:[#allocation16_spill] sm:$0xff] }
 0x1f7   :  { %v1323_v45 = vsel %vm1259_vm11, %v1001_v15, 0.0  ;;  %vm7179_vm2 = vcmp.ne.s32.totalorder %v7473_v4, 4294967196  ;;  %v7600_v26 = vld [vmem:[#allocation36_spill] sm:$0xff] }
 0x1f8   :  { %v1322_v38 = vsel %vm1258_vm10, %v1000_v27, 0.0  ;;  %v1437_v43 = vsel %vm207_vm0, %v1323_v45, 0.0  ;;  %v7192_v27 = vmov 0.0   ;;  %v7479_v45 = vld [vmem:[#allocation50_spill] sm:$0xff] }
 0x1f9   :  { %2046 = vadd.xlane.f32.xlu1 %v2045_v14  ;;  %1417 = vadd.xlane.f32.xlu0 %v1416_v61  ;;  %v839_v14 = vmul.f32 0.6931472, %v3072_v62  ;;  %v4874_v61 = vpop.permute.xlu1 %1121  ;;  %v1434_v63 = vsel %vm207_vm0, %v1322_v38, 0.0  ;;  %v2817_v31 = vsel %vm144_vm1, 1.0, %v7192_v27  ;;  %v2816_v21 = vsel %vm7179_vm2, 1.0, %v7192_v27  ;;  %v4954_v62 = vld [vmem:[%s7103_s1 + $0x110] sm:$0xff] }
 0x1fa   :  { %7462 = vst [vmem:[#allocation19_spill] sm:$0xff] %v4874_v61  ;;  %vm1260_vm12 = vcmp.eq.s32.totalorder %v4448_v24, %v4874_v61  ;;  %7474 = vst [vmem:[#allocation88_spill] sm:$0xff] %v4954_v62  ;;  %v2818_v38 = vsel %vm7180_vm4, 1.0, %v7192_v27  ;;  %vm7181_vm2 = vcmp.ne.s32.totalorder %v7477_v25, 4294967196  ;;  %vm7182_vm4 = vcmp.ne.s32.totalorder %v7479_v45, 4294967196  ;;  %v136_v45 = vld [vmem:[%s7103_s1 + $0x1c8] sm:$0xff] }
 0x1fb   :  { %v939_v37 = vadd.f32 %v839_v14, %v7465_v36  ;;  %v1324_v51 = vsel %vm1260_vm12, %v1002_v47, 0.0  ;;  %v4966_v14 = vld [vmem:[%s7103_s1 + $0x120] sm:$0xff]  ;;  %v2661_v15 = vsel %vm2393_vm3, %v2818_v38, 0.0  ;;  %v2819_v5 = vsel %vm7181_vm2, 1.0, %v7192_v27 }
 0x1fc   :  { %v1440_v54 = vsel %vm207_vm0, %v1324_v51, 0.0  ;;  %7476 = vst [vmem:[#allocation89_spill] sm:$0xff] %v4966_v14 }
 0x1fd   :  { %2049 = vadd.xlane.f32.xlu1 %v2048_v18  ;;  %1420 = vadd.xlane.f32.xlu0 %v1419_v17  ;;  %v841_v18 = vmul.f32 0.6931472, %v3074_v0  ;;  %v4887_v17 = vpop.permute.xlu0 %1124  ;;  %v1003_v33 = vsub.f32 %v3300_v53, %v939_v37  ;;  %v4977_v0 = vld [vmem:[%s7103_s1 + $0x130] sm:$0xff] }
 0x1fe   :  { %7464 = vst [vmem:[#allocation20_spill] sm:$0xff] %v4887_v17  ;;  %vm1261_vm13 = vcmp.eq.s32.totalorder %v4448_v24, %v4887_v17  ;;  %7478 = vst [vmem:[#allocation90_spill] sm:$0xff] %v4977_v0  ;;  %v7481_v37 = vld [vmem:[#allocation51_spill] sm:$0xff] }
 0x1ff   :  { %v940_v44 = vadd.f32 %v841_v18, %v7467_v8  ;;  %v1325_v55 = vsel %vm1261_vm13, %v1003_v33, 0.0  ;;  %v2820_v18 = vsel %vm7182_vm4, 1.0, %v7192_v27  ;;  %vm7183_vm2 = vcmp.ne.s32.totalorder %v7481_v37, 4294967196  ;;  %v7484_v33 = vld [vmem:[#allocation52_spill] sm:$0xff] }
 0x200   :  { %v1443_v46 = vsel %vm207_vm0, %v1325_v55, 0.0  ;;  %v2665_v36 = vsel %vm2393_vm3, %v2820_v18, 0.0  ;;  %vm7186_vm4 = vcmp.ne.s32.totalorder %v7484_v33, 4294967196  ;;  %v5021_v55 = vld [vmem:[%s7103_s1 + $0x108] sm:$0xff]  ;;  %v7494_v18 = vld [vmem:[#allocation55_spill] sm:$0xff] }
 0x201   :  { %2052 = vadd.xlane.f32.xlu1 %v2051_v10  ;;  %1423 = vadd.xlane.f32.xlu0 %v1422_v32  ;;  %v843_v10 = vmul.f32 0.6931472, %v3076_v57  ;;  %v4899_v32 = vpop.permute.xlu1 %1127  ;;  %v4911_v1 = vpop.permute.xlu0 %1130  ;;  %v2821_v57 = vsel %vm7183_vm2, 1.0, %v7192_v27  ;;  %v2822_v8 = vsel %vm7186_vm4, 1.0, %v7192_v27  ;;  %7486 = vst [vmem:[#allocation95_spill] sm:$0xff] %v5021_v55  ;;  %vm7187_vm4 = vcmp.ne.s32.totalorder %v7494_v18, 4294967196 }
 0x202   :  { %7466 = vst [vmem:[#allocation21_spill] sm:$0xff] %v4899_v32  ;;  %vm1262_vm14 = vcmp.eq.s32.totalorder %v4448_v24, %v4899_v32  ;;  %7468 = vst [vmem:[#allocation22_spill] sm:$0xff] %v4911_v1  ;;  %vm1263_vm15 = vcmp.eq.s32.totalorder %v4448_v24, %v4911_v1  ;;  %v2667_v53 = vsel %vm2393_vm3, %v2821_v57, 0.0  ;;  %v130_v18 = vld [vmem:[%s7103_s1 + $0x198] sm:$0xff] }
 0x203   :  { %v941_v7 = vadd.f32 %v843_v10, %v7469_v59  ;;  %v5004_v10 = vld [vmem:[%s7103_s1 + $0xf8] sm:$0xff] }
 0x204   :  { %7483 = vst [vmem:[#allocation93_spill] sm:$0xff] %v5004_v10  ;;  %v134_v33 = vld [vmem:[%s7103_s1 + $0x1b8] sm:$0xff] }
 0x205   :  { %2055 = vadd.xlane.f32.xlu1 %v2054_v39  ;;  %1426 = vadd.xlane.f32.xlu0 %v1425_v56  ;;  %v3301_v39 = vld [vmem:[%s7102_s0 + $0xe0] sm:$0xff]  ;;  %v1005_v35 = vsub.f32 %v3302_v23, %v941_v7  ;;  %v5040_v23 = vld [vmem:[%s7103_s1 + $0x118] sm:$0xff] }
 0x206   :  { %v1004_v56 = vsub.f32 %v3301_v39, %v940_v44  ;;  %v5016_v44 = vld [vmem:[%s7103_s1 + $0x158] sm:$0xff]  ;;  %v2669_v39 = vsel %vm2393_vm3, %v2822_v8, 0.0  ;;  %7489 = vst [vmem:[#allocation97_spill] sm:$0xff] %v5040_v23  ;;  %v5094_v8 = vld [vmem:[%s7103_s1 + $0x148] sm:$0xff] }
 0x207   :  { %7485 = vst [vmem:[#allocation94_spill] sm:$0xff] %v5016_v44  ;;  %7495 = vst [vmem:[#allocation101_spill] sm:$0xff] %v5094_v8 }
 0x208   :  { %v1326_v42 = vsel %vm1262_vm14, %v1004_v56, 0.0  ;;  %v7487_v56 = vld [vmem:[#allocation53_spill] sm:$0xff] }
 0x209   :  { %2058 = vadd.xlane.f32.xlu1 %v2057_v40  ;;  %1429 = vadd.xlane.f32.xlu0 %v1428_v11  ;;  %v1446_v40 = vsel %vm207_vm0, %v1326_v42, 0.0  ;;  %v1327_v11 = vsel %vm1263_vm15, %v1005_v35, 0.0  ;;  %vm7184_vm2 = vcmp.ne.s32.totalorder %v7487_v56, 4294967196  ;;  %v132_v56 = vld [vmem:[%s7103_s1 + $0x1a8] sm:$0xff] }
 0x20a   :  { %v1449_v13 = vsel %vm207_vm0, %v1327_v11, 0.0  ;;  %v2823_v59 = vsel %vm7184_vm2, 1.0, %v7192_v27 }
 0x20b   :  { %v2671_v35 = vsel %vm2393_vm3, %v2823_v59, 0.0 }
 0x20d   :  { %2061 = vadd.xlane.f32.xlu1 %v2060_v2  ;;  %1432 = vadd.xlane.f32.xlu0 %v1431_v49  ;;  %v2659_v2 = vsel %vm2393_vm3, %v2817_v31, 0.0  ;;  %v2658_v49 = vsel %vm2393_vm3, %v2816_v21, 0.0 }
 0x20e   :  { %v2660_v6 = vadd.f32 %v2659_v2, %v2658_v49  ;;  %v5057_v2 = vld [vmem:[%s7103_s1 + $0x128] sm:$0xff] }
 0x20f   :  { %7491 = vst [vmem:[#allocation98_spill] sm:$0xff] %v5057_v2  ;;  %v5062_v49 = vld [vmem:[%s7103_s1 + $0x48] sm:$0xff] }
 0x210   :  { %7492 = vst [vmem:[#allocation99_spill] sm:$0xff] %v5062_v49 }
 0x211   :  { %2064 = vadd.xlane.f32.xlu1 %v2063_v28  ;;  %1435 = vadd.xlane.f32.xlu0 %v1434_v63  ;;  %v2662_v28 = vadd.f32 %v2661_v15, %v2660_v6  ;;  %v2663_v63 = vsel %vm2393_vm3, %v2819_v5, 0.0  ;;  %v127_v15 = vld [vmem:[%s7103_s1 + $0x180] sm:$0xff] }
 0x213   :  { %v2664_v47 = vadd.f32 %v2663_v63, %v2662_v28  ;;  %v5076_v28 = vld [vmem:[%s7103_s1 + $0x138] sm:$0xff] }
 0x214   :  { %7493 = vst [vmem:[#allocation100_spill] sm:$0xff] %v5076_v28 }
 0x215   :  { %1438 = vadd.xlane.f32.xlu0 %v1437_v43  ;;  %v4999_v43 = vld [vmem:[%s7103_s1 + $0x150] sm:$0xff]  ;;  %v2666_v51 = vadd.f32 %v2665_v36, %v2664_v47  ;;  %v2826_v47 = vsel %vm7187_vm4, 1.0, %v7192_v27 }
 0x216   :  { %7482 = vst [vmem:[#allocation92_spill] sm:$0xff] %v4999_v43 }
 0x219   :  { %1441 = vadd.xlane.f32.xlu0 %v1440_v54  ;;  %v2668_v54 = vadd.f32 %v2667_v53, %v2666_v51  ;;  %v129_v51 = vld [vmem:[%s7103_s1 + $0x190] sm:$0xff] }
 0x21b   :  { %v2670_v42 = vadd.f32 %v2669_v39, %v2668_v54  ;;  %v5099_v54 = vld [vmem:[%s7103_s1 + $0x58] sm:$0xff]  ;;  %v2677_v39 = vsel %vm2393_vm3, %v2826_v47, 0.0  ;;  %v133_v47 = vld [vmem:[%s7103_s1 + $0x1b0] sm:$0xff] }
 0x21c   :  { %7496 = vst [vmem:[#allocation102_spill] sm:$0xff] %v5099_v54  ;;  %vm7188_vm4 = vcmp.ne.s32.totalorder %v5099_v54, 4294967196  ;;  %v128_v54 = vld [vmem:[%s7103_s1 + $0x188] sm:$0xff] }
 0x21d   :  { %1444 = vadd.xlane.f32.xlu0 %v1443_v46  ;;  %v5035_v46 = vld [vmem:[%s7103_s1 + $0x168] sm:$0xff]  ;;  %v2672_v31 = vadd.f32 %v2671_v35, %v2670_v42  ;;  %v2827_v59 = vsel %vm7188_vm4, 1.0, %v7192_v27 }
 0x21e   :  { %7488 = vst [vmem:[#allocation96_spill] sm:$0xff] %v5035_v46 }
 0x221   :  { %1447 = vadd.xlane.f32.xlu0 %v1446_v40  ;;  %v7490_v40 = vld [vmem:[#allocation54_spill] sm:$0xff] }
 0x222   :  { %1133 = vperm.xlu1 %2888, %v4926_v30   ;;  %vm7185_vm2 = vcmp.ne.s32.totalorder %v7490_v40, 4294967196 }
 0x223   :  { %v2824_v11 = vsel %vm7185_vm2, 1.0, %v7192_v27  ;;  %vm7212_vm2 = vcmp.ne.s32.totalorder %v5062_v49, 4294967196 }
 0x224   :  { %v2673_v38 = vsel %vm2393_vm3, %v2824_v11, 0.0  ;;  %v2825_v6 = vsel %vm7212_vm2, 1.0, %v7192_v27  ;;  %v131_v11 = vld [vmem:[%s7103_s1 + $0x1a0] sm:$0xff] }
 0x225   :  { %1450 = vadd.xlane.f32.xlu0 %v1449_v13  ;;  %v126_v13 = vld [vmem:[%s7103_s1 + $0x178] sm:$0xff]  ;;  %v2674_v5 = vadd.f32 %v2673_v38, %v2672_v31  ;;  %v2675_v63 = vsel %vm2393_vm3, %v2825_v6, 0.0  ;;  %v123_v31 = vld [vmem:[%s7103_s1 + $0x160] sm:$0xff]  ;;  %v2679_v38 = vsel %vm2393_vm3, %v2827_v59, 0.0 }
 0x226   :  { %1139 = vperm.xlu1 %2888, %v4939_v48   ;;  %v5121_v6 = vld [vmem:[%s7103_s1 + $0x60] sm:$0xff] }
 0x227   :  { %v2676_v53 = vadd.f32 %v2675_v63, %v2674_v5  ;;  %7497 = vst [vmem:[#allocation103_spill] sm:$0xff] %v5121_v6  ;;  %vm7189_vm4 = vcmp.ne.s32.totalorder %v5121_v6, 4294967196 }
 0x22a   :  { %1145 = vperm.xlu1 %2888, %v4954_v62  }
 0x22e   :  { %1151 = vperm.xlu1 %2888, %v4966_v14  }
 0x232   :  { %1157 = vperm.xlu1 %2888, %v4977_v0  }
 0x236   :  { %1163 = vperm.xlu1 %2888, %v4988_v12  }
 0x23a   :  { %1169 = vperm.xlu1 %2888, %v4999_v43   ;;  %v5028_v7 = vpop.xlane.xlu0 %1363  ;;  %v5083_v36 = vpop.xlane.xlu1 %1366 }
 0x23b   :  { %1136 = vperm.xlu0 %2887, %v5004_v10  }
 0x23e   :  { %1172 = vperm.xlu1 %2888, %v5016_v44   ;;  %v5052_v21 = vpop.xlane.xlu0 %1369 }
 0x23f   :  { %1142 = vperm.xlu0 %2887, %v5021_v55  }
 0x242   :  { %1178 = vperm.xlu1 %2888, %v5035_v46   ;;  %v5085_v57 = vpop.xlane.xlu0 %1372 }
 0x243   :  { %1148 = vperm.xlu0 %2887, %v5040_v23  }
 0x246   :  { %1184 = vperm.xlu1 %2888, %v126_v13   ;;  %v5106_v42 = vpop.xlane.xlu1 %1375  ;;  %v2678_v13 = vadd.f32 %v2677_v39, %v2676_v53  ;;  %v125_v53 = vld [vmem:[%s7103_s1 + $0x170] sm:$0xff]  ;;  %v5140_v39 = vld [vmem:[%s7103_s1 + $0x68] sm:$0xff] }
 0x247   :  { %1154 = vperm.xlu0 %2887, %v5057_v2   ;;  %7500 = vst [vmem:[#allocation106_spill] sm:$0xff] %v5140_v39 }
 0x24a   :  { %1187 = vperm.xlu1 %2888, %v127_v15   ;;  %v5108_v35 = vpop.xlane.xlu0 %1378  ;;  %v2828_v15 = vsel %vm7189_vm4, 1.0, %v7192_v27  ;;  %vm7194_vm4 = vcmp.ne.s32.totalorder %v5140_v39, 4294967196 }
 0x24b   :  { %1160 = vperm.xlu0 %2887, %v5076_v28   ;;  %v2681_v59 = vsel %vm2393_vm3, %v2828_v15, 0.0 }
 0x24e   :  { %1193 = vperm.xlu1 %2888, %v129_v51   ;;  %v5127_v5 = vpop.xlane.xlu1 %1381  ;;  %v2680_v51 = vadd.f32 %v2679_v38, %v2678_v13  ;;  %v135_v38 = vld [vmem:[%s7103_s1 + $0x1c0] sm:$0xff] }
 0x24f   :  { %1166 = vperm.xlu0 %2887, %v5094_v8   ;;  %7498 = vst [vmem:[#allocation104_spill] sm:$0xff] %v5127_v5 }
 0x250   :  { %v2682_v6 = vadd.f32 %v2681_v59, %v2680_v51  ;;  %v137_v59 = vld [vmem:[%s7103_s1 + $0x1d0] sm:$0xff] }
 0x252   :  { %1199 = vperm.xlu1 %2888, %v131_v11   ;;  %v5129_v63 = vpop.xlane.xlu0 %1384  ;;  %v2829_v11 = vsel %vm7194_vm4, 1.0, %v7192_v27  ;;  %v5161_v27 = vld [vmem:[%s7103_s1 + $0x70] sm:$0xff] }
 0x253   :  { %7499 = vst [vmem:[#allocation105_spill] sm:$0xff] %v5129_v63  ;;  %1175 = vperm.xlu0 %2887, %v123_v31   ;;  %v2683_v15 = vsel %vm2393_vm3, %v2829_v11, 0.0  ;;  %7503 = vst [vmem:[#allocation109_spill] sm:$0xff] %v5161_v27  ;;  %vm7198_vm4 = vcmp.ne.s32.totalorder %v5161_v27, 4294967196  ;;  %v5180_v27 = vld [vmem:[%s7103_s1 + $0x78] sm:$0xff] }
 0x254   :  { %v2684_v11 = vadd.f32 %v2683_v15, %v2682_v6  ;;  %7507 = vst [vmem:[#allocation112_spill] sm:$0xff] %v5180_v27  ;;  %v139_v15 = vld [vmem:[%s7103_s1 + $0x1e0] sm:$0xff] }
 0x256   :  { %v5147_v31 = vpop.xlane.xlu1 %1387  ;;  %1205 = vperm.xlu1 %2888, %v133_v47   ;;  %v5149_v13 = vpop.xlane.xlu0 %1390  ;;  %v7504_v47 = vmov 0.0  }
 0x257   :  { %7501 = vst [vmem:[#allocation107_spill] sm:$0xff] %v5147_v31  ;;  %7502 = vst [vmem:[#allocation108_spill] sm:$0xff] %v5149_v13  ;;  %1181 = vperm.xlu0 %2887, %v125_v53   ;;  %v2830_v53 = vsel %vm7198_vm4, 1.0, %v7504_v47  ;;  %vm7203_vm4 = vcmp.ne.s32.totalorder %v5180_v27, 4294967196  ;;  %v5201_v27 = vld [vmem:[%s7103_s1 + $0x80] sm:$0xff]  ;;  %v7587_v31 = vld [vmem:[#allocation31_spill] sm:$0xff] }
 0x258   :  { %7510 = vst [vmem:[#allocation115_spill] sm:$0xff] %v5201_v27 }
 0x25a   :  { %v5167_v39 = vpop.xlane.xlu1 %1396  ;;  %1211 = vperm.xlu1 %2888, %v135_v38   ;;  %v5169_v51 = vpop.xlane.xlu0 %1393  ;;  %v2685_v38 = vsel %vm2393_vm3, %v2830_v53, 0.0 }
 0x25b   :  { %7505 = vst [vmem:[#allocation110_spill] sm:$0xff] %v5167_v39  ;;  %7506 = vst [vmem:[#allocation111_spill] sm:$0xff] %v5169_v51  ;;  %1190 = vperm.xlu0 %2887, %v128_v54   ;;  %v2831_v54 = vsel %vm7203_vm4, 1.0, %v7504_v47  ;;  %v2686_v40 = vadd.f32 %v2685_v38, %v2684_v11  ;;  %vm7206_vm4 = vcmp.ne.s32.totalorder %v5201_v27, 4294967196  ;;  %v141_v38 = vld [vmem:[%s7103_s1 + $0x1f0] sm:$0xff]  ;;  %v5220_v27 = vld [vmem:[%s7103_s1 + $0x88] sm:$0xff] }
 0x25c   :  { %v2687_v53 = vsel %vm2393_vm3, %v2831_v54, 0.0  ;;  %7513 = vst [vmem:[#allocation118_spill] sm:$0xff] %v5220_v27  ;;  %v7571_v39 = vld [vmem:[#allocation72_spill] sm:$0xff] }
 0x25d   :  { %v2688_v54 = vadd.f32 %v2687_v53, %v2686_v40 }
 0x25e   :  { %v5187_v49 = vpop.xlane.xlu1 %2013  ;;  %1217 = vperm.xlu1 %2888, %v137_v59   ;;  %v5189_v6 = vpop.xlane.xlu0 %2010 }
 0x25f   :  { %7508 = vst [vmem:[#allocation113_spill] sm:$0xff] %v5187_v49  ;;  %7509 = vst [vmem:[#allocation114_spill] sm:$0xff] %v5189_v6  ;;  %1196 = vperm.xlu0 %2887, %v130_v18   ;;  %v2832_v18 = vsel %vm7206_vm4, 1.0, %v7504_v47  ;;  %vm7210_vm4 = vcmp.ne.s32.totalorder %v5220_v27, 4294967196 }
 0x262   :  { %v5207_v59 = vpop.xlane.xlu1 %1402  ;;  %1223 = vperm.xlu1 %2888, %v139_v15   ;;  %v5209_v11 = vpop.xlane.xlu0 %1399  ;;  %v2689_v15 = vsel %vm2393_vm3, %v2832_v18, 0.0  ;;  %v5238_v18 = vld [vmem:[%s7103_s1 + $0x90] sm:$0xff] }
 0x263   :  { %7511 = vst [vmem:[#allocation116_spill] sm:$0xff] %v5207_v59  ;;  %7512 = vst [vmem:[#allocation117_spill] sm:$0xff] %v5209_v11  ;;  %1202 = vperm.xlu0 %2887, %v132_v56   ;;  %v2833_v56 = vsel %vm7210_vm4, 1.0, %v7504_v47  ;;  %v2690_v53 = vadd.f32 %v2689_v15, %v2688_v54  ;;  %vm7215_vm4 = vcmp.ne.s32.totalorder %v5238_v18, 4294967196  ;;  %v138_v15 = vld [vmem:[%s7103_s1 + $0x1d8] sm:$0xff]  ;;  %v5303_v59 = vld [vmem:[%s7103_s1 + $0xb0] sm:$0xff] }
 0x264   :  { %v2691_v25 = vsel %vm2393_vm3, %v2833_v56, 0.0  ;;  %7516 = vst [vmem:[#allocation121_spill] sm:$0xff] %v5238_v18  ;;  %v5254_v56 = vld [vmem:[%s7103_s1 + $0x98] sm:$0xff]  ;;  %7528 = vst [vmem:[#allocation133_spill] sm:$0xff] %v5303_v59 }
 0x265   :  { %v2692_v54 = vadd.f32 %v2691_v25, %v2690_v53  ;;  %7519 = vst [vmem:[#allocation124_spill] sm:$0xff] %v5254_v56  ;;  %vm7217_vm2 = vcmp.ne.s32.totalorder %v5254_v56, 4294967196  ;;  %v140_v53 = vld [vmem:[%s7103_s1 + $0x1e8] sm:$0xff] }
 0x266   :  { %v5227_v37 = vpop.xlane.xlu1 %2025  ;;  %1229 = vperm.xlu1 %2888, %v141_v38   ;;  %v5229_v40 = vpop.xlane.xlu0 %2016  ;;  %v2834_v38 = vsel %vm7215_vm4, 1.0, %v7504_v47 }
 0x267   :  { %7514 = vst [vmem:[#allocation119_spill] sm:$0xff] %v5227_v37  ;;  %7515 = vst [vmem:[#allocation120_spill] sm:$0xff] %v5229_v40  ;;  %1208 = vperm.xlu0 %2887, %v134_v33   ;;  %v2693_v18 = vsel %vm2393_vm3, %v2834_v38, 0.0  ;;  %v5272_v38 = vld [vmem:[%s7103_s1 + $0xa0] sm:$0xff] }
 0x268   :  { %7522 = vst [vmem:[#allocation127_spill] sm:$0xff] %v5272_v38  ;;  %vm7221_vm4 = vcmp.ne.s32.totalorder %v5272_v38, 4294967196 }
 0x269   :  { %v2836_v56 = vsel %vm7221_vm4, 1.0, %v7504_v47  ;;  %vm7226_vm4 = vcmp.ne.s32.totalorder %v5303_v59, 4294967196 }
 0x26a   :  { %v5244_v27 = vpop.xlane.xlu1 %2028  ;;  %v5246_v33 = vpop.xlane.xlu0 %2019  ;;  %v2697_v38 = vsel %vm2393_vm3, %v2836_v56, 0.0  ;;  %v2838_v56 = vsel %vm7226_vm4, 1.0, %v7504_v47 }
 0x26b   :  { %7517 = vst [vmem:[#allocation122_spill] sm:$0xff] %v5244_v27  ;;  %7518 = vst [vmem:[#allocation123_spill] sm:$0xff] %v5246_v33  ;;  %1214 = vperm.xlu0 %2887, %v136_v45   ;;  %v2835_v27 = vsel %vm7217_vm2, 1.0, %v7504_v47  ;;  %v2694_v45 = vadd.f32 %v2693_v18, %v2692_v54  ;;  %v7569_v33 = vld [vmem:[#allocation71_spill] sm:$0xff] }
 0x26c   :  { %v2695_v37 = vsel %vm2393_vm3, %v2835_v27, 0.0  ;;  %v142_v27 = vld [vmem:[%s7103_s1 + $0x1f8] sm:$0xff] }
 0x26d   :  { %v2696_v54 = vadd.f32 %v2695_v37, %v2694_v45 }
 0x26e   :  { %v5261_v58 = vpop.xlane.xlu1 %2031  ;;  %v5263_v25 = vpop.xlane.xlu0 %1405 }
 0x26f   :  { %7520 = vst [vmem:[#allocation125_spill] sm:$0xff] %v5261_v58  ;;  %7521 = vst [vmem:[#allocation126_spill] sm:$0xff] %v5263_v25  ;;  %1220 = vperm.xlu0 %2887, %v138_v15   ;;  %v5288_v15 = vld [vmem:[%s7103_s1 + $0xa8] sm:$0xff]  ;;  %v2698_v45 = vadd.f32 %v2697_v38, %v2696_v54  ;;  %v2701_v38 = vsel %vm2393_vm3, %v2838_v56, 0.0 }
 0x270   :  { %7525 = vst [vmem:[#allocation130_spill] sm:$0xff] %v5288_v15  ;;  %vm7224_vm2 = vcmp.ne.s32.totalorder %v5288_v15, 4294967196 }
 0x272   :  { %v5278_v58 = vpop.xlane.xlu1 %2034  ;;  %v5280_v18 = vpop.xlane.xlu0 %2022 }
 0x273   :  { %7523 = vst [vmem:[#allocation128_spill] sm:$0xff] %v5278_v58  ;;  %7524 = vst [vmem:[#allocation129_spill] sm:$0xff] %v5280_v18  ;;  %1226 = vperm.xlu0 %2887, %v140_v53   ;;  %v2837_v58 = vsel %vm7224_vm2, 1.0, %v7504_v47  ;;  %v7555_v18 = vld [vmem:[#allocation65_spill] sm:$0xff] }
 0x274   :  { %v2699_v53 = vsel %vm2393_vm3, %v2837_v58, 0.0  ;;  %v5316_v58 = vld [vmem:[%s7103_s1 + $0xb8] sm:$0xff] }
 0x275   :  { %7531 = vst [vmem:[#allocation136_spill] sm:$0xff] %v5316_v58  ;;  %vm7230_vm2 = vcmp.ne.s32.totalorder %v5316_v58, 4294967196 }
 0x276   :  { %v5295_v25 = vpop.xlane.xlu1 %2037  ;;  %v5297_v37 = vpop.xlane.xlu0 %1408  ;;  %v2839_v54 = vsel %vm7230_vm2, 1.0, %v7504_v47 }
 0x277   :  { %7526 = vst [vmem:[#allocation131_spill] sm:$0xff] %v5295_v25  ;;  %7527 = vst [vmem:[#allocation132_spill] sm:$0xff] %v5297_v37  ;;  %1232 = vperm.xlu0 %2887, %v142_v27   ;;  %v2700_v37 = vadd.f32 %v2699_v53, %v2698_v45  ;;  %v2703_v45 = vsel %vm2393_vm3, %v2839_v54, 0.0  ;;  %v5331_v53 = vld [vmem:[%s7103_s1 + $0xc0] sm:$0xff] }
 0x278   :  { %7534 = vst [vmem:[#allocation139_spill] sm:$0xff] %v5331_v53  ;;  %vm7308_vm4 = vcmp.ne.s32.totalorder %v5331_v53, 4294967196 }
 0x279   :  { %v2840_v56 = vsel %vm7308_vm4, 1.0, %v7504_v47 }
 0x27a   :  { %v5309_v15 = vpop.xlane.xlu1 %2040  ;;  %v5311_v25 = vpop.xlane.xlu0 %1411 }
 0x27b   :  { %7529 = vst [vmem:[#allocation134_spill] sm:$0xff] %v5309_v15  ;;  %7530 = vst [vmem:[#allocation135_spill] sm:$0xff] %v5311_v25  ;;  %v2702_v15 = vadd.f32 %v2701_v38, %v2700_v37  ;;  %v7535_v25 = vld [vmem:[#allocation56_spill] sm:$0xff]  ;;  %v7538_v37 = vld [vmem:[#allocation57_spill] sm:$0xff] }
 0x27c   :  { %3077 = vlog2.f32 %v7535_v25  ;;  %v7539_v38 = vld [vmem:[#allocation58_spill] sm:$0xff]  ;;  %v2705_v25 = vsel %vm2393_vm3, %v2840_v56, 0.0 }
 0x27d   :  { %3079 = vlog2.f32 %v7538_v37  ;;  %v2704_v54 = vadd.f32 %v2703_v45, %v2702_v15  ;;  %v1964_v15 = vsel %vm1253_vm5, %v4598_v3, 0.0  ;;  %v7543_v37 = vld [vmem:[#allocation59_spill] sm:$0xff] }
 0x27e   :  { %v5323_v27 = vpop.xlane.xlu1 %2043  ;;  %v5325_v59 = vpop.xlane.xlu0 %1414  ;;  %3081 = vlog2.f32 %v7539_v38  ;;  %v5367_v56 = vld [vmem:[%s7103_s1 + $0xd0] sm:$0xff] }
 0x27f   :  { %7532 = vst [vmem:[#allocation137_spill] sm:$0xff] %v5323_v27  ;;  %7533 = vst [vmem:[#allocation138_spill] sm:$0xff] %v5325_v59  ;;  %v5347_v59 = vld [vmem:[%s7103_s1 + $0xc8] sm:$0xff]  ;;  %v2706_v45 = vadd.f32 %v2705_v25, %v2704_v54  ;;  %3083 = vlog2.f32 %v7543_v37  ;;  %v7547_v25 = vld [vmem:[#allocation60_spill] sm:$0xff] }
 0x280   :  { %7540 = vst [vmem:[#allocation57_spill] sm:$0xff] %v5347_v59  ;;  %vm7233_vm2 = vcmp.ne.s32.totalorder %v5347_v59, 4294967196  ;;  %7544 = vst [vmem:[#allocation59_spill] sm:$0xff] %v5367_v56  ;;  %v2066_v59 = vsel %vm207_vm0, %v1964_v15, 0.0  ;;  %3085 = vlog2.f32 %v7547_v25  ;;  %v5387_v15 = vld [vmem:[%s7103_s1 + $0xd8] sm:$0xff] }
 0x281   :  { %v2841_v53 = vsel %vm7233_vm2, 1.0, %v7504_v47  ;;  %vm7303_vm2 = vcmp.ne.s32.totalorder %v5367_v56, 4294967196  ;;  %7549 = vst [vmem:[#allocation60_spill] sm:$0xff] %v5387_v15  ;;  %vm7254_vm5 = vcmp.ne.s32.totalorder %v5387_v15, 4294967196  ;;  %v7550_v56 = vld [vmem:[#allocation62_spill] sm:$0xff]  ;;  %v7554_v25 = vld [vmem:[#allocation64_spill] sm:$0xff] }
 0x282   :  { %v5338_v58 = vpop.xlane.xlu1 %2046  ;;  %v5340_v27 = vpop.xlane.xlu0 %1417  ;;  %v2707_v38 = vsel %vm2393_vm3, %v2841_v53, 0.0  ;;  %v1965_v53 = vsel %vm1254_vm6, %v4598_v3, 0.0  ;;  %v2843_v3 = vsel %vm7254_vm5, 1.0, %v7504_v47  ;;  %v5407_v15 = vld [vmem:[%s7103_s1 + $0xe0] sm:$0xff] }
 0x283   :  { %7536 = vst [vmem:[#allocation56_spill] sm:$0xff] %v5338_v58  ;;  %7537 = vst [vmem:[#allocation140_spill] sm:$0xff] %v5340_v27  ;;  %v2708_v37 = vadd.f32 %v2707_v38, %v2706_v45  ;;  %vm7241_vm6 = vcmp.ne.s32.totalorder %v5407_v15, 4294967196 }
 0x284   :  { %7556 = vst [vmem:[#allocation63_spill] sm:$0xff] %v5407_v15  ;;  %v7562_v15 = vld [vmem:[#allocation68_spill] sm:$0xff] }
 0x286   :  { %v5354_v58 = vpop.xlane.xlu1 %2049  ;;  %v5356_v27 = vpop.xlane.xlu0 %1420 }
 0x287   :  { %7541 = vst [vmem:[#allocation58_spill] sm:$0xff] %v5354_v58  ;;  %7542 = vst [vmem:[#allocation141_spill] sm:$0xff] %v5356_v27  ;;  %v2842_v58 = vsel %vm7303_vm2, 1.0, %v7504_v47  ;;  %v7548_v27 = vld [vmem:[#allocation61_spill] sm:$0xff]  ;;  %vm7307_vm2 = vcmp.ne.s32.totalorder %v4977_v0, 4294967196 }
 0x288   :  { %3087 = vlog2.f32 %v7548_v27 }
 0x289   :  { %3089 = vlog2.f32 %v7550_v56  ;;  %v3078_v38 = vpop.eup %3077 }
 0x28a   :  { %v5374_v52 = vpop.xlane.xlu1 %2052  ;;  %2067 = vadd.xlane.f32.xlu1 %v2066_v59  ;;  %v5376_v54 = vpop.xlane.xlu0 %1423  ;;  %v2709_v59 = vsel %vm2393_vm3, %v2842_v58, 0.0  ;;  %3091 = vlog2.f32 %v7551_v22  ;;  %v2844_v22 = vsel %vm7241_vm6, 1.0, %v7504_v47 }
 0x28b   :  { %7545 = vst [vmem:[#allocation142_spill] sm:$0xff] %v5374_v52  ;;  %7546 = vst [vmem:[#allocation143_spill] sm:$0xff] %v5376_v54  ;;  %v2069_v52 = vsel %vm207_vm0, %v1965_v53, 0.0  ;;  %3093 = vlog2.f32 %v7554_v25  ;;  %v3080_v54 = vpop.eup %3079  ;;  %v2710_v58 = vadd.f32 %v2709_v59, %v2708_v37  ;;  %v2711_v53 = vsel %vm2393_vm3, %v2843_v3, 0.0  ;;  %v7558_v25 = vld [vmem:[#allocation67_spill] sm:$0xff] }
 0x28c   :  { %3095 = vlog2.f32 %v7555_v18  ;;  %v3082_v56 = vpop.eup %3081  ;;  %v845_v59 = vmul.f32 0.6931472, %v3078_v38  ;;  %v847_v3 = vmul.f32 0.6931472, %v3080_v54  ;;  %v7563_v54 = vld [vmem:[#allocation69_spill] sm:$0xff] }
 0x28d   :  { %v3084_v11 = vpop.eup %3083 }
 0x28e   :  { %v5397_v27 = vpop.xlane.xlu1 %2055  ;;  %2070 = vadd.xlane.f32.xlu1 %v2069_v52  ;;  %v5399_v45 = vpop.xlane.xlu0 %1426  ;;  %v7557_v52 = vld [vmem:[#allocation66_spill] sm:$0xff]  ;;  %v851_v4 = vmul.f32 0.6931472, %v3084_v11 }
 0x28f   :  { %7552 = vst [vmem:[#allocation61_spill] sm:$0xff] %v5397_v27  ;;  %7553 = vst [vmem:[#allocation62_spill] sm:$0xff] %v5399_v45  ;;  %3097 = vlog2.f32 %v7557_v52  ;;  %v849_v45 = vmul.f32 0.6931472, %v3082_v56  ;;  %v2712_v27 = vadd.f32 %v2711_v53, %v2710_v58  ;;  %v5424_v52 = vld [vmem:[%s7103_s1 + $0xe8] sm:$0xff]  ;;  %v7567_v56 = vld [vmem:[#allocation24_spill] sm:$0xff] }
 0x290   :  { %3099 = vlog2.f32 %v7558_v25  ;;  %7561 = vst [vmem:[#allocation66_spill] sm:$0xff] %v5424_v52  ;;  %vm7248_vm6 = vcmp.ne.s32.totalorder %v5424_v52, 4294967196  ;;  %v2713_v25 = vsel %vm2393_vm3, %v2844_v22, 0.0  ;;  %v7566_v58 = vld [vmem:[#allocation70_spill] sm:$0xff]  ;;  %v942_v53 = vadd.f32 %v845_v59, %v7567_v56  ;;  %v3086_v22 = vpop.eup %3085  ;;  %v7572_v59 = vld [vmem:[#allocation73_spill] sm:$0xff] }
 0x291   :  { %3101 = vlog2.f32 %v4395_v34  ;;  %v2845_v34 = vsel %vm7248_vm6, 1.0, %v7504_v47  ;;  %v7570_v52 = vld [vmem:[#allocation26_spill] sm:$0xff]  ;;  %vm7252_vm6 = vcmp.ne.s32.totalorder %v4926_v30, 4294967196 }
 0x292   :  { %v5415_v37 = vpop.xlane.xlu1 %2058  ;;  %v5417_v18 = vpop.xlane.xlu0 %1429  ;;  %3103 = vlog2.f32 %v4397_v29  ;;  %v5444_v20 = vadd.f32 %v849_v45, %v7570_v52  ;;  %v2846_v11 = vsel %vm7252_vm6, 1.0, %v7504_v47  ;;  %vm7257_vm6 = vcmp.ne.s32.totalorder %v5004_v10, 4294967196 }
 0x293   :  { %7559 = vst [vmem:[#allocation64_spill] sm:$0xff] %v5415_v37  ;;  %7560 = vst [vmem:[#allocation65_spill] sm:$0xff] %v5417_v18  ;;  %3105 = vlog2.f32 %v7562_v15  ;;  %v7568_v18 = vld [vmem:[#allocation25_spill] sm:$0xff]  ;;  %v2714_v15 = vadd.f32 %v2713_v25, %v2712_v27  ;;  %v5464_v25 = vld [vmem:[%s7102_s0 + $0xf8] sm:$0xff] }
 0x294   :  { %3107 = vlog2.f32 %v7563_v54  ;;  %v5440_v37 = vadd.f32 %v847_v3, %v7568_v18  ;;  %v853_v18 = vmul.f32 0.6931472, %v3086_v22  ;;  %v7575_v3 = vld [vmem:[#allocation74_spill] sm:$0xff]  ;;  %v7577_v22 = vld [vmem:[#allocation27_spill] sm:$0xff] }
 0x295   :  { %3109 = vlog2.f32 %v7566_v58  ;;  %v3088_v54 = vpop.eup %3087 }
 0x296   :  { %v5433_v38 = vpop.xlane.xlu1 %2061  ;;  %v5435_v29 = vpop.xlane.xlu0 %1432  ;;  %3111 = vlog2.f32 %v7569_v33 }
 0x297   :  { %7564 = vst [vmem:[#allocation67_spill] sm:$0xff] %v5433_v38  ;;  %7565 = vst [vmem:[#allocation68_spill] sm:$0xff] %v5435_v29  ;;  %v2715_v38 = vsel %vm2393_vm3, %v2845_v34, 0.0  ;;  %3113 = vlog2.f32 %v7571_v39  ;;  %v3090_v58 = vpop.eup %3089  ;;  %v3323_v39 = vld [vmem:[%s7102_s0 + $0xf0] sm:$0xff]  ;;  %v855_v29 = vmul.f32 0.6931472, %v3088_v54 }
 0x298   :  { %3115 = vlog2.f32 %v7572_v59  ;;  %v3092_v45 = vpop.eup %3091  ;;  %v1006_v52 = vsub.f32 %v3323_v39, %v942_v53  ;;  %v7576_v59 = vld [vmem:[#allocation75_spill] sm:$0xff]  ;;  %v2716_v30 = vadd.f32 %v2715_v38, %v2714_v15  ;;  %v2717_v34 = vsel %vm2393_vm3, %v2846_v11, 0.0  ;;  %v7583_v11 = vld [vmem:[#allocation28_spill] sm:$0xff] }
 0x299   :  { %3117 = vlog2.f32 %v7575_v3  ;;  %v3094_v56 = vpop.eup %3093  ;;  %v5475_v3 = vld [vmem:[%s7102_s0 + $0x100] sm:$0xff]  ;;  %v857_v15 = vmul.f32 0.6931472, %v3090_v58  ;;  %v5494_v58 = vadd.f32 %v853_v18, %v7583_v11 }
 0x29a   :  { %v5453_v27 = vpop.xlane.xlu1 %2064  ;;  %v5455_v33 = vpop.xlane.xlu0 %1435  ;;  %3119 = vlog2.f32 %v7576_v59  ;;  %v7579_v59 = vld [vmem:[#allocation77_spill] sm:$0xff]  ;;  %v861_v51 = vmul.f32 0.6931472, %v3094_v56  ;;  %v2718_v6 = vadd.f32 %v2717_v34, %v2716_v30  ;;  %v7586_v56 = vld [vmem:[#allocation30_spill] sm:$0xff] }
 0x29b   :  { %7573 = vst [vmem:[#allocation69_spill] sm:$0xff] %v5453_v27  ;;  %7574 = vst [vmem:[#allocation70_spill] sm:$0xff] %v5455_v33  ;;  %v5470_v33 = vadd.f32 %v851_v4, %v7577_v22  ;;  %v3096_v39 = vpop.eup %3095  ;;  %v7578_v27 = vld [vmem:[#allocation76_spill] sm:$0xff]  ;;  %v859_v4 = vmul.f32 0.6931472, %v3092_v45  ;;  %v2847_v22 = vsel %vm7257_vm6, 1.0, %v7504_v47  ;;  %v5518_v13 = vadd.f32 %v857_v15, %v7586_v56 }
 0x29c   :  { %3121 = vlog2.f32 %v7578_v27  ;;  %v3098_v38 = vpop.eup %3097  ;;  %v7582_v27 = vld [vmem:[#allocation78_spill] sm:$0xff]  ;;  %vm7266_vm6 = vcmp.ne.s32.totalorder %v4939_v48, 4294967196  ;;  %v2719_v18 = vsel %vm2393_vm3, %v2847_v22, 0.0  ;;  %v7584_v30 = vld [vmem:[#allocation29_spill] sm:$0xff]  ;;  %v7590_v56 = vld [vmem:[#allocation79_spill] sm:$0xff] }
 0x29d   :  { %3123 = vlog2.f32 %v7579_v59  ;;  %v3100_v54 = vpop.eup %3099  ;;  %v863_v59 = vmul.f32 0.6931472, %v3096_v39  ;;  %v5510_v34 = vadd.f32 %v855_v29, %v7584_v30  ;;  %v5521_v32 = vadd.f32 %v859_v4, %v7587_v31  ;;  %v5526_v29 = vld [vmem:[%s7102_s0 + $0x110] sm:$0xff]  ;;  %v7591_v4 = vld [vmem:[#allocation33_spill] sm:$0xff] }
 0x29e   :  { %v5486_v40 = vpop.permute.xlu1 %1133  ;;  %v5488_v53 = vpop.xlane.xlu0 %1438  ;;  %3125 = vlog2.f32 %v7582_v27  ;;  %v2720_v31 = vadd.f32 %v2719_v18, %v2718_v6  ;;  %v5575_v18 = vld [vmem:[%s7102_s0 + $0x130] sm:$0xff] }
 0x29f   :  { %7580 = vst [vmem:[#allocation24_spill] sm:$0xff] %v5486_v40  ;;  %7581 = vst [vmem:[#allocation25_spill] sm:$0xff] %v5488_v53  ;;  %vm1264_vm5 = vcmp.eq.s32.totalorder %v4448_v24, %v5486_v40  ;;  %v3102_v45 = vpop.eup %3101  ;;  %v5502_v53 = vld [vmem:[%s7102_s0 + $0x108] sm:$0xff]  ;;  %v2848_v40 = vsel %vm7266_vm6, 1.0, %v7504_v47  ;;  %3127 = vlog2.f32 %v7590_v56  ;;  %vm7276_vm6 = vcmp.ne.s32.totalorder %v5021_v55, 4294967196 }
 0x2a0   :  { %v1328_v10 = vsel %vm1264_vm5, %v1006_v52, 0.0  ;;  %v3104_v27 = vpop.eup %3103  ;;  %v865_v52 = vmul.f32 0.6931472, %v3098_v38  ;;  %7588 = vst [vmem:[#allocation26_spill] sm:$0xff] %v5521_v32  ;;  %v869_v63 = vmul.f32 0.6931472, %v3102_v45  ;;  %v7642_v19 = vsub.f32 %v5502_v53, %v5470_v33 }
 0x2a1   :  { %v1452_v39 = vsel %vm207_vm0, %v1328_v10, 0.0  ;;  %v3106_v11 = vpop.eup %3105  ;;  %v867_v10 = vmul.f32 0.6931472, %v3100_v54  ;;  %v871_v15 = vmul.f32 0.6931472, %v3104_v27  ;;  %v7593_v45 = vld [vmem:[#allocation80_spill] sm:$0xff] }
 0x2a2   :  { %1453 = vadd.xlane.f32.xlu0 %v1452_v39  ;;  %v5515_v49 = vpop.xlane.xlu0 %1441  ;;  %v3108_v22 = vpop.eup %3107  ;;  %v7589_v39 = vld [vmem:[#allocation32_spill] sm:$0xff]  ;;  %3129 = vlog2.f32 %v7593_v45  ;;  %v2721_v1 = vsel %vm2393_vm3, %v2848_v40, 0.0  ;;  %v2849_v6 = vsel %vm7276_vm6, 1.0, %v7504_v47  ;;  %v5562_v56 = vld [vmem:[%s7102_s0 + $0x128] sm:$0xff]  ;;  %v873_v55 = vmul.f32 0.6931472, %v3106_v11 }
 0x2a3   :  { %7585 = vst [vmem:[#allocation71_spill] sm:$0xff] %v5515_v49  ;;  %v5531_v30 = vadd.f32 %v861_v51, %v7589_v39  ;;  %v3110_v48 = vpop.eup %3109  ;;  %v5535_v49 = vadd.f32 %v863_v59, %v7591_v4  ;;  %v5543_v51 = vld [vmem:[%s7102_s0 + $0x118] sm:$0xff]  ;;  %v5555_v40 = vld [vmem:[%s7102_s0 + $0x120] sm:$0xff]  ;;  %7595 = vst [vmem:[#allocation74_spill] sm:$0xff] %v5562_v56  ;;  %v5580_v60 = vadd.f32 %v869_v63, %v7600_v26  ;;  %v875_v32 = vmul.f32 0.6931472, %v3108_v22 }
 0x2a4   :  { %v3112_v54 = vpop.eup %3111  ;;  %v7596_v45 = vld [vmem:[#allocation34_spill] sm:$0xff]  ;;  %v5585_v11 = vld [vmem:[%s7102_s0 + $0x138] sm:$0xff]  ;;  %v877_v5 = vmul.f32 0.6931472, %v3110_v48  ;;  %vm7283_vm6 = vcmp.ne.s32.totalorder %v4954_v62, 4294967196  ;;  %v2723_v26 = vsel %vm2393_vm3, %v2849_v6, 0.0 }
 0x2a5   :  { %7592 = vst [vmem:[#allocation72_spill] sm:$0xff] %v5535_v49  ;;  %v3114_v39 = vpop.eup %3113  ;;  %v5567_v27 = vadd.f32 %v865_v52, %v7596_v45  ;;  %7601 = vst [vmem:[#allocation76_spill] sm:$0xff] %v5580_v60  ;;  %v2722_v52 = vadd.f32 %v2721_v1, %v2720_v31  ;;  %v879_v61 = vmul.f32 0.6931472, %v3112_v54  ;;  %v7604_v22 = vld [vmem:[#allocation81_spill] sm:$0xff]  ;;  %v2850_v31 = vsel %vm7283_vm6, 1.0, %v7504_v47 }
 0x2a6   :  { %v5550_v59 = vpop.xlane.xlu0 %1444  ;;  %v3116_v38 = vpop.eup %3115  ;;  %v881_v1 = vmul.f32 0.6931472, %v3114_v39  ;;  %3131 = vlog2.f32 %v7604_v22  ;;  %v5608_v39 = vld [vmem:[%s7102_s0 + $0x148] sm:$0xff]  ;;  %v5618_v62 = vld [vmem:[%s7102_s0 + $0x150] sm:$0xff]  ;;  %v5627_v6 = vld [vmem:[%s7102_s0 + $0x158] sm:$0xff]  ;;  %vm7289_vm6 = vcmp.ne.s32.totalorder %v5040_v23, 4294967196 }
 0x2a7   :  { %7594 = vst [vmem:[#allocation73_spill] sm:$0xff] %v5550_v59  ;;  %7597 = vst [vmem:[#allocation75_spill] sm:$0xff] %v5567_v27  ;;  %v7598_v59 = vld [vmem:[#allocation35_spill] sm:$0xff]  ;;  %v3118_v4 = vpop.eup %3117  ;;  %v7607_v22 = vld [vmem:[#allocation38_spill] sm:$0xff] }
 0x2a8   :  { %v5570_v17 = vadd.f32 %v867_v10, %v7598_v59  ;;  %v7602_v59 = vld [vmem:[#allocation37_spill] sm:$0xff]  ;;  %v3120_v56 = vpop.eup %3119  ;;  %7606 = vst [vmem:[#allocation28_spill] sm:$0xff] %v5608_v39  ;;  %v5613_v10 = vadd.f32 %v873_v55, %v7607_v22  ;;  %7608 = vst [vmem:[#allocation29_spill] sm:$0xff] %v5618_v62  ;;  %v885_v27 = vmul.f32 0.6931472, %v3118_v4  ;;  %v7611_v22 = vld [vmem:[#allocation39_spill] sm:$0xff] }
 0x2a9   :  { %v5590_v45 = vadd.f32 %v871_v15, %v7602_v59  ;;  %v3122_v63 = vpop.eup %3121  ;;  %v5601_v15 = vld [vmem:[%s7102_s0 + $0x140] sm:$0xff]  ;;  %v883_v59 = vmul.f32 0.6931472, %v3116_v38  ;;  %7610 = vst [vmem:[#allocation31_spill] sm:$0xff] %v5627_v6  ;;  %v2725_v39 = vsel %vm2393_vm3, %v2850_v31, 0.0  ;;  %v2851_v62 = vsel %vm7289_vm6, 1.0, %v7504_v47  ;;  %v5649_v6 = vpop.permute.xlu1 %1139 }
 0x2aa   :  { %7599 = vst [vmem:[#allocation27_spill] sm:$0xff] %v5570_v17  ;;  %7605 = vst [vmem:[#allocation78_spill] sm:$0xff] %v5601_v15  ;;  %v3124_v54 = vpop.eup %3123  ;;  %v2724_v15 = vadd.f32 %v2723_v26, %v2722_v52  ;;  %v5622_v49 = vpop.xlane.xlu0 %1447  ;;  %v5632_v17 = vadd.f32 %v875_v32, %v7611_v22  ;;  %v7612_v48 = vld [vmem:[#allocation40_spill] sm:$0xff]  ;;  %v7614_v52 = vld [vmem:[#allocation41_spill] sm:$0xff]  ;;  %v889_v60 = vmul.f32 0.6931472, %v3122_v63 }
 0x2ab   :  { %7603 = vst [vmem:[#allocation77_spill] sm:$0xff] %v5590_v45  ;;  %v3126_v38 = vpop.eup %3125  ;;  %7609 = vst [vmem:[#allocation30_spill] sm:$0xff] %v5622_v49  ;;  %v5637_v4 = vadd.f32 %v877_v5, %v7612_v48  ;;  %v5640_v26 = vadd.f32 %v879_v61, %v7614_v52  ;;  %v887_v49 = vmul.f32 0.6931472, %v3120_v56  ;;  %v7616_v55 = vld [vmem:[#allocation42_spill] sm:$0xff]  ;;  %v7618_v5 = vld [vmem:[#allocation43_spill] sm:$0xff] }
 0x2ac   :  { %v5646_v45 = vadd.f32 %v881_v1, %v7616_v55  ;;  %v891_v32 = vmul.f32 0.6931472, %v3124_v54  ;;  %v893_v22 = vmul.f32 0.6931472, %v3126_v38  ;;  %v7617_v31 = vld [vmem:[#allocation82_spill] sm:$0xff]  ;;  %v5652_v48 = vadd.f32 %v883_v59, %v7618_v5  ;;  %v7620_v61 = vld [vmem:[#allocation83_spill] sm:$0xff]  ;;  %v3128_v55 = vpop.eup %3127 }
 0x2ad   :  { %7613 = vst [vmem:[#allocation32_spill] sm:$0xff] %v5637_v4  ;;  %7615 = vst [vmem:[#allocation79_spill] sm:$0xff] %v5640_v26  ;;  %3133 = vlog2.f32 %v7617_v31  ;;  %v2726_v56 = vadd.f32 %v2725_v39, %v2724_v15  ;;  %v5658_v63 = vld [vmem:[%s7102_s0 + $0x160] sm:$0xff]  ;;  %vm7297_vm6 = vcmp.ne.s32.totalorder %v4966_v14, 4294967196  ;;  %v2727_v59 = vsel %vm2393_vm3, %v2851_v62, 0.0  ;;  %v5670_v15 = vld [vmem:[%s7102_s0 + $0x170] sm:$0xff] }
 0x2ae   :  { %7619 = vst [vmem:[#allocation33_spill] sm:$0xff] %v5652_v48  ;;  %3135 = vlog2.f32 %v7620_v61  ;;  %v7621_v54 = vld [vmem:[#allocation44_spill] sm:$0xff]  ;;  %7622 = vst [vmem:[#allocation80_spill] sm:$0xff] %v5670_v15  ;;  %v5677_v52 = vld [vmem:[%s7102_s0 + $0x168] sm:$0xff]  ;;  %v2852_v62 = vsel %vm7297_vm6, 1.0, %v7504_v47  ;;  %v5684_v5 = vpop.xlane.xlu0 %1450  ;;  %vm7298_vm6 = vcmp.ne.s32.totalorder %v5057_v2, 4294967196 }
 0x2af   :  { %v5663_v38 = vadd.f32 %v885_v27, %v7621_v54  ;;  %v3130_v31 = vpop.eup %3129  ;;  %7623 = vst [vmem:[#allocation34_spill] sm:$0xff] %v5684_v5  ;;  %v7624_v61 = vld [vmem:[#allocation46_spill] sm:$0xff]  ;;  %v7626_v1 = vld [vmem:[#allocation45_spill] sm:$0xff]  ;;  %v5695_v23 = vld [vmem:[%s7102_s0 + $0x178] sm:$0xff]  ;;  %v2728_v5 = vadd.f32 %v2727_v59, %v2726_v56  ;;  %v2729_v48 = vsel %vm2393_vm3, %v2852_v62, 0.0  ;;  %v2853_v56 = vsel %vm7298_vm6, 1.0, %v7504_v47 }
 0x2b0   :  { %v5687_v54 = vadd.f32 %v889_v60, %v7624_v61  ;;  %v5690_v39 = vadd.f32 %v887_v49, %v7626_v1  ;;  %v7628_v4 = vld [vmem:[#allocation5_spill] sm:$0xff]  ;;  %v7630_v49 = vld [vmem:[#allocation47_spill] sm:$0xff]  ;;  %v7632_v27 = vld [vmem:[#allocation84_spill] sm:$0xff] }
 0x2b1   :  { %v5700_v15 = vadd.f32 %v893_v22, %v7628_v4  ;;  %v5705_v14 = vld [vmem:[%s7102_s0 + $0x188] sm:$0xff]  ;;  %v5710_v1 = vadd.f32 %v891_v32, %v7630_v49  ;;  %v5715_v61 = vld [vmem:[%s7102_s0 + $0x180] sm:$0xff]  ;;  %v895_v22 = vmul.f32 0.6931472, %v3128_v55  ;;  %3137 = vlog2.f32 %v7632_v27  ;;  %v5723_v26 = vld [vmem:[%s7102_s0 + $0x190] sm:$0xff]  ;;  %v5730_v4 = vpop.permute.xlu1 %1145 }
 0x2b2   :  { %7625 = vst [vmem:[#allocation35_spill] sm:$0xff] %v5687_v54  ;;  %7627 = vst [vmem:[#allocation36_spill] sm:$0xff] %v5690_v39  ;;  %v897_v49 = vmul.f32 0.6931472, %v3130_v31  ;;  %v7633_v60 = vld [vmem:[#allocation85_spill] sm:$0xff]  ;;  %v5748_v31 = vld [vmem:[%s7102_s0 + $0x198] sm:$0xff]  ;;  %v2730_v2 = vadd.f32 %v2729_v48, %v2728_v5  ;;  %v7637_v54 = vsub.f32 %v5464_v25, %v5440_v37  ;;  %vm7314_vm4 = vcmp.eq.s32.totalorder %v4448_v24, %v5730_v4 }
 0x2b3   :  { %7629 = vst [vmem:[#allocation37_spill] sm:$0xff] %v5700_v15  ;;  %7631 = vst [vmem:[#allocation81_spill] sm:$0xff] %v5710_v1  ;;  %3139 = vlog2.f32 %v7633_v60  ;;  %v5741_v59 = vld [vmem:[%s7102_s0 + $0x1a0] sm:$0xff]  ;;  %v3132_v62 = vpop.eup %3131  ;;  %v5758_v60 = vld [vmem:[%s7102_s0 + $0x1b0] sm:$0xff]  ;;  %v2731_v15 = vsel %vm2393_vm3, %v2853_v56, 0.0  ;;  %v2854_v37 = vsel %vm7307_vm2, 1.0, %v7504_v47  ;;  %vm7315_vm2 = vcmp.eq.s32.totalorder %v4448_v24, %v5649_v6 }
 0x2b4   :  { %3141 = vlog2.f32 %v4442_v50  ;;  %7634 = vst [vmem:[#allocation38_spill] sm:$0xff] %v5741_v59  ;;  %7635 = vst [vmem:[#allocation39_spill] sm:$0xff] %v5758_v60  ;;  %v5765_v32 = vld [vmem:[%s7102_s0 + $0x1a8] sm:$0xff]  ;;  %v7640_v50 = vld [vmem:[#allocation7_spill] sm:$0xff]  ;;  %v899_v48 = vmul.f32 0.6931472, %v3132_v62 }
 0x2b5   :  { %3143 = vlog2.f32 %v4444_v41  ;;  %7636 = vst [vmem:[#allocation40_spill] sm:$0xff] %v5765_v32  ;;  %v1556_v41 = vmul.f32 1.442695, %v5083_v36  ;;  %v7638_v39 = vld [vmem:[#allocation6_spill] sm:$0xff]  ;;  %v5783_v1 = vadd.f32 %v897_v49, %v7640_v50  ;;  %v1554_v25 = vmul.f32 1.442695, %v5028_v7  ;;  %v5805_v49 = vpop.permute.xlu1 %1151 }
 0x2b6   :  { %v5736_v55 = vpop.permute.xlu0 %1136  ;;  %v5777_v27 = vadd.f32 %v895_v22, %v7638_v39  ;;  %v5794_v39 = vld [vmem:[%s7104_s2] ss:$0 sm:$0xff]  ;;  %v1558_v22 = vmul.f32 1.442695, %v5052_v21  ;;  %v5818_v62 = vld [vmem:[%s7102_s0 + $0x1b8] sm:$0xff]  ;;  %v2733_v32 = vsel %vm2393_vm3, %v2854_v37, 0.0 }
 0x2b7   :  { %vm7309_vm6 = vcmp.eq.s32.totalorder %v4448_v24, %v5736_v55  ;;  %7641 = vst [vmem:[#allocation42_spill] sm:$0xff] %v5783_v1  ;;  %3145 = vpow2.f32 %v1556_v41  ;;  %7643 = vst [vmem:[#allocation82_spill] sm:$0xff] %v5818_v62  ;;  %v7644_v41 = vsub.f32 %v5475_v3, %v5444_v20 }
 0x2b8   :  { %v1329_v59 = vsel %vm7309_vm6, %v7637_v54, 0.0  ;;  %7639 = vst [vmem:[#allocation41_spill] sm:$0xff] %v5777_v27  ;;  %v1966_v54 = vsel %vm1255_vm7, %v5794_v39, 0.0  ;;  %3147 = vpow2.f32 %v1554_v25  ;;  %vm7313_vm7 = vcmp.ne.s32.totalorder %v5076_v28, 4294967196  ;;  %7659 = vst [vmem:[#allocation6_spill] sm:$0xff] %v5929_v16  ;;  %v7665_v28 = vld [vmem:[#allocation26_spill] sm:$0xff] }
 0x2b9   :  { %v1455_v60 = vsel %vm207_vm0, %v1329_v59, 0.0  ;;  %v2732_v59 = vadd.f32 %v2731_v15, %v2730_v2  ;;  %v1560_v2 = vmul.f32 1.442695, %v5085_v57  ;;  %v2072_v15 = vsel %vm207_vm0, %v1966_v54, 0.0  ;;  %v7683_v27 = vld [vmem:[#allocation75_spill] sm:$0xff] }
 0x2ba   :  { %1456 = vadd.xlane.f32.xlu1 %v1455_v60  ;;  %v5789_v5 = vpop.permute.xlu0 %1142  ;;  %v3134_v56 = vpop.eup %3133  ;;  %v1330_v37 = vsel %vm7315_vm2, %v7644_v41, 0.0  ;;  %3149 = vpow2.f32 %v1558_v22  ;;  %vm7320_vm2 = vcmp.ne.s32.totalorder %v5016_v44, 4294967196  ;;  %v1968_v44 = vsel %vm1257_vm9, %v5794_v39, 0.0 }
 0x2bb   :  { %vm7312_vm6 = vcmp.eq.s32.totalorder %v4448_v24, %v5789_v5  ;;  %v3136_v0 = vpop.eup %3135  ;;  %v901_v54 = vmul.f32 0.6931472, %v3134_v56  ;;  %v2734_v3 = vadd.f32 %v2733_v32, %v2732_v59  ;;  %v7648_v56 = vld [vmem:[#allocation8_spill] sm:$0xff]  ;;  %3151 = vpow2.f32 %v1560_v2  ;;  %v5861_v41 = vpop.permute.xlu1 %1157 }
 0x2bc   :  { %v1331_v50 = vsel %vm7312_vm6, %v7642_v19, 0.0  ;;  %v7645_v19 = vsub.f32 %v5526_v29, %v5494_v58  ;;  %v5846_v20 = vmul.f32 0.6931472, %v3136_v0  ;;  %v5851_v58 = vld [vmem:[%s7102_s0 + $0x1c0] sm:$0xff]  ;;  %v5856_v22 = vadd.f32 %v899_v48, %v7648_v56 }
 0x2bd   :  { %v1461_v33 = vsel %vm207_vm0, %v1331_v50, 0.0  ;;  %v2855_v50 = vsel %vm7313_vm7, 1.0, %v7504_v47  ;;  %7647 = vst [vmem:[#allocation83_spill] sm:$0xff] %v5851_v58  ;;  %v1458_v0 = vsel %vm207_vm0, %v1330_v37, 0.0  ;;  %vm7333_vm7 = vcmp.ne.s32.totalorder %v4988_v12, 4294967196 }
 0x2be   :  { %2073 = vadd.xlane.f32.xlu1 %v2072_v15  ;;  %1462 = vadd.xlane.f32.xlu0 %v1461_v33  ;;  %v5827_v53 = vpop.permute.xlu0 %1148  ;;  %v1332_v25 = vsel %vm7314_vm4, %v7645_v19, 0.0  ;;  %7646 = vst [vmem:[#allocation43_spill] sm:$0xff] %v5846_v20  ;;  %7649 = vst [vmem:[#allocation44_spill] sm:$0xff] %v5856_v22  ;;  %v5858_v15 = vpop.eup %3137  ;;  %v1562_v33 = vmul.f32 1.442695, %v5106_v42  ;;  %v2735_v19 = vsel %vm2393_vm3, %v2855_v50, 0.0  ;;  %v7652_v2 = vsub.f32 %v5543_v51, %v5510_v34 }
 0x2bf   :  { %vm1269_vm6 = vcmp.eq.s32.totalorder %v4448_v24, %v5827_v53  ;;  %7650 = vst [vmem:[#allocation46_spill] sm:$0xff] %v5858_v15  ;;  %v1464_v32 = vsel %vm207_vm0, %v1332_v25, 0.0  ;;  %v1967_v48 = vsel %vm1256_vm8, %v5794_v39, 0.0  ;;  %v2856_v50 = vsel %vm7333_vm7, 1.0, %v7504_v47 }
 0x2c0   :  { %v5865_v59 = vpop.eup %3139  ;;  %v1333_v37 = vsel %vm1269_vm6, %v7652_v2, 0.0  ;;  %vm7318_vm4 = vcmp.ne.s32.totalorder %v4999_v43, 4294967196  ;;  %vm1270_vm8 = vcmp.eq.s32.totalorder %v4448_v24, %v5805_v49  ;;  %v2859_v51 = vsel %vm7320_vm2, 1.0, %v7504_v47 }
 0x2c1   :  { %7651 = vst [vmem:[#allocation45_spill] sm:$0xff] %v5865_v59  ;;  %v5879_v25 = vpop.eup %3141  ;;  %v2858_v34 = vsel %vm7318_vm4, 1.0, %v7504_v47  ;;  %v1564_v56 = vmul.f32 1.442695, %v5108_v35  ;;  %3153 = vpow2.f32 %v1562_v33  ;;  %v2736_v29 = vadd.f32 %v2735_v19, %v2734_v3  ;;  %v7661_v19 = vld [vmem:[#allocation104_spill] sm:$0xff] }
 0x2c2   :  { %1459 = vadd.xlane.f32.xlu1 %v1458_v0  ;;  %1465 = vadd.xlane.f32.xlu0 %v1464_v32  ;;  %7653 = vst [vmem:[#allocation5_spill] sm:$0xff] %v5879_v25  ;;  %v5888_v9 = vpop.eup %3143  ;;  %v5897_v0 = vpop.permute.xlu0 %1154  ;;  %v7655_v32 = vld [vmem:[#allocation9_spill] sm:$0xff]  ;;  %v2075_v60 = vsel %vm207_vm0, %v1967_v48, 0.0  ;;  %v1467_v12 = vsel %vm207_vm0, %v1333_v37, 0.0  ;;  %v2737_v43 = vsel %vm2393_vm3, %v2856_v50, 0.0  ;;  %vm7332_vm4 = vcmp.ne.s32.totalorder %v5094_v8, 4294967196 }
 0x2c3   :  { %7654 = vst [vmem:[#allocation47_spill] sm:$0xff] %v5888_v9  ;;  %v5900_v2 = vadd.f32 %v901_v54, %v7655_v32  ;;  %v7657_v54 = vsub.f32 %v5555_v40, %v5518_v13  ;;  %v5917_v33 = vsel %vm2393_vm3, %v2858_v34, 0.0  ;;  %vm1271_vm2 = vcmp.eq.s32.totalorder %v4448_v24, %v5897_v0  ;;  %v7664_v8 = vld [vmem:[#allocation74_spill] sm:$0xff] }
 0x2c4   :  { %7658 = vst [vmem:[#allocation85_spill] sm:$0xff] %v5917_v33  ;;  %v5934_v40 = vsel %vm2393_vm3, %v2859_v51, 0.0  ;;  %vm7323_vm9 = vcmp.ne.s32.totalorder %v5035_v46, 4294967196  ;;  %3155 = vpow2.f32 %v1564_v56  ;;  %v1566_v48 = vmul.f32 1.442695, %v7661_v19  ;;  %v3146_v37 = vpop.eup %3145 }
 0x2c5   :  { %7656 = vst [vmem:[#allocation84_spill] sm:$0xff] %v5900_v2  ;;  %v1334_v3 = vsel %vm1270_vm8, %v7657_v54, 0.0  ;;  %7660 = vst [vmem:[#allocation7_spill] sm:$0xff] %v5934_v40  ;;  %v5941_v50 = vsel %vm7323_vm9, 1.0, %v7504_v47  ;;  %v2738_v34 = vadd.f32 %v2737_v43, %v2736_v29  ;;  %v2078_v32 = vsel %vm207_vm0, %v1968_v44, 0.0  ;;  %v7671_v44 = vld [vmem:[#allocation105_spill] sm:$0xff] }
 0x2c6   :  { %2076 = vadd.xlane.f32.xlu1 %v2075_v60  ;;  %1468 = vadd.xlane.f32.xlu0 %v1467_v12  ;;  %v2857_v60 = vsel %vm7332_vm4, 1.0, %v7504_v47  ;;  %v5922_v12 = vpop.permute.xlu1 %1163  ;;  %7662 = vst [vmem:[#allocation8_spill] sm:$0xff] %v5941_v50  ;;  %v1470_v54 = vsel %vm207_vm0, %v1334_v3, 0.0  ;;  %v1969_v56 = vsel %vm1258_vm10, %v5794_v39, 0.0  ;;  %v7666_v9 = vsub.f32 %v7664_v8, %v7665_v28  ;;  %v3148_v3 = vpop.eup %3147 }
 0x2c7   :  { %v2739_v13 = vsel %vm2393_vm3, %v2857_v60, 0.0  ;;  %v1970_v29 = vsel %vm1259_vm11, %v5794_v39, 0.0  ;;  %vm1272_vm9 = vcmp.eq.s32.totalorder %v4448_v24, %v5861_v41  ;;  %v1972_v8 = vsel %vm1261_vm13, %v5794_v39, 0.0  ;;  %v3150_v51 = vpop.eup %3149  ;;  %v5975_v59 = vpop.permute.xlu0 %1160 }
 0x2c8   :  { %v1335_v43 = vsel %vm1271_vm2, %v7666_v9, 0.0  ;;  %3157 = vpow2.f32 %v1566_v48  ;;  %v1568_v46 = vmul.f32 1.442695, %v7671_v44  ;;  %v1683_v25 = vsub.f32 1.0, %v3146_v37  ;;  %v3152_v22 = vpop.eup %3151 }
 0x2c9   :  { %v1973_v20 = vsel %vm1262_vm14, %v5794_v39, 0.0  ;;  %v5981_v2 = vadd.f32 %v2739_v13, %v2738_v34  ;;  %v2081_v15 = vsel %vm207_vm0, %v1969_v56, 0.0  ;;  %v1473_v9 = vsel %vm207_vm0, %v1335_v43, 0.0 }
 0x2ca   :  { %2079 = vadd.xlane.f32.xlu1 %v2078_v32  ;;  %1471 = vadd.xlane.f32.xlu0 %v1470_v54  ;;  %v1971_v32 = vsel %vm1260_vm12, %v5794_v39, 0.0  ;;  %v1974_v54 = vsel %vm1263_vm15, %v5794_v39, 0.0  ;;  %v5983_v28 = vpop.permute.xlu1 %1169  ;;  %v2084_v48 = vsel %vm207_vm0, %v1970_v29, 0.0  ;;  %v1682_v16 = vsub.f32 1.0, %v3148_v3 }
 0x2cb   :  { %7673 = vst [vmem:[#allocation9_spill] sm:$0xff] %v5981_v2  ;;  %v7674_v37 = vsub.f32 %v5575_v18, %v5531_v30  ;;  %v2090_v34 = vsel %vm207_vm0, %v1972_v8, 0.0  ;;  %v5996_v60 = vsel %vm207_vm0, %v1974_v54, 0.0  ;;  %v1684_v56 = vsub.f32 1.0, %v3150_v51  ;;  %v7675_v8 = vld [vmem:[#allocation107_spill] sm:$0xff]  ;;  %v6026_v58 = vpop.permute.xlu0 %1166 }
 0x2cc   :  { %vm1273_vm10 = vcmp.eq.s32.totalorder %v4448_v24, %v5975_v59  ;;  %v2087_v43 = vsel %vm207_vm0, %v1971_v32, 0.0  ;;  %v1875_v30 = vsub.f32 0.0, %v5083_v36  ;;  %v1874_v18 = vsub.f32 0.0, %v5028_v7  ;;  %v7676_v32 = vld [vmem:[#allocation108_spill] sm:$0xff]  ;;  %7681 = vst [vmem:[#allocation104_spill] sm:$0xff] %v6026_v58  ;;  %v7689_v2 = vld [vmem:[#allocation27_spill] sm:$0xff] }
 0x2cd   :  { %v1336_v13 = vsel %vm1272_vm9, %v7674_v37, 0.0  ;;  %3159 = vpow2.f32 %v1568_v46  ;;  %v1747_v29 = vmax.f32 %v1683_v25, 0.0  ;;  %v1876_v3 = vsub.f32 0.0, %v5052_v21  ;;  %v7677_v36 = vld [vmem:[#allocation72_spill] sm:$0xff] }
 0x2ce   :  { %2082 = vadd.xlane.f32.xlu1 %v2081_v15  ;;  %1474 = vadd.xlane.f32.xlu0 %v1473_v9  ;;  %v6002_v15 = vsel %vm207_vm0, %v1973_v20, 0.0  ;;  %v1570_v54 = vmul.f32 1.442695, %v7675_v8  ;;  %v1685_v9 = vsub.f32 1.0, %v3152_v22  ;;  %v1476_v51 = vsel %vm207_vm0, %v1336_v13, 0.0  ;;  %v3154_v37 = vpop.eup %3153  ;;  %v7679_v22 = vld [vmem:[#allocation113_spill] sm:$0xff] }
 0x2cf   :  { %v1877_v50 = vsub.f32 0.0, %v5085_v57  ;;  %v1572_v1 = vmul.f32 1.442695, %v7676_v32  ;;  %v1746_v20 = vmax.f32 %v1682_v16, 0.0  ;;  %v7678_v7 = vsub.f32 %v5585_v11, %v7677_v36  ;;  %v6021_v57 = vpop.permute.xlu1 %1172  ;;  %v7680_v11 = vld [vmem:[#allocation114_spill] sm:$0xff] }
 0x2d0   :  { %v1878_v21 = vsub.f32 0.0, %v5106_v42  ;;  %v2202_v25 = vmul.f32 %v7679_v22, %v1875_v30  ;;  %v1748_v13 = vmax.f32 %v1684_v56, 0.0  ;;  %vm1274_vm11 = vcmp.eq.s32.totalorder %v4448_v24, %v5922_v12 }
 0x2d1   :  { %v1337_v46 = vsel %vm1273_vm10, %v7678_v7, 0.0  ;;  %v1879_v16 = vsub.f32 0.0, %v5108_v35  ;;  %v2201_v36 = vmul.f32 %v7680_v11, %v1874_v18  ;;  %v3156_v7 = vpop.eup %3155  ;;  %3161 = vpow2.f32 %v1570_v54  ;;  %v7682_v35 = vld [vmem:[#allocation78_spill] sm:$0xff] }
 0x2d2   :  { %2085 = vadd.xlane.f32.xlu1 %v2084_v48  ;;  %1477 = vadd.xlane.f32.xlu0 %v1476_v51  ;;  %v1811_v51 = vmul.f32 %v1747_v29, %v1747_v29  ;;  %v1749_v42 = vmax.f32 %v1685_v9, 0.0  ;;  %v1686_v40 = vsub.f32 1.0, %v3154_v37  ;;  %v1479_v56 = vsel %vm207_vm0, %v1337_v46, 0.0  ;;  %v7685_v29 = vld [vmem:[#allocation111_spill] sm:$0xff]  ;;  %v7688_v37 = vld [vmem:[#allocation28_spill] sm:$0xff] }
 0x2d3   :  { %3163 = vpow2.f32 %v1572_v1  ;;  %v1810_v22 = vmul.f32 %v1746_v20, %v1746_v20  ;;  %v7684_v48 = vsub.f32 %v7682_v35, %v7683_v27  ;;  %v1574_v11 = vmul.f32 1.442695, %v7685_v29  ;;  %v6042_v62 = vpop.permute.xlu1 %1178 }
 0x2d4   :  { %v2266_v54 = vmul.f32 %v2202_v25, %v1811_v51  ;;  %v1812_v9 = vmul.f32 %v1748_v13, %v1748_v13  ;;  %vm1275_vm12 = vcmp.eq.s32.totalorder %v4448_v24, %v6026_v58  ;;  %v1687_v20 = vsub.f32 1.0, %v3156_v7  ;;  %v7687_v25 = vld [vmem:[#allocation110_spill] sm:$0xff]  ;;  %v7692_v7 = vld [vmem:[#allocation123_spill] sm:$0xff] }
 0x2d5   :  { %v1338_v18 = vsel %vm1274_vm11, %v7684_v48, 0.0  ;;  %v3158_v46 = vpop.eup %3157  ;;  %v1813_v35 = vmul.f32 %v1749_v42, %v1749_v42  ;;  %v1750_v30 = vmax.f32 %v1686_v40, 0.0  ;;  %v1576_v13 = vmul.f32 1.442695, %v7687_v25 }
 0x2d6   :  { %2088 = vadd.xlane.f32.xlu1 %v2087_v43  ;;  %1480 = vadd.xlane.f32.xlu0 %v1479_v56  ;;  %v2265_v43 = vmul.f32 %v2201_v36, %v1810_v22  ;;  %v7686_v56 = vld [vmem:[#allocation120_spill] sm:$0xff]  ;;  %v1482_v48 = vsel %vm207_vm0, %v1338_v18, 0.0  ;;  %v7690_v1 = vsub.f32 %v7688_v37, %v7689_v2  ;;  %3165 = vpow2.f32 %v1574_v11 }
 0x2d7   :  { %v2203_v27 = vmul.f32 %v7686_v56, %v1876_v3  ;;  %v2330_v3 = vsel %vm144_vm1, %v2266_v54, 0.0  ;;  %v2204_v42 = vmul.f32 %v7692_v7, %v1877_v50  ;;  %vm1276_vm13 = vcmp.eq.s32.totalorder %v4448_v24, %v5983_v28  ;;  %v7693_v22 = vld [vmem:[#allocation16_spill] sm:$0xff]  ;;  %v7695_v56 = vld [vmem:[#allocation117_spill] sm:$0xff] }
 0x2d8   :  { %v1339_v36 = vsel %vm1275_vm12, %v7690_v1, 0.0  ;;  %vm7694_vm14 = vcmp.ne.s32.totalorder %v7693_v22, 4294967196  ;;  %v1578_v2 = vmul.f32 1.442695, %v7695_v56  ;;  %v1751_v37 = vmax.f32 %v1687_v20, 0.0  ;;  %v7697_v54 = vld [vmem:[#allocation116_spill] sm:$0xff] }
 0x2d9   :  { %v2329_v18 = vsel %vm7694_vm14, %v2265_v43, 0.0  ;;  %v1688_v51 = vsub.f32 1.0, %v3158_v46  ;;  %v2267_v1 = vmul.f32 %v2203_v27, %v1812_v9  ;;  %v1485_v40 = vsel %vm207_vm0, %v1339_v36, 0.0  ;;  %v7698_v43 = vld [vmem:[#allocation29_spill] sm:$0xff]  ;;  %v7699_v22 = vld [vmem:[#allocation76_spill] sm:$0xff]  ;;  %v6077_v27 = vpop.permute.xlu1 %1184 }
 0x2da   :  { %2091 = vadd.xlane.f32.xlu1 %v2090_v34  ;;  %1483 = vadd.xlane.f32.xlu0 %v1482_v48  ;;  %v3160_v33 = vpop.eup %3159  ;;  %v1814_v34 = vmul.f32 %v1750_v30, %v1750_v30  ;;  %v7696_v48 = vld [vmem:[#allocation129_spill] sm:$0xff]  ;;  %3167 = vpow2.f32 %v1576_v13  ;;  %v2395_v50 = vsel %vm2393_vm3, %v2330_v3, 0.0  ;;  %v1580_v7 = vmul.f32 1.442695, %v7697_v54  ;;  %v6079_v3 = vpop.permute.xlu0 %1175 }
 0x2db   :  { %v2205_v11 = vmul.f32 %v7696_v48, %v1878_v21  ;;  %v7700_v58 = vsub.f32 %v7698_v43, %v7699_v22  ;;  %v2394_v30 = vsel %vm2393_vm3, %v2329_v18, 0.0  ;;  %v7701_v21 = vld [vmem:[#allocation119_spill] sm:$0xff]  ;;  %v2268_v46 = vmul.f32 %v2204_v42, %v1813_v35 }
 0x2dc   :  { %v2206_v20 = vmul.f32 %v7701_v21, %v1879_v16  ;;  %vm1277_vm15 = vcmp.eq.s32.totalorder %v4448_v24, %v6021_v57  ;;  %3169 = vpow2.f32 %v1578_v2  ;;  %v1752_v13 = vmax.f32 %v1688_v51, 0.0  ;;  %v7705_v2 = vld [vmem:[#allocation31_spill] sm:$0xff] }
 0x2dd   :  { %v1340_v9 = vsel %vm1276_vm13, %v7700_v58, 0.0  ;;  %v1689_v36 = vsub.f32 1.0, %v3160_v33  ;;  %v1887_v48 = vsub.f32 0.0, %v7697_v54  ;;  %v2269_v18 = vmul.f32 %v2205_v11, %v1814_v34  ;;  %v7761_v54 = vld [vmem:[#allocation102_spill] sm:$0xff] }
 0x2de   :  { %2094 = vadd.xlane.f32.xlu1 %v6002_v15  ;;  %1486 = vadd.xlane.f32.xlu0 %v1485_v40  ;;  %v1815_v15 = vmul.f32 %v1751_v37, %v1751_v37  ;;  %v7702_v40 = vld [vmem:[#allocation48_spill] sm:$0xff]  ;;  %v1488_v16 = vsel %vm207_vm0, %v1340_v9, 0.0  ;;  %v3162_v35 = vpop.eup %3161  ;;  %v2396_v42 = vadd.f32 %v2395_v50, %v2394_v30  ;;  %v1886_v43 = vsub.f32 0.0, %v7695_v56  ;;  %v7706_v37 = vld [vmem:[#allocation77_spill] sm:$0xff] }
 0x2df   :  { %vm7703_vm1 = vcmp.ne.s32.totalorder %v7702_v40, 4294967196  ;;  %v1975_v51 = vsel %vm1264_vm5, %v5794_v39, 0.0  ;;  %v7707_v22 = vsub.f32 %v7705_v2, %v7706_v37  ;;  %3171 = vpow2.f32 %v1580_v7  ;;  %v7708_v50 = vld [vmem:[#allocation49_spill] sm:$0xff]  ;;  %v7711_v40 = vld [vmem:[#allocation122_spill] sm:$0xff]  ;;  %v6107_v7 = vpop.permute.xlu1 %1187 }
 0x2e0   :  { %v2331_v58 = vsel %vm7703_vm1, %v2267_v1, 0.0  ;;  %v3164_v34 = vpop.eup %3163  ;;  %v2270_v11 = vmul.f32 %v2206_v20, %v1815_v15  ;;  %vm7709_vm14 = vcmp.ne.s32.totalorder %v7708_v50, 4294967196  ;;  %vm1278_vm1 = vcmp.eq.s32.totalorder %v4448_v24, %v6079_v3  ;;  %v7712_v37 = vld [vmem:[#allocation50_spill] sm:$0xff] }
 0x2e1   :  { %v1341_v1 = vsel %vm1277_vm15, %v7707_v22, 0.0  ;;  %v2332_v9 = vsel %vm7709_vm14, %v2268_v46, 0.0  ;;  %v1816_v30 = vmul.f32 %v1752_v13, %v1752_v13  ;;  %v7710_v21 = vsub.f32 0.0, %v7661_v19  ;;  %v3354_v3 = vld [vmem:[%s7102_s0 + $0x1d0] sm:$0xff] }
 0x2e2   :  { %2097 = vadd.xlane.f32.xlu1 %v5996_v60  ;;  %1489 = vadd.xlane.f32.xlu0 %v1488_v16  ;;  %v2397_v60 = vsel %vm2393_vm3, %v2331_v58, 0.0  ;;  %v1753_v33 = vmax.f32 %v1689_v36, 0.0  ;;  %v1690_v2 = vsub.f32 1.0, %v3162_v35  ;;  %vm7713_vm5 = vcmp.ne.s32.totalorder %v7712_v37, 4294967196  ;;  %v7716_v58 = vld [vmem:[#allocation51_spill] sm:$0xff]  ;;  %v7721_v37 = vld [vmem:[#allocation132_spill] sm:$0xff] }
 0x2e3   :  { %v2207_v16 = vmul.f32 %v7711_v40, %v7710_v21  ;;  %v2333_v22 = vsel %vm7713_vm5, %v2269_v18, 0.0  ;;  %v2099_v20 = vsel %vm207_vm0, %v1975_v51, 0.0  ;;  %v1491_v46 = vsel %vm207_vm0, %v1341_v1, 0.0  ;;  %v7718_v51 = vld [vmem:[#allocation126_spill] sm:$0xff] }
 0x2e4   :  { %v2399_v15 = vsel %vm2393_vm3, %v2332_v9, 0.0  ;;  %v1691_v50 = vsub.f32 1.0, %v3164_v34  ;;  %v7714_v13 = vsub.f32 %v5658_v63, %v5613_v10  ;;  %vm7715_vm14 = vcmp.eq.s32.totalorder %v4448_v24, %v5736_v55  ;;  %v3166_v10 = vpop.eup %3165  ;;  %v7720_v9 = vld [vmem:[#allocation125_spill] sm:$0xff] }
 0x2e5   :  { %v1976_v36 = vsel %vm7715_vm14, %v5794_v39, 0.0  ;;  %vm7717_vm5 = vcmp.ne.s32.totalorder %v7716_v58, 4294967196  ;;  %v2398_v35 = vadd.f32 %v2397_v60, %v2396_v42  ;;  %v1582_v1 = vmul.f32 1.442695, %v7718_v51 }
 0x2e6   :  { %v1342_v19 = vsel %vm1278_vm1, %v7714_v13, 0.0  ;;  %2100 = vadd.xlane.f32.xlu1 %v2099_v20  ;;  %1492 = vadd.xlane.f32.xlu0 %v1491_v46  ;;  %v2334_v18 = vsel %vm7717_vm5, %v2270_v11, 0.0  ;;  %vm7334_vm4 = vcmp.eq.s32.totalorder %v4448_v24, %v6042_v62  ;;  %v2271_v63 = vmul.f32 %v2207_v16, %v1816_v30  ;;  %v6132_v20 = vpop.permute.xlu0 %1181 }
 0x2e7   :  { %v7719_v34 = vsub.f32 0.0, %v7671_v44  ;;  %v2401_v40 = vsel %vm2393_vm3, %v2333_v22, 0.0  ;;  %v1584_v55 = vmul.f32 1.442695, %v7721_v37  ;;  %v2400_v46 = vadd.f32 %v2399_v15, %v2398_v35  ;;  %v6147_v15 = vpop.permute.xlu1 %1193  ;;  %v7727_v35 = vld [vmem:[#allocation128_spill] sm:$0xff] }
 0x2e8   :  { %v1817_v11 = vmul.f32 %v1753_v33, %v1753_v33  ;;  %v2102_v42 = vsel %vm207_vm0, %v1976_v36, 0.0  ;;  %v1494_v60 = vsel %vm207_vm0, %v1342_v19, 0.0  ;;  %v1754_v13 = vmax.f32 %v1690_v2, 0.0  ;;  %v3168_v33 = vpop.eup %3167 }
 0x2e9   :  { %v2208_v21 = vmul.f32 %v7720_v9, %v7719_v34  ;;  %v1755_v58 = vmax.f32 %v1691_v50, 0.0  ;;  %vm7722_vm14 = vcmp.eq.s32.totalorder %v4448_v24, %v5649_v6  ;;  %v7723_v30 = vsub.f32 %v5677_v52, %v5632_v17  ;;  %v7724_v50 = vld [vmem:[#allocation52_spill] sm:$0xff]  ;;  %v3170_v52 = vpop.eup %3169  ;;  %v7728_v9 = vld [vmem:[#allocation135_spill] sm:$0xff] }
 0x2ea   :  { %2103 = vadd.xlane.f32.xlu1 %v2102_v42  ;;  %1495 = vadd.xlane.f32.xlu0 %v1494_v60  ;;  %v1977_v44 = vsel %vm7722_vm14, %v5794_v39, 0.0  ;;  %v2403_v22 = vsel %vm2393_vm3, %v2334_v18, 0.0  ;;  %3173 = vpow2.f32 %v1582_v1  ;;  %v2402_v2 = vadd.f32 %v2401_v40, %v2400_v46  ;;  %v7729_v60 = vld [vmem:[#allocation80_spill] sm:$0xff] }
 0x2eb   :  { %v1343_v16 = vsel %vm7334_vm4, %v7723_v30, 0.0  ;;  %vm1280_vm5 = vcmp.eq.s32.totalorder %v4448_v24, %v6132_v20  ;;  %vm7725_vm7 = vcmp.ne.s32.totalorder %v7724_v50, 4294967196  ;;  %v2272_v19 = vmul.f32 %v2208_v21, %v1817_v11  ;;  %v7730_v30 = vld [vmem:[#allocation32_spill] sm:$0xff] }
 0x2ec   :  { %v2335_v6 = vsel %vm7725_vm7, %v2271_v63, 0.0  ;;  %3175 = vpow2.f32 %v1584_v55  ;;  %v1692_v17 = vsub.f32 1.0, %v3166_v10  ;;  %v7726_v36 = vsub.f32 0.0, %v7675_v8  ;;  %v3172_v11 = vpop.eup %3171  ;;  %v3359_v20 = vld [vmem:[%s7102_s0 + $0x1e0] sm:$0xff] }
 0x2ed   :  { %v1586_v18 = vmul.f32 1.442695, %v7728_v9  ;;  %v2105_v1 = vsel %vm207_vm0, %v1977_v44, 0.0  ;;  %v1497_v40 = vsel %vm207_vm0, %v1343_v16, 0.0  ;;  %v1818_v46 = vmul.f32 %v1754_v13, %v1754_v13  ;;  %v7733_v13 = vld [vmem:[#allocation53_spill] sm:$0xff]  ;;  %v7735_v16 = vld [vmem:[#allocation138_spill] sm:$0xff] }
 0x2ee   :  { %v2209_v34 = vmul.f32 %v7727_v35, %v7726_v36  ;;  %v1819_v42 = vmul.f32 %v1755_v58, %v1755_v58  ;;  %v7731_v50 = vsub.f32 %v7729_v60, %v7730_v30  ;;  %2106 = vadd.xlane.f32.xlu1 %v2105_v1  ;;  %1498 = vadd.xlane.f32.xlu0 %v1497_v40  ;;  %v2405_v63 = vsel %vm2393_vm3, %v2335_v6, 0.0  ;;  %v6175_v40 = vpop.permute.xlu1 %1199  ;;  %v7738_v60 = vld [vmem:[#allocation140_spill] sm:$0xff] }
 0x2ef   :  { %vm7732_vm7 = vcmp.eq.s32.totalorder %v4448_v24, %v5789_v5  ;;  %v2404_v21 = vadd.f32 %v2403_v22, %v2402_v2  ;;  %v1693_v55 = vsub.f32 1.0, %v3168_v33  ;;  %vm1281_vm14 = vcmp.eq.s32.totalorder %v4448_v24, %v6077_v27  ;;  %v7737_v2 = vld [vmem:[#allocation131_spill] sm:$0xff]  ;;  %v3362_v27 = vld [vmem:[%s7102_s0 + $0x1e8] sm:$0xff] }
 0x2f0   :  { %v1344_v10 = vsel %vm1280_vm5, %v7731_v50, 0.0  ;;  %v1978_v8 = vsel %vm7732_vm7, %v5794_v39, 0.0  ;;  %vm7734_vm4 = vcmp.ne.s32.totalorder %v7733_v13, 4294967196  ;;  %v1756_v44 = vmax.f32 %v1692_v17, 0.0  ;;  %v7740_v17 = vld [vmem:[#allocation79_spill] sm:$0xff] }
 0x2f1   :  { %v2336_v58 = vsel %vm7734_vm4, %v2272_v19, 0.0  ;;  %v1588_v36 = vmul.f32 1.442695, %v7735_v16  ;;  %v1694_v35 = vsub.f32 1.0, %v3170_v52  ;;  %v2273_v1 = vmul.f32 %v2209_v34, %v1818_v46  ;;  %v7743_v46 = vld [vmem:[#allocation134_spill] sm:$0xff] }
 0x2f2   :  { %3177 = vpow2.f32 %v1586_v18  ;;  %v2108_v5 = vsel %vm207_vm0, %v1978_v8, 0.0  ;;  %v1500_v22 = vsel %vm207_vm0, %v1344_v10, 0.0  ;;  %v7736_v33 = vsub.f32 0.0, %v7676_v32 }
 0x2f3   :  { %v1590_v30 = vmul.f32 1.442695, %v7738_v60  ;;  %2109 = vadd.xlane.f32.xlu1 %v2108_v5  ;;  %1501 = vadd.xlane.f32.xlu0 %v1500_v22  ;;  %vm7739_vm4 = vcmp.eq.s32.totalorder %v4448_v24, %v5730_v4  ;;  %v7741_v52 = vsub.f32 %v5695_v23, %v7740_v17  ;;  %v2406_v18 = vadd.f32 %v2405_v63, %v2404_v21  ;;  %v6199_v5 = vpop.permute.xlu0 %1190  ;;  %v7744_v23 = vld [vmem:[#allocation54_spill] sm:$0xff] }
 0x2f4   :  { %v2210_v6 = vmul.f32 %v7737_v2, %v7736_v33  ;;  %v1979_v19 = vsel %vm7739_vm4, %v5794_v39, 0.0  ;;  %v7742_v32 = vsub.f32 0.0, %v7685_v29  ;;  %v1757_v10 = vmax.f32 %v1693_v55, 0.0 }
 0x2f5   :  { %v1345_v34 = vsel %vm1281_vm14, %v7741_v52, 0.0  ;;  %vm7335_vm7 = vcmp.eq.s32.totalorder %v4448_v24, %v6107_v7  ;;  %v2407_v8 = vsel %vm2393_vm3, %v2336_v58, 0.0  ;;  %v1820_v4 = vmul.f32 %v1756_v44, %v1756_v44 }
 0x2f6   :  { %v2211_v50 = vmul.f32 %v7743_v46, %v7742_v32  ;;  %3179 = vpow2.f32 %v1588_v36  ;;  %v1695_v13 = vsub.f32 1.0, %v3172_v11  ;;  %vm7745_vm4 = vcmp.ne.s32.totalorder %v7744_v23, 4294967196  ;;  %v7751_v46 = vld [vmem:[#allocation137_spill] sm:$0xff]  ;;  %v7754_v23 = vld [vmem:[#allocation55_spill] sm:$0xff] }
 0x2f7   :  { %v2337_v22 = vsel %vm7745_vm4, %v2273_v1, 0.0  ;;  %v1758_v33 = vmax.f32 %v1694_v35, 0.0  ;;  %v2111_v63 = vsel %vm207_vm0, %v1979_v19, 0.0  ;;  %v1503_v29 = vsel %vm207_vm0, %v1345_v34, 0.0  ;;  %v3174_v1 = vpop.eup %3173  ;;  %v7748_v34 = vld [vmem:[#allocation99_spill] sm:$0xff] }
 0x2f8   :  { %v2274_v21 = vmul.f32 %v2210_v6, %v1819_v42  ;;  %3181 = vpow2.f32 %v1590_v30  ;;  %2112 = vadd.xlane.f32.xlu1 %v2111_v63  ;;  %1504 = vadd.xlane.f32.xlu0 %v1503_v29  ;;  %v1980_v55 = vsel %vm1269_vm6, %v5794_v39, 0.0  ;;  %v7746_v11 = vsub.f32 %v5715_v61, %v5646_v45  ;;  %v6216_v42 = vpop.permute.xlu1 %1205  ;;  %v7747_v30 = vld [vmem:[#allocation141_spill] sm:$0xff]  ;;  %v7757_v63 = vld [vmem:[#allocation143_spill] sm:$0xff] }
 0x2f9   :  { %v1888_v44 = vsub.f32 0.0, %v7718_v51  ;;  %v2408_v36 = vadd.f32 %v2407_v8, %v2406_v18  ;;  %v2275_v35 = vmul.f32 %v2211_v50, %v1820_v4  ;;  %vm1283_vm4 = vcmp.eq.s32.totalorder %v4448_v24, %v6199_v5  ;;  %v3176_v61 = vpop.eup %3175  ;;  %v3366_v5 = vld [vmem:[%s7102_s0 + $0x1f8] sm:$0xff] }
 0x2fa   :  { %v1346_v58 = vsel %vm7335_vm7, %v7746_v11, 0.0  ;;  %v2409_v53 = vsel %vm2393_vm3, %v2337_v22, 0.0  ;;  %v1821_v2 = vmul.f32 %v1757_v10, %v1757_v10  ;;  %v1759_v6 = vmax.f32 %v1695_v13, 0.0  ;;  %v7752_v10 = vld [vmem:[#allocation33_spill] sm:$0xff] }
 0x2fb   :  { %v1592_v45 = vmul.f32 1.442695, %v7747_v30  ;;  %v1889_v19 = vsub.f32 0.0, %v7721_v37  ;;  %v1822_v17 = vmul.f32 %v1758_v33, %v1758_v33  ;;  %v2114_v51 = vsel %vm207_vm0, %v1980_v55, 0.0  ;;  %v6248_v55 = vpop.permute.xlu0 %1196 }
 0x2fc   :  { %v1506_v52 = vsel %vm207_vm0, %v1346_v58, 0.0  ;;  %vm7749_vm6 = vcmp.ne.s32.totalorder %v7748_v34, 4294967196  ;;  %v7750_v32 = vsub.f32 0.0, %v7687_v25  ;;  %v7753_v8 = vsub.f32 %v5705_v14, %v7752_v10  ;;  %2115 = vadd.xlane.f32.xlu1 %v2114_v51  ;;  %v7756_v14 = vld [vmem:[#allocation56_spill] sm:$0xff]  ;;  %v6251_v58 = vpop.permute.xlu1 %1211 }
 0x2fd   :  { %v2338_v18 = vsel %vm7749_vm6, %v2274_v21, 0.0  ;;  %1507 = vadd.xlane.f32.xlu0 %v1506_v52  ;;  %v1981_v37 = vsel %vm1270_vm8, %v5794_v39, 0.0  ;;  %v2410_v13 = vadd.f32 %v2409_v53, %v2408_v36  ;;  %vm7755_vm6 = vcmp.ne.s32.totalorder %v7754_v23, 4294967196  ;;  %v6278_v10 = vld [vmem:[%s7103_s1 + $0x160] sm:$0xff] }
 0x2fe   :  { %v2212_v50 = vmul.f32 %v7751_v46, %v7750_v32  ;;  %v1347_v4 = vsel %vm1283_vm4, %v7753_v8, 0.0  ;;  %v2339_v25 = vsel %vm7755_vm6, %v2275_v35, 0.0  ;;  %v1696_v22 = vsub.f32 1.0, %v3174_v1  ;;  %v7763_v8 = vld [vmem:[#allocation36_spill] sm:$0xff] }
 0x2ff   :  { %vm7336_vm7 = vcmp.eq.s32.totalorder %v4448_v24, %v6147_v15  ;;  %v2213_v33 = vmul.f32 %v7756_v14, %v1886_v43  ;;  %3183 = vpow2.f32 %v1592_v45  ;;  %v1594_v29 = vmul.f32 1.442695, %v7757_v63  ;;  %v3178_v1 = vpop.eup %3177 }
 0x300   :  { %v1697_v21 = vsub.f32 1.0, %v3176_v61  ;;  %v2411_v49 = vsel %vm2393_vm3, %v2338_v18, 0.0  ;;  %v1823_v11 = vmul.f32 %v1759_v6, %v1759_v6  ;;  %v2117_v36 = vsel %vm207_vm0, %v1981_v37, 0.0 }
 0x301   :  { %v1509_v35 = vsel %vm207_vm0, %v1347_v4, 0.0  ;;  %v1890_v56 = vsub.f32 0.0, %v7728_v9  ;;  %v2276_v53 = vmul.f32 %v2212_v50, %v1821_v2  ;;  %2118 = vadd.xlane.f32.xlu1 %v2117_v36  ;;  %v1982_v43 = vsel %vm1271_vm2, %v5794_v39, 0.0  ;;  %v7759_v2 = vld [vmem:[#allocation58_spill] sm:$0xff]  ;;  %v6301_v36 = vpop.permute.xlu0 %1202 }
 0x302   :  { %1510 = vadd.xlane.f32.xlu0 %v1509_v35  ;;  %v7758_v6 = vsub.f32 %v5723_v26, %v5663_v38  ;;  %v2412_v61 = vadd.f32 %v2411_v49, %v2410_v13  ;;  %v2413_v51 = vsel %vm2393_vm3, %v2339_v25, 0.0  ;;  %v1760_v52 = vmax.f32 %v1696_v22, 0.0  ;;  %v7760_v26 = vld [vmem:[#allocation142_spill] sm:$0xff]  ;;  %v7765_v22 = vld [vmem:[#allocation61_spill] sm:$0xff] }
 0x303   :  { %vm1285_vm8 = vcmp.eq.s32.totalorder %v4448_v24, %v6248_v55  ;;  %v2277_v9 = vmul.f32 %v2213_v33, %v1822_v17  ;;  %v2214_v0 = vmul.f32 %v7759_v2, %v1887_v48  ;;  %3185 = vpow2.f32 %v1594_v29  ;;  %v3180_v18 = vpop.eup %3179 }
 0x304   :  { %v1348_v45 = vsel %vm7336_vm7, %v7758_v6, 0.0  ;;  %v1761_v34 = vmax.f32 %v1697_v21, 0.0  ;;  %v2215_v38 = vmul.f32 %v7760_v26, %v1888_v44  ;;  %v1698_v32 = vsub.f32 1.0, %v3178_v1  ;;  %v7768_v6 = vld [vmem:[#allocation38_spill] sm:$0xff]  ;;  %v7773_v26 = vld [vmem:[#allocation64_spill] sm:$0xff] }
 0x305   :  { %v2120_v46 = vsel %vm207_vm0, %v1982_v43, 0.0  ;;  %v1512_v50 = vsel %vm207_vm0, %v1348_v45, 0.0  ;;  %vm7341_vm2 = vcmp.ne.s32.totalorder %v6278_v10, 4294967196  ;;  %vm7762_vm6 = vcmp.ne.s32.totalorder %v7761_v54, 4294967196  ;;  %v3182_v13 = vpop.eup %3181  ;;  %v7769_v45 = vld [vmem:[#allocation35_spill] sm:$0xff] }
 0x306   :  { %v2340_v48 = vsel %vm7762_vm6, %v2276_v53, 0.0  ;;  %v1891_v17 = vsub.f32 0.0, %v7735_v16  ;;  %v7764_v44 = vsub.f32 %v5748_v31, %v7763_v8  ;;  %2121 = vadd.xlane.f32.xlu1 %v2120_v46  ;;  %1513 = vadd.xlane.f32.xlu0 %v1512_v50  ;;  %v1983_v37 = vsel %vm1272_vm9, %v5794_v39, 0.0  ;;  %v6297_v31 = vpop.permute.xlu1 %1217  ;;  %v7766_v16 = vld [vmem:[#allocation103_spill] sm:$0xff]  ;;  %v7774_v50 = vld [vmem:[#allocation109_spill] sm:$0xff] }
 0x307   :  { %v2414_v23 = vadd.f32 %v2413_v51, %v2412_v61  ;;  %v1824_v25 = vmul.f32 %v1760_v52, %v1760_v52  ;;  %v2216_v14 = vmul.f32 %v7765_v22, %v1889_v19  ;;  %vm7337_vm6 = vcmp.eq.s32.totalorder %v4448_v24, %v6175_v40 }
 0x308   :  { %v1349_v4 = vsel %vm1285_vm8, %v7764_v44, 0.0  ;;  %vm7767_vm7 = vcmp.ne.s32.totalorder %v7766_v16, 4294967196  ;;  %v2278_v29 = vmul.f32 %v2214_v0, %v1823_v11  ;;  %v1825_v21 = vmul.f32 %v1761_v34, %v1761_v34  ;;  %v7771_v34 = vld [vmem:[#allocation106_spill] sm:$0xff]  ;;  %v7776_v44 = vld [vmem:[#allocation67_spill] sm:$0xff]  ;;  %v7780_v16 = vld [vmem:[#allocation112_spill] sm:$0xff] }
 0x309   :  { %v2341_v33 = vsel %vm7767_vm7, %v2277_v9, 0.0  ;;  %v1699_v49 = vsub.f32 1.0, %v3180_v18  ;;  %v2279_v41 = vmul.f32 %v2215_v38, %v1824_v25  ;;  %v1762_v35 = vmax.f32 %v1698_v32, 0.0 }
 0x30a   :  { %v2123_v1 = vsel %vm207_vm0, %v1983_v37, 0.0  ;;  %v1515_v53 = vsel %vm207_vm0, %v1349_v4, 0.0  ;;  %v2415_v19 = vsel %vm2393_vm3, %v2340_v48, 0.0  ;;  %v1700_v43 = vsub.f32 1.0, %v3182_v13  ;;  %v6325_v48 = vpop.permute.xlu1 %1223  ;;  %v7777_v13 = vld [vmem:[#allocation40_spill] sm:$0xff] }
 0x30b   :  { %v7770_v61 = vsub.f32 %v7768_v6, %v7769_v45  ;;  %2124 = vadd.xlane.f32.xlu1 %v2123_v1  ;;  %1516 = vadd.xlane.f32.xlu0 %v1515_v53  ;;  %v1984_v51 = vsel %vm1273_vm10, %v5794_v39, 0.0  ;;  %v2416_v52 = vadd.f32 %v2415_v19, %v2414_v23  ;;  %v1892_v9 = vsub.f32 0.0, %v7738_v60  ;;  %v7778_v23 = vld [vmem:[#allocation81_spill] sm:$0xff] }
 0x30c   :  { %v2280_v2 = vmul.f32 %v2216_v14, %v1825_v21  ;;  %vm1287_vm9 = vcmp.eq.s32.totalorder %v4448_v24, %v6301_v36  ;;  %v2417_v0 = vsel %vm2393_vm3, %v2341_v33, 0.0  ;;  %vm7772_vm7 = vcmp.ne.s32.totalorder %v7771_v34, 4294967196  ;;  %v3184_v46 = vpop.eup %3183 }
 0x30d   :  { %v1350_v11 = vsel %vm7337_vm6, %v7770_v61, 0.0  ;;  %v2342_v18 = vsel %vm7772_vm7, %v2278_v29, 0.0  ;;  %v2217_v38 = vmul.f32 %v7773_v26, %v1890_v56  ;;  %v1763_v32 = vmax.f32 %v1699_v49, 0.0  ;;  %v7782_v49 = vld [vmem:[#allocation69_spill] sm:$0xff] }
 0x30e   :  { %vm7775_vm6 = vcmp.ne.s32.totalorder %v7774_v50, 4294967196  ;;  %v1826_v54 = vmul.f32 %v1762_v35, %v1762_v35  ;;  %v2126_v60 = vsel %vm207_vm0, %v1984_v51, 0.0  ;;  %v1518_v8 = vsel %vm207_vm0, %v1350_v11, 0.0  ;;  %v6349_v35 = vpop.permute.xlu0 %1208  ;;  %v7789_v50 = vld [vmem:[#allocation115_spill] sm:$0xff] }
 0x30f   :  { %v2343_v59 = vsel %vm7775_vm6, %v2279_v41, 0.0  ;;  %v2218_v4 = vmul.f32 %v7776_v44, %v1891_v17  ;;  %v1764_v37 = vmax.f32 %v1700_v43, 0.0  ;;  %v7779_v25 = vsub.f32 %v7777_v13, %v7778_v23  ;;  %2127 = vadd.xlane.f32.xlu1 %v2126_v60  ;;  %1519 = vadd.xlane.f32.xlu0 %v1518_v8  ;;  %v7791_v23 = vld [vmem:[#allocation118_spill] sm:$0xff] }
 0x310   :  { %v1985_v22 = vsel %vm1274_vm11, %v5794_v39, 0.0  ;;  %v2860_v14 = vsel %vm7341_vm2, 1.0, %v7504_v47  ;;  %v2419_v17 = vsel %vm2393_vm3, %v2342_v18, 0.0  ;;  %vm7781_vm10 = vcmp.ne.s32.totalorder %v7780_v16, 4294967196  ;;  %v3186_v1 = vpop.eup %3185  ;;  %v7788_v18 = vld [vmem:[#allocation85_spill] sm:$0xff] }
 0x311   :  { %v1351_v56 = vsel %vm1287_vm9, %v7779_v25, 0.0  ;;  %v2344_v33 = vsel %vm7781_vm10, %v2280_v2, 0.0  ;;  %vm1288_vm6 = vcmp.eq.s32.totalorder %v4448_v24, %v6216_v42  ;;  %v2281_v29 = vmul.f32 %v2217_v38, %v1826_v54  ;;  %v7784_v2 = vld [vmem:[#allocation39_spill] sm:$0xff] }
 0x312   :  { %v1827_v21 = vmul.f32 %v1763_v32, %v1763_v32  ;;  %v2219_v41 = vmul.f32 %v7782_v49, %v1892_v9  ;;  %v1701_v12 = vsub.f32 1.0, %v3184_v46  ;;  %v2418_v53 = vadd.f32 %v2417_v0, %v2416_v52  ;;  %v7785_v9 = vld [vmem:[#allocation37_spill] sm:$0xff]  ;;  %v6367_v46 = vpop.permute.xlu1 %1229 }
 0x313   :  { %v2421_v19 = vsel %vm2393_vm3, %v2343_v59, 0.0  ;;  %v2129_v43 = vsel %vm207_vm0, %v1985_v22, 0.0  ;;  %v1521_v6 = vsel %vm207_vm0, %v1351_v56, 0.0  ;;  %v1828_v61 = vmul.f32 %v1764_v37, %v1764_v37  ;;  %v7787_v0 = vld [vmem:[#allocation9_spill] sm:$0xff]  ;;  %v7793_v56 = vld [vmem:[#allocation82_spill] sm:$0xff] }
 0x314   :  { %v2282_v45 = vmul.f32 %v2218_v4, %v1827_v21  ;;  %v1986_v51 = vsel %vm1275_vm12, %v5794_v39, 0.0  ;;  %v7786_v34 = vsub.f32 %v7784_v2, %v7785_v9  ;;  %2130 = vadd.xlane.f32.xlu1 %v2129_v43  ;;  %1522 = vadd.xlane.f32.xlu0 %v1521_v6  ;;  %v2742_v26 = vadd.f32 %v7788_v18, %v7787_v0  ;;  %v7794_v22 = vld [vmem:[#allocation41_spill] sm:$0xff]  ;;  %v7799_v2 = vld [vmem:[#allocation83_spill] sm:$0xff]  ;;  %v7800_v9 = vld [vmem:[#allocation42_spill] sm:$0xff] }
 0x315   :  { %v2420_v38 = vadd.f32 %v2419_v17, %v2418_v53  ;;  %v2423_v32 = vsel %vm2393_vm3, %v2344_v33, 0.0  ;;  %vm1289_vm11 = vcmp.eq.s32.totalorder %v4448_v24, %v6349_v35  ;;  %vm7790_vm12 = vcmp.ne.s32.totalorder %v7789_v50, 4294967196 }
 0x316   :  { %v1352_v52 = vsel %vm1288_vm6, %v7786_v34, 0.0  ;;  %v2345_v59 = vsel %vm7790_vm12, %v2281_v29, 0.0  ;;  %v2283_v54 = vmul.f32 %v2219_v41, %v1828_v61  ;;  %v1765_v60 = vmax.f32 %v1701_v12, 0.0  ;;  %v7796_v29 = vld [vmem:[#allocation7_spill] sm:$0xff]  ;;  %v2068_v12 = vpop.xlane.xlu1 %2067 }
 0x317   :  { %v1702_v8 = vsub.f32 1.0, %v3186_v1  ;;  %v2745_v44 = vsel %vm2393_vm3, %v2860_v14, 0.0  ;;  %v2422_v4 = vadd.f32 %v2421_v19, %v2420_v38  ;;  %v2132_v37 = vsel %vm207_vm0, %v1986_v51, 0.0  ;;  %v7797_v1 = vld [vmem:[#allocation121_spill] sm:$0xff]  ;;  %v6395_v19 = vpop.permute.xlu0 %1214 }
 0x318   :  { %v1524_v13 = vsel %vm207_vm0, %v1352_v52, 0.0  ;;  %vm7792_vm7 = vcmp.ne.s32.totalorder %v7791_v23, 4294967196  ;;  %v7795_v17 = vsub.f32 %v7793_v56, %v7794_v22  ;;  %2133 = vadd.xlane.f32.xlu1 %v2132_v37  ;;  %v1893_v33 = vsub.f32 0.0, %v7747_v30  ;;  %v7805_v22 = vld [vmem:[#allocation6_spill] sm:$0xff] }
 0x319   :  { %v2346_v25 = vsel %vm7792_vm7, %v2282_v45, 0.0  ;;  %1525 = vadd.xlane.f32.xlu0 %v1524_v13  ;;  %v1987_v14 = vsel %vm1276_vm13, %v5794_v39, 0.0  ;;  %v2744_v21 = vadd.f32 %v7796_v29, %v2742_v26  ;;  %v2424_v49 = vadd.f32 %v2423_v32, %v2422_v4  ;;  %v7802_v26 = vld [vmem:[#allocation8_spill] sm:$0xff] }
 0x31a   :  { %v1353_v16 = vsel %vm1289_vm11, %v7795_v17, 0.0  ;;  %v2425_v41 = vsel %vm2393_vm3, %v2345_v59, 0.0  ;;  %vm1290_vm10 = vcmp.eq.s32.totalorder %v4448_v24, %v6251_v58  ;;  %vm7798_vm12 = vcmp.ne.s32.totalorder %v7797_v1, 4294967196  ;;  %v2071_v50 = vpop.xlane.xlu1 %2070  ;;  %v7806_v17 = vld [vmem:[#allocation44_spill] sm:$0xff]  ;;  %v7810_v1 = vld [vmem:[#allocation10_spill] sm:$0xff] }
 0x31b   :  { %v2347_v53 = vsel %vm7798_vm12, %v2283_v54, 0.0  ;;  %v1829_v30 = vmul.f32 %v1765_v60, %v1765_v60  ;;  %v2220_v43 = vmul.f32 %v2068_v12, %v1893_v33  ;;  %v1766_v6 = vmax.f32 %v1702_v8, 0.0  ;;  %v7803_v54 = vld [vmem:[#allocation124_spill] sm:$0xff] }
 0x31c   :  { %v2427_v28 = vsel %vm2393_vm3, %v2346_v25, 0.0  ;;  %v2135_v45 = vsel %vm207_vm0, %v1987_v14, 0.0  ;;  %v1527_v61 = vsel %vm207_vm0, %v1353_v16, 0.0  ;;  %v1894_v11 = vsub.f32 0.0, %v7757_v63  ;;  %v6416_v63 = vld [vmem:[%s7103_s1 + $0x170] sm:$0xff]  ;;  %v6450_v12 = vld [vmem:[%s7103_s1 + $0x178] sm:$0xff] }
 0x31d   :  { %v2426_v51 = vadd.f32 %v2425_v41, %v2424_v49  ;;  %v7801_v34 = vsub.f32 %v7799_v2, %v7800_v9  ;;  %v2284_v0 = vmul.f32 %v2220_v43, %v1829_v30  ;;  %2136 = vadd.xlane.f32.xlu1 %v2135_v45  ;;  %1528 = vadd.xlane.f32.xlu0 %v1527_v61  ;;  %v1988_v18 = vsel %vm1277_vm15, %v5794_v39, 0.0  ;;  %v7808_v14 = vld [vmem:[#allocation46_spill] sm:$0xff]  ;;  %v7809_v49 = vld [vmem:[#allocation84_spill] sm:$0xff]  ;;  %v6455_v43 = vpop.permute.xlu0 %1220 }
 0x31e   :  { %v2747_v38 = vsel %vm2393_vm3, %v7802_v26, 0.0  ;;  %vm7338_vm13 = vcmp.ne.s32.totalorder %v6416_v63, 4294967196  ;;  %v2429_v32 = vsel %vm2393_vm3, %v2347_v53, 0.0  ;;  %vm1291_vm7 = vcmp.eq.s32.totalorder %v4448_v24, %v6395_v19  ;;  %v7811_v53 = vld [vmem:[#allocation43_spill] sm:$0xff]  ;;  %v7815_v26 = vld [vmem:[#allocation45_spill] sm:$0xff] }
 0x31f   :  { %v1354_v52 = vsel %vm1290_vm10, %v7801_v34, 0.0  ;;  %v2428_v59 = vadd.f32 %v2427_v28, %v2426_v51  ;;  %vm7804_vm12 = vcmp.ne.s32.totalorder %v7803_v54, 4294967196  ;;  %v1830_v60 = vmul.f32 %v1766_v6, %v1766_v6  ;;  %v7812_v28 = vld [vmem:[#allocation127_spill] sm:$0xff] }
 0x320   :  { %v2348_v57 = vsel %vm7804_vm12, %v2284_v0, 0.0  ;;  %v2221_v8 = vmul.f32 %v2071_v50, %v1894_v11  ;;  %v2746_v4 = vadd.f32 %v2745_v44, %v2744_v21  ;;  %v2138_v13 = vsel %vm207_vm0, %v1988_v18, 0.0 }
 0x321   :  { %v2431_v37 = vsel %vm2393_vm3, %v2348_v57, 0.0  ;;  %v1530_v23 = vsel %vm207_vm0, %v1354_v52, 0.0  ;;  %v2430_v25 = vadd.f32 %v2429_v32, %v2428_v59  ;;  %v1989_v56 = vsel %vm1278_vm1, %v5794_v39, 0.0  ;;  %2139 = vadd.xlane.f32.xlu1 %v2138_v13  ;;  %v7816_v32 = vld [vmem:[#allocation11_spill] sm:$0xff] }
 0x322   :  { %v7807_v16 = vsub.f32 %v7805_v22, %v7806_v17  ;;  %v2285_v44 = vmul.f32 %v2221_v8, %v1830_v60  ;;  %1531 = vadd.xlane.f32.xlu0 %v1530_v23  ;;  %v905_v29 = vmul.f32 0.6931472, %v7808_v14  ;;  %v2862_v21 = vsel %vm7338_vm13, 1.0, %v7504_v47  ;;  %v3356_v59 = vld [vmem:[%s7102_s0 + $0x1d8] sm:$0xff]  ;;  %v6488_v8 = vld [vmem:[%s7103_s1 + $0x180] sm:$0xff] }
 0x323   :  { %v1034_v41 = vsub.f32 %v3354_v3, %v7809_v49  ;;  %vm1292_vm15 = vcmp.eq.s32.totalorder %v4448_v24, %v6297_v31  ;;  %vm7339_vm1 = vcmp.ne.s32.totalorder %v6450_v12, 4294967196  ;;  %v971_v30 = vadd.f32 %v7811_v53, %v7810_v1  ;;  %v7818_v17 = vld [vmem:[#allocation12_spill] sm:$0xff]  ;;  %v6521_v3 = vld [vmem:[%s7103_s1 + $0x188] sm:$0xff]  ;;  %v7819_v53 = vld [vmem:[#allocation47_spill] sm:$0xff] }
 0x324   :  { %v1355_v33 = vsel %vm1291_vm7, %v7807_v16, 0.0  ;;  %v2432_v6 = vadd.f32 %v2431_v37, %v2430_v25  ;;  %vm7813_vm12 = vcmp.ne.s32.totalorder %v7812_v28, 4294967196  ;;  %v2748_v61 = vadd.f32 %v2747_v38, %v2746_v4  ;;  %v6494_v4 = vld [vmem:[%s7104_s2] ss:$0 sm:$0xff]  ;;  %v7817_v25 = vld [vmem:[#allocation5_spill] sm:$0xff] }
 0x325   :  { %v2349_v45 = vsel %vm7813_vm12, %v2285_v44, 0.0  ;;  %v2141_v51 = vsel %vm207_vm0, %v1989_v56, 0.0  ;;  %v1533_v2 = vsel %vm207_vm0, %v1355_v33, 0.0  ;;  %v2749_v9 = vsel %vm2393_vm3, %v2862_v21, 0.0  ;;  %v6513_v33 = vpop.permute.xlu0 %1226  ;;  %v7820_v28 = vld [vmem:[#allocation13_spill] sm:$0xff]  ;;  %v7827_v31 = vld [vmem:[#allocation68_spill] sm:$0xff] }
 0x326   :  { %v2433_v11 = vsel %vm2393_vm3, %v2349_v45, 0.0  ;;  %v1356_v34 = vsel %vm1292_vm15, %v1034_v41, 0.0  ;;  %2142 = vadd.xlane.f32.xlu1 %v2141_v51  ;;  %1534 = vadd.xlane.f32.xlu0 %v1533_v2  ;;  %vm7814_vm12 = vcmp.eq.s32.totalorder %v4448_v24, %v6042_v62  ;;  %v2863_v18 = vsel %vm7339_vm1, 1.0, %v7504_v47 }
 0x327   :  { %v6466_v52 = vadd.f32 %v2433_v11, %v2432_v6  ;;  %v1990_v0 = vsel %vm7814_vm12, %v5794_v39, 0.0  ;;  %vm1293_vm13 = vcmp.eq.s32.totalorder %v4448_v24, %v6455_v43  ;;  %v907_v38 = vmul.f32 0.6931472, %v7815_v26  ;;  %v6540_v6 = vld [vmem:[%s7103_s1 + $0x190] sm:$0xff]  ;;  %v6565_v26 = vld [vmem:[%s7103_s1 + $0x198] sm:$0xff] }
 0x328   :  { %v972_v50 = vadd.f32 %v905_v29, %v7816_v32  ;;  %v1035_v54 = vsub.f32 %v3356_v59, %v971_v30  ;;  %v2750_v57 = vadd.f32 %v2749_v9, %v2748_v61  ;;  %v2144_v62 = vsel %vm207_vm0, %v1990_v0, 0.0  ;;  %v7823_v59 = vld [vmem:[#allocation14_spill] sm:$0xff] }
 0x329   :  { %v1536_v39 = vsel %vm207_vm0, %v1356_v34, 0.0  ;;  %v2751_v60 = vsel %vm2393_vm3, %v2863_v18, 0.0  ;;  %vm7340_vm12 = vcmp.ne.s32.totalorder %v6488_v8, 4294967196  ;;  %v1991_v37 = vsel %vm1280_vm5, %v6494_v4, 0.0  ;;  %v7833_v43 = vld [vmem:[#allocation130_spill] sm:$0xff] }
 0x32a   :  { %v1357_v13 = vsel %vm1293_vm13, %v1035_v54, 0.0  ;;  %2145 = vadd.xlane.f32.xlu1 %v2144_v62  ;;  %1537 = vadd.xlane.f32.xlu0 %v1536_v39  ;;  %v2864_v23 = vsel %vm7340_vm12, 1.0, %v7504_v47  ;;  %vm1294_vm1 = vcmp.eq.s32.totalorder %v4448_v24, %v6325_v48  ;;  %v909_v56 = vmul.f32 0.6931472, %v7817_v25  ;;  %v6704_v48 = vld [vmem:[%s7103_s1 + $0x1c8] sm:$0xff] }
 0x32b   :  { %v1036_v22 = vsub.f32 %v3359_v20, %v972_v50  ;;  %v973_v16 = vadd.f32 %v907_v38, %v7818_v17  ;;  %v2752_v44 = vadd.f32 %v2751_v60, %v2750_v57  ;;  %v2147_v14 = vsel %vm207_vm0, %v1991_v37, 0.0  ;;  %v7822_v38 = vld [vmem:[#allocation62_spill] sm:$0xff]  ;;  %v6573_v57 = vpop.permute.xlu0 %1232 }
 0x32c   :  { %v1539_v29 = vsel %vm207_vm0, %v1357_v13, 0.0  ;;  %v2753_v21 = vsel %vm2393_vm3, %v2864_v23, 0.0  ;;  %vm7342_vm5 = vcmp.ne.s32.totalorder %v6521_v3, 4294967196  ;;  %v1992_v41 = vsel %vm1281_vm14, %v6494_v4, 0.0 }
 0x32d   :  { %v1358_v49 = vsel %vm1294_vm1, %v1036_v22, 0.0  ;;  %v2865_v1 = vsel %vm7342_vm5, 1.0, %v7504_v47  ;;  %vm7343_vm12 = vcmp.eq.s32.totalorder %v4448_v24, %v6513_v33  ;;  %v911_v30 = vmul.f32 0.6931472, %v7819_v53 }
 0x32e   :  { %2148 = vadd.xlane.f32.xlu1 %v2147_v14  ;;  %1540 = vadd.xlane.f32.xlu0 %v1539_v29  ;;  %vm7345_vm2 = vcmp.ne.s32.totalorder %v6540_v6, 4294967196  ;;  %v974_v45 = vadd.f32 %v909_v56, %v7820_v28  ;;  %v1037_v61 = vsub.f32 %v3362_v27, %v973_v16  ;;  %v2754_v11 = vadd.f32 %v2753_v21, %v2752_v44  ;;  %v6593_v56 = vld [vmem:[%s7103_s1 + $0x1a0] sm:$0xff]  ;;  %v6635_v27 = vld [vmem:[%s7103_s1 + $0x1b0] sm:$0xff] }
 0x32f   :  { %v2150_v51 = vsel %vm207_vm0, %v1992_v41, 0.0  ;;  %v1542_v2 = vsel %vm207_vm0, %v1358_v49, 0.0  ;;  %v2755_v9 = vsel %vm2393_vm3, %v2865_v1, 0.0  ;;  %vm7821_vm14 = vcmp.eq.s32.totalorder %v4448_v24, %v6107_v7  ;;  %v3364_v7 = vld [vmem:[%s7102_s0 + $0x1f0] sm:$0xff]  ;;  %v6615_v49 = vld [vmem:[%s7103_s1 + $0x1a8] sm:$0xff] }
 0x330   :  { %v1359_v34 = vsel %vm7343_vm12, %v1037_v61, 0.0  ;;  %v1993_v0 = vsel %vm7821_vm14, %v6494_v4, 0.0  ;;  %v2866_v18 = vsel %vm7345_vm2, 1.0, %v7504_v47  ;;  %vm1296_vm5 = vcmp.eq.s32.totalorder %v4448_v24, %v6367_v46  ;;  %v6728_v46 = vld [vmem:[%s7103_s1 + $0x1d0] sm:$0xff] }
 0x331   :  { %vm7344_vm12 = vcmp.ne.s32.totalorder %v6565_v26, 4294967196  ;;  %v1596_v32 = vmul.f32 1.442695, %v7822_v38  ;;  %v1038_v50 = vsub.f32 %v3364_v7, %v974_v45  ;;  %v975_v54 = vadd.f32 %v911_v30, %v7823_v59 }
 0x332   :  { %2151 = vadd.xlane.f32.xlu1 %v2150_v51  ;;  %1543 = vadd.xlane.f32.xlu0 %v1542_v2  ;;  %v2756_v62 = vadd.f32 %v2755_v9, %v2754_v11  ;;  %v2153_v39 = vsel %vm207_vm0, %v1993_v0, 0.0  ;;  %v1545_v60 = vsel %vm207_vm0, %v1359_v34, 0.0  ;;  %v2757_v37 = vsel %vm2393_vm3, %v2866_v18, 0.0  ;;  %v6655_v34 = vld [vmem:[%s7103_s1 + $0x1b8] sm:$0xff] }
 0x333   :  { %v1994_v13 = vsel %vm1283_vm4, %v6494_v4, 0.0  ;;  %v1360_v23 = vsel %vm1296_vm5, %v1038_v50, 0.0  ;;  %v2867_v25 = vsel %vm7344_vm12, 1.0, %v7504_v47  ;;  %vm1297_vm14 = vcmp.eq.s32.totalorder %v4448_v24, %v6573_v57  ;;  %v7826_v50 = vld [vmem:[#allocation65_spill] sm:$0xff] }
 0x334   :  { %vm195_vm4 = vcmp.ne.s32.totalorder %v6593_v56, 4294967196  ;;  %3187 = vpow2.f32 %v1596_v32  ;;  %v1039_v20 = vsub.f32 %v3366_v5, %v975_v54  ;;  %v2758_v22 = vadd.f32 %v2757_v37, %v2756_v62  ;;  %v6793_v57 = vld [vmem:[%s7103_s1 + $0x1e8] sm:$0xff] }
 0x335   :  { %v2156_v17 = vsel %vm207_vm0, %v1994_v13, 0.0  ;;  %v1548_v16 = vsel %vm207_vm0, %v1360_v23, 0.0  ;;  %v2759_v44 = vsel %vm2393_vm3, %v2867_v25, 0.0  ;;  %vm7824_vm12 = vcmp.eq.s32.totalorder %v4448_v24, %v6147_v15  ;;  %7837 = vst [vmem:[#allocation18_spill] sm:$0xff] %v6793_v57 }
 0x336   :  { %2154 = vadd.xlane.f32.xlu1 %v2153_v39  ;;  %1546 = vadd.xlane.f32.xlu0 %v1545_v60  ;;  %v1361_v14 = vsel %vm1297_vm14, %v1039_v20, 0.0  ;;  %v1995_v29 = vsel %vm7824_vm12, %v6494_v4, 0.0  ;;  %v2868_v21 = vsel %vm195_vm4, 1.0, %v7504_v47  ;;  %vm196_vm2 = vcmp.ne.s32.totalorder %v6615_v49, 4294967196  ;;  %v6676_v39 = vld [vmem:[%s7103_s1 + $0x1c0] sm:$0xff]  ;;  %v7828_v20 = vld [vmem:[#allocation70_spill] sm:$0xff] }
 0x337   :  { %v2760_v41 = vadd.f32 %v2759_v44, %v2758_v22  ;;  %v2159_v1 = vsel %vm207_vm0, %v1995_v29, 0.0  ;;  %v1551_v53 = vsel %vm207_vm0, %v1361_v14, 0.0  ;;  %v2761_v30 = vsel %vm2393_vm3, %v2868_v21, 0.0  ;;  %v7829_v44 = vld [vmem:[#allocation25_spill] sm:$0xff]  ;;  %v6696_v29 = vpop.xlane.xlu0 %1453 }
 0x338   :  { %v1999_v15 = vsel %vm1288_vm6, %v6494_v4, 0.0  ;;  %v1996_v28 = vsel %vm1285_vm8, %v6494_v4, 0.0  ;;  %v2869_v45 = vsel %vm196_vm2, 1.0, %v7504_v47  ;;  %vm197_vm12 = vcmp.ne.s32.totalorder %v6635_v27, 4294967196 }
 0x339   :  { %v2762_v42 = vadd.f32 %v2761_v30, %v2760_v41  ;;  %v2162_v61 = vsel %vm207_vm0, %v1996_v28, 0.0  ;;  %v2171_v11 = vsel %vm207_vm0, %v1999_v15, 0.0  ;;  %v2870_v55 = vsel %vm197_vm12, 1.0, %v7504_v47  ;;  %v7830_v28 = vld [vmem:[#allocation71_spill] sm:$0xff] }
 0x33a   :  { %2157 = vadd.xlane.f32.xlu1 %v2156_v17  ;;  %1549 = vadd.xlane.f32.xlu0 %v1548_v16  ;;  %v2763_v51 = vsel %vm2393_vm3, %v2869_v45, 0.0  ;;  %vm7825_vm8 = vcmp.eq.s32.totalorder %v4448_v24, %v6175_v40  ;;  %v2001_v9 = vsel %vm1290_vm10, %v6494_v4, 0.0  ;;  %vm198_vm6 = vcmp.ne.s32.totalorder %v6655_v34, 4294967196 }
 0x33b   :  { %v1997_v2 = vsel %vm7825_vm8, %v6494_v4, 0.0  ;;  %v2765_v18 = vsel %vm2393_vm3, %v2870_v55, 0.0  ;;  %v2764_v32 = vadd.f32 %v2763_v51, %v2762_v42  ;;  %v2177_v7 = vsel %vm207_vm0, %v2001_v9, 0.0 }
 0x33c   :  { %v2165_v40 = vsel %vm207_vm0, %v1997_v2, 0.0  ;;  %v2871_v58 = vsel %vm198_vm6, 1.0, %v7504_v47  ;;  %v1598_v59 = vmul.f32 1.442695, %v7826_v50  ;;  %v2003_v54 = vsel %vm1292_vm15, %v6494_v4, 0.0 }
 0x33d   :  { %v1998_v62 = vsel %vm1287_vm9, %v6494_v4, 0.0  ;;  %vm199_vm10 = vcmp.ne.s32.totalorder %v6676_v39, 4294967196  ;;  %v1600_v37 = vmul.f32 1.442695, %v7827_v31  ;;  %v2766_v23 = vadd.f32 %v2765_v18, %v2764_v32  ;;  %v7832_v18 = vld [vmem:[#allocation30_spill] sm:$0xff] }
 0x33e   :  { %2160 = vadd.xlane.f32.xlu1 %v2159_v1  ;;  %1552 = vadd.xlane.f32.xlu0 %v1551_v53  ;;  %v2872_v60 = vsel %vm199_vm10, 1.0, %v7504_v47  ;;  %v2767_v36 = vsel %vm2393_vm3, %v2871_v58, 0.0  ;;  %v2168_v25 = vsel %vm207_vm0, %v1998_v62, 0.0  ;;  %v2183_v5 = vsel %vm207_vm0, %v2003_v54, 0.0 }
 0x33f   :  { %3189 = vpow2.f32 %v1598_v59  ;;  %v1602_v22 = vmul.f32 1.442695, %v7828_v20  ;;  %v2005_v17 = vsel %vm1294_vm1, %v6494_v4, 0.0  ;;  %v2000_v16 = vsel %vm1289_vm11, %v6494_v4, 0.0 }
 0x340   :  { %v1604_v14 = vmul.f32 1.442695, %v7829_v44  ;;  %v2769_v41 = vsel %vm2393_vm3, %v2872_v60, 0.0  ;;  %vm200_vm9 = vcmp.ne.s32.totalorder %v6704_v48, 4294967196  ;;  %3191 = vpow2.f32 %v1600_v37 }
 0x341   :  { %v3188_v0 = vpop.eup %3187  ;;  %v2768_v1 = vadd.f32 %v2767_v36, %v2766_v23  ;;  %v2174_v53 = vsel %vm207_vm0, %v2000_v16, 0.0  ;;  %v2189_v30 = vsel %vm207_vm0, %v2005_v17, 0.0  ;;  %v1895_v15 = vsub.f32 0.0, %v7822_v38  ;;  %v7831_v38 = vld [vmem:[#allocation73_spill] sm:$0xff] }
 0x342   :  { %2163 = vadd.xlane.f32.xlu1 %v2162_v61  ;;  %2172 = vadd.xlane.f32.xlu0 %v2171_v11  ;;  %v1703_v13 = vsub.f32 1.0, %v3188_v0  ;;  %3193 = vpow2.f32 %v1602_v22  ;;  %v1606_v45 = vmul.f32 1.442695, %v7830_v28  ;;  %v2007_v42 = vsel %vm1296_vm5, %v6494_v4, 0.0 }
 0x343   :  { %v6698_v21 = vpop.xlane.xlu1 %1456  ;;  %v2002_v61 = vsel %vm1291_vm7, %v6494_v4, 0.0  ;;  %v2873_v11 = vsel %vm200_vm9, 1.0, %v7504_v47  ;;  %3195 = vpow2.f32 %v1604_v14  ;;  %v1608_v55 = vmul.f32 1.442695, %v7831_v38 }
 0x344   :  { %v1767_v35 = vmax.f32 %v1703_v13, 0.0  ;;  %vm201_vm11 = vcmp.ne.s32.totalorder %v6728_v46, 4294967196  ;;  %v2770_v0 = vadd.f32 %v2769_v41, %v2768_v1  ;;  %v1610_v32 = vmul.f32 1.442695, %v7832_v18  ;;  %v6749_v13 = vld [vmem:[%s7103_s1 + $0x1d8] sm:$0xff] }
 0x345   :  { %v2771_v58 = vsel %vm2393_vm3, %v2873_v11, 0.0  ;;  %3197 = vpow2.f32 %v1606_v45  ;;  %v2004_v59 = vsel %vm1293_vm13, %v6494_v4, 0.0  ;;  %v2874_v62 = vsel %vm201_vm11, 1.0, %v7504_v47 }
 0x346   :  { %2166 = vadd.xlane.f32.xlu1 %v2165_v40  ;;  %2178 = vadd.xlane.f32.xlu0 %v2177_v7  ;;  %v1831_v19 = vmul.f32 %v1767_v35, %v1767_v35  ;;  %v2180_v40 = vsel %vm207_vm0, %v2002_v61, 0.0  ;;  %v2195_v7 = vsel %vm207_vm0, %v2007_v42, 0.0  ;;  %3199 = vpow2.f32 %v1608_v55 }
 0x347   :  { %v2074_v51 = vpop.xlane.xlu1 %2073  ;;  %v6723_v2 = vpop.xlane.xlu0 %1462  ;;  %vm202_vm7 = vcmp.ne.s32.totalorder %v6749_v13, 4294967196  ;;  %vm7834_vm13 = vcmp.ne.s32.totalorder %v7833_v43, 4294967196  ;;  %v2772_v36 = vadd.f32 %v2771_v58, %v2770_v0  ;;  %3201 = vpow2.f32 %v1610_v32 }
 0x348   :  { %v2222_v9 = vmul.f32 %v2074_v51, %v1895_v15  ;;  %v2773_v22 = vsel %vm2393_vm3, %v2874_v62, 0.0  ;;  %vm7835_vm15 = vcmp.eq.s32.totalorder %v4448_v24, %v6513_v33  ;;  %v2875_v41 = vsel %vm202_vm7, 1.0, %v7504_v47  ;;  %v6773_v33 = vld [vmem:[%s7103_s1 + $0x1e0] sm:$0xff] }
 0x349   :  { %v2006_v17 = vsel %vm7835_vm15, %v6494_v4, 0.0  ;;  %vm203_vm1 = vcmp.ne.s32.totalorder %v6773_v33, 4294967196  ;;  %v1614_v45 = vmul.f32 1.442695, %v6696_v29  ;;  %v2775_v11 = vsel %vm2393_vm3, %v2875_v41, 0.0 }
 0x34a   :  { %2169 = vadd.xlane.f32.xlu1 %v2168_v25  ;;  %2184 = vadd.xlane.f32.xlu0 %v2183_v5  ;;  %v2286_v54 = vmul.f32 %v2222_v9, %v1831_v19  ;;  %v2186_v5 = vsel %vm207_vm0, %v2004_v59, 0.0  ;;  %v2192_v42 = vsel %vm207_vm0, %v2006_v17, 0.0  ;;  %v2876_v61 = vsel %vm203_vm1, 1.0, %v7504_v47  ;;  %v6803_v17 = vld [vmem:[%s7103_s1 + $0x1f0] sm:$0xff] }
 0x34b   :  { %v6742_v60 = vpop.xlane.xlu1 %1459  ;;  %v6744_v37 = vpop.xlane.xlu0 %1465  ;;  %v2008_v55 = vsel %vm1297_vm14, %v6494_v4, 0.0  ;;  %vm204_vm5 = vcmp.ne.s32.totalorder %v6793_v57, 4294967196  ;;  %7838 = vst [vmem:[#allocation74_spill] sm:$0xff] %v6803_v17 }
 0x34c   :  { %v2350_v23 = vsel %vm7834_vm13, %v2286_v54, 0.0  ;;  %v3190_v14 = vpop.eup %3189  ;;  %v2198_v59 = vsel %vm207_vm0, %v2008_v55, 0.0  ;;  %v1896_v54 = vsub.f32 0.0, %v7826_v50  ;;  %vm205_vm0 = vcmp.ne.s32.totalorder %v6803_v17, 4294967196 }
 0x34d   :  { %v2435_v25 = vsel %vm2393_vm3, %v2350_v23, 0.0  ;;  %v3192_v15 = vpop.eup %3191  ;;  %v1704_v51 = vsub.f32 1.0, %v3190_v14  ;;  %v1616_v23 = vmul.f32 1.442695, %v6698_v21  ;;  %v1897_v50 = vsub.f32 0.0, %v7827_v31 }
 0x34e   :  { %2175 = vadd.xlane.f32.xlu1 %v2174_v53  ;;  %2190 = vadd.xlane.f32.xlu0 %v2189_v30  ;;  %v6762_v16 = vadd.f32 %v2435_v25, %v6466_v52  ;;  %v7836_v53 = vld [vmem:[#allocation34_spill] sm:$0xff]  ;;  %v2774_v52 = vadd.f32 %v2773_v22, %v2772_v36  ;;  %v1899_v31 = vsub.f32 0.0, %v7829_v44  ;;  %v1900_v44 = vsub.f32 0.0, %v7830_v28 }
 0x34f   :  { %v2077_v35 = vpop.xlane.xlu1 %2076  ;;  %v6767_v1 = vpop.xlane.xlu0 %1468  ;;  %v1612_v30 = vmul.f32 1.442695, %v7836_v53  ;;  %v1768_v4 = vmax.f32 %v1704_v51, 0.0 }
 0x350   :  { %v3194_v19 = vpop.eup %3193  ;;  %v2776_v58 = vadd.f32 %v2775_v11, %v2774_v52  ;;  %v2223_v14 = vmul.f32 %v2077_v35, %v1896_v54 }
 0x351   :  { %v3196_v32 = vpop.eup %3195  ;;  %3203 = vpow2.f32 %v1612_v30  ;;  %v1706_v62 = vsub.f32 1.0, %v3194_v19  ;;  %v2878_v30 = vsel %vm205_vm0, 1.0, %v7504_v47 }
 0x352   :  { %2181 = vadd.xlane.f32.xlu1 %v2180_v40  ;;  %2196 = vadd.xlane.f32.xlu0 %v2195_v7  ;;  %v1705_v40 = vsub.f32 1.0, %v3192_v15  ;;  %v2777_v7 = vsel %vm2393_vm3, %v2876_v61, 0.0  ;;  %3205 = vpow2.f32 %v1614_v45  ;;  %v3198_v43 = vpop.eup %3197  ;;  %v2877_v15 = vsel %vm204_vm5, 1.0, %v7504_v47 }
 0x353   :  { %v2080_v9 = vpop.xlane.xlu1 %2079  ;;  %v6786_v0 = vpop.xlane.xlu0 %1471  ;;  %v2778_v52 = vadd.f32 %v2777_v7, %v2776_v58  ;;  %v1898_v45 = vsub.f32 0.0, %v7828_v20  ;;  %v1832_v61 = vmul.f32 %v1768_v4, %v1768_v4  ;;  %v1770_v55 = vmax.f32 %v1706_v62, 0.0 }
 0x354   :  { %v3200_v22 = vpop.eup %3199  ;;  %v1769_v41 = vmax.f32 %v1705_v40, 0.0  ;;  %v2224_v11 = vmul.f32 %v2080_v9, %v1897_v50  ;;  %v1708_v51 = vsub.f32 1.0, %v3198_v43  ;;  %3207 = vpow2.f32 %v1616_v23  ;;  %v6822_v9 = vld [vmem:[%s7103_s1 + $0x1f8] sm:$0xff] }
 0x355   :  { %v1709_v40 = vsub.f32 1.0, %v3200_v22  ;;  %v2287_v54 = vmul.f32 %v2223_v14, %v1832_v61  ;;  %v2779_v20 = vsel %vm2393_vm3, %v2877_v15, 0.0  ;;  %7839 = vst [vmem:[#allocation26_spill] sm:$0xff] %v6822_v9  ;;  %vm206_vm14 = vcmp.ne.s32.totalorder %v6822_v9, 4294967196  ;;  %v7840_v15 = vld [vmem:[#allocation133_spill] sm:$0xff] }
 0x356   :  { %2187 = vadd.xlane.f32.xlu1 %v2186_v5  ;;  %v1707_v5 = vsub.f32 1.0, %v3196_v32  ;;  %v1833_v24 = vmul.f32 %v1769_v41, %v1769_v41  ;;  %v1834_v62 = vmul.f32 %v1770_v55, %v1770_v55  ;;  %v1772_v23 = vmax.f32 %v1708_v51, 0.0 }
 0x357   :  { %v2083_v36 = vpop.xlane.xlu1 %2082  ;;  %v6798_v25 = vpop.xlane.xlu0 %1474  ;;  %v1773_v50 = vmax.f32 %v1709_v40, 0.0  ;;  %vm7841_vm8 = vcmp.ne.s32.totalorder %v7840_v15, 4294967196 }
 0x358   :  { %v1771_v35 = vmax.f32 %v1707_v5, 0.0  ;;  %v2225_v7 = vmul.f32 %v2083_v36, %v1898_v45  ;;  %v2288_v4 = vmul.f32 %v2224_v11, %v1833_v24  ;;  %v2781_v5 = vsel %vm2393_vm3, %v2878_v30, 0.0 }
 0x359   :  { %v1620_v36 = vmul.f32 1.442695, %v6723_v2  ;;  %v2351_v45 = vsel %vm7841_vm8, %v2287_v54, 0.0  ;;  %v2780_v24 = vadd.f32 %v2779_v20, %v2778_v52  ;;  %v2879_v11 = vsel %vm206_vm14, 1.0, %v7504_v47  ;;  %v7844_v47 = vld [vmem:[#allocation139_spill] sm:$0xff] }
 0x35a   :  { %2193 = vadd.xlane.f32.xlu1 %v2192_v42  ;;  %v3202_v42 = vpop.eup %3201  ;;  %v1835_v22 = vmul.f32 %v1771_v35, %v1771_v35  ;;  %v2289_v61 = vmul.f32 %v2225_v7, %v1834_v62  ;;  %v1901_v30 = vsub.f32 0.0, %v7831_v38  ;;  %v7842_v35 = vld [vmem:[#allocation136_spill] sm:$0xff]  ;;  %v1836_v40 = vmul.f32 %v1772_v23, %v1772_v23 }
 0x35b   :  { %v2086_v19 = vpop.xlane.xlu1 %2085  ;;  %v6815_v32 = vpop.xlane.xlu0 %1477  ;;  %v1710_v58 = vsub.f32 1.0, %v3202_v42  ;;  %vm7843_vm13 = vcmp.ne.s32.totalorder %v7842_v35, 4294967196  ;;  %v1622_v54 = vmul.f32 1.442695, %v6744_v37  ;;  %v2437_v52 = vsel %vm2393_vm3, %v2351_v45, 0.0 }
 0x35c   :  { %v2226_v43 = vmul.f32 %v2086_v19, %v1899_v31  ;;  %v2352_v31 = vsel %vm7843_vm13, %v2288_v4, 0.0  ;;  %v1837_v7 = vmul.f32 %v1773_v50, %v1773_v50  ;;  %vm7845_vm15 = vcmp.ne.s32.totalorder %v7844_v47, 4294967196 }
 0x35d   :  { %v1774_v55 = vmax.f32 %v1710_v58, 0.0  ;;  %v2353_v38 = vsel %vm7845_vm15, %v2289_v61, 0.0  ;;  %v2439_v4 = vsel %vm2393_vm3, %v2352_v31, 0.0  ;;  %v2783_v45 = vsel %vm2393_vm3, %v2879_v11, 0.0 }
 0x35e   :  { %2199 = vadd.xlane.f32.xlu1 %v2198_v59  ;;  %v1618_v59 = vmul.f32 1.442695, %v6742_v60  ;;  %v3204_v42 = vpop.eup %3203  ;;  %v2290_v19 = vmul.f32 %v2226_v43, %v1835_v22  ;;  %v7846_v22 = vld [vmem:[#allocation57_spill] sm:$0xff]  ;;  %v1624_v35 = vmul.f32 1.442695, %v6767_v1  ;;  %v2441_v61 = vsel %vm2393_vm3, %v2353_v38, 0.0 }
 0x35f   :  { %v2089_v14 = vpop.xlane.xlu1 %2088  ;;  %v6828_v41 = vpop.xlane.xlu0 %1480  ;;  %v1838_v43 = vmul.f32 %v1774_v55, %v1774_v55  ;;  %vm7847_vm8 = vcmp.ne.s32.totalorder %v7846_v22, 4294967196  ;;  %v1903_v11 = vsub.f32 0.0, %v7836_v53  ;;  %v1626_v47 = vmul.f32 1.442695, %v6786_v0 }
 0x360   :  { %3209 = vpow2.f32 %v1618_v59  ;;  %v2227_v28 = vmul.f32 %v2089_v14, %v1900_v44  ;;  %v3206_v51 = vpop.eup %3205  ;;  %v1902_v59 = vsub.f32 0.0, %v7832_v18  ;;  %v1711_v14 = vsub.f32 1.0, %v3204_v42 }
 0x361   :  { %3211 = vpow2.f32 %v1620_v36  ;;  %v1712_v23 = vsub.f32 1.0, %v3206_v51  ;;  %v2782_v18 = vadd.f32 %v2781_v5, %v2780_v24  ;;  %v2438_v36 = vadd.f32 %v2437_v52, %v6762_v16  ;;  %v3208_v55 = vpop.eup %3207  ;;  %v7848_v5 = vld [vmem:[#allocation59_spill] sm:$0xff] }
 0x362   :  { %v2291_v58 = vmul.f32 %v2227_v28, %v1836_v40  ;;  %v2354_v15 = vsel %vm7847_vm8, %v2290_v19, 0.0  ;;  %3213 = vpow2.f32 %v1622_v54  ;;  %vm7849_vm13 = vcmp.ne.s32.totalorder %v7848_v5, 4294967196  ;;  %v7850_v54 = vld [vmem:[#allocation60_spill] sm:$0xff] }
 0x363   :  { %v2092_v20 = vpop.xlane.xlu1 %2091  ;;  %v6841_v44 = vpop.xlane.xlu0 %1483  ;;  %v2440_v51 = vadd.f32 %v2439_v4, %v2438_v36  ;;  %v1775_v31 = vmax.f32 %v1711_v14, 0.0  ;;  %v2443_v19 = vsel %vm2393_vm3, %v2354_v15, 0.0  ;;  %vm7851_vm15 = vcmp.ne.s32.totalorder %v7850_v54, 4294967196  ;;  %v7852_v4 = vld [vmem:[#allocation63_spill] sm:$0xff] }
 0x364   :  { %v2228_v62 = vmul.f32 %v2092_v20, %v1901_v30  ;;  %v2784_v30 = vadd.f32 %v2783_v45, %v2782_v18  ;;  %v2355_v16 = vsel %vm7849_vm13, %v2291_v58, 0.0  ;;  %v1776_v20 = vmax.f32 %v1712_v23, 0.0 }
 0x365   :  { %v2442_v40 = vadd.f32 %v2441_v61, %v2440_v51  ;;  %3215 = vpow2.f32 %v1624_v35  ;;  %v2445_v38 = vsel %vm2393_vm3, %v2355_v16, 0.0  ;;  %vm7853_vm8 = vcmp.ne.s32.totalorder %v7852_v4, 4294967196  ;;  %v7854_v16 = vld [vmem:[#allocation66_spill] sm:$0xff] }
 0x366   :  { %v2292_v50 = vmul.f32 %v2228_v62, %v1837_v7  ;;  %2785 = vadd.xlane.f32.xlu1 %v2784_v30  ;;  %v1839_v18 = vmul.f32 %v1775_v31, %v1775_v31  ;;  %v1840_v45 = vmul.f32 %v1776_v20, %v1776_v20  ;;  %3217 = vpow2.f32 %v1626_v47 }
 0x367   :  { %v2095_v28 = vpop.xlane.xlu1 %2094  ;;  %v6852_v42 = vpop.xlane.xlu0 %1486  ;;  %v2444_v14 = vadd.f32 %v2443_v19, %v2442_v40  ;;  %v1628_v35 = vmul.f32 1.442695, %v6798_v25  ;;  %vm7855_vm13 = vcmp.ne.s32.totalorder %v7854_v16, 4294967196 }
 0x368   :  { %v2229_v24 = vmul.f32 %v2095_v28, %v1902_v59  ;;  %v2356_v52 = vsel %vm7851_vm15, %v2292_v50, 0.0  ;;  %v1713_v59 = vsub.f32 1.0, %v3208_v55 }
 0x369   :  { %v2447_v15 = vsel %vm2393_vm3, %v2356_v52, 0.0  ;;  %v2446_v23 = vadd.f32 %v2445_v38, %v2444_v14  ;;  %3219 = vpow2.f32 %v1628_v35  ;;  %v1630_v52 = vmul.f32 1.442695, %v6815_v32  ;;  %v7856_v14 = vld [vmem:[#allocation23_spill] sm:$0xff] }
 0x36a   :  { %v2293_v7 = vmul.f32 %v2229_v24, %v1838_v43  ;;  %v1904_v43 = vsub.f32 0.0, %v6696_v29  ;;  %v1777_v55 = vmax.f32 %v1713_v59, 0.0  ;;  %vm7857_vm15 = vcmp.ne.s32.totalorder %v7856_v14, 4294967196 }
 0x36b   :  { %v2098_v62 = vpop.xlane.xlu1 %2097  ;;  %v6862_v58 = vpop.xlane.xlu0 %1489  ;;  %v2448_v5 = vadd.f32 %v2447_v15, %v2446_v23  ;;  %3221 = vpow2.f32 %v1630_v52 }
 0x36c   :  { %v2357_v53 = vsel %vm7853_vm8, %v2293_v7, 0.0  ;;  %v2230_v36 = vmul.f32 %v2098_v62, %v1903_v11  ;;  %v1905_v11 = vsub.f32 0.0, %v6698_v21  ;;  %v1841_v7 = vmul.f32 %v1777_v55, %v1777_v55 }
 0x36d   :  { %v3210_v22 = vpop.eup %3209  ;;  %v2449_v61 = vsel %vm2393_vm3, %v2357_v53, 0.0  ;;  %v1906_v21 = vsub.f32 0.0, %v6742_v60  ;;  %v1907_v60 = vsub.f32 0.0, %v6723_v2  ;;  %v1908_v2 = vsub.f32 0.0, %v6744_v37 }
 0x36e   :  { %v2294_v50 = vmul.f32 %v2230_v36, %v1839_v18  ;;  %v3212_v51 = vpop.eup %3211  ;;  %v1714_v19 = vsub.f32 1.0, %v3210_v22  ;;  %v2450_v40 = vadd.f32 %v2449_v61, %v2448_v5  ;;  %v1632_v61 = vmul.f32 1.442695, %v6828_v41 }
 0x36f   :  { %v2101_v28 = vpop.xlane.xlu1 %2100  ;;  %v6870_v30 = vpop.xlane.xlu0 %1492  ;;  %v1715_v38 = vsub.f32 1.0, %v3212_v51  ;;  %v1909_v37 = vsub.f32 0.0, %v6767_v1 }
 0x370   :  { %v2358_v24 = vsel %vm7855_vm13, %v2294_v50, 0.0  ;;  %v2231_v31 = vmul.f32 %v2101_v28, %v1904_v43  ;;  %v3214_v62 = vpop.eup %3213  ;;  %v1778_v18 = vmax.f32 %v1714_v19, 0.0  ;;  %v7858_v28 = vld [vmem:[#allocation93_spill] sm:$0xff]  ;;  %v1634_v19 = vmul.f32 1.442695, %v6841_v44 }
 0x371   :  { %v2451_v29 = vsel %vm2393_vm3, %v2358_v24, 0.0  ;;  %v1779_v50 = vmax.f32 %v1715_v38, 0.0  ;;  %vm7859_vm8 = vcmp.ne.s32.totalorder %v7858_v28, 4294967196  ;;  %3223 = vpow2.f32 %v1632_v61 }
 0x372   :  { %v2295_v54 = vmul.f32 %v2231_v31, %v1840_v45  ;;  %v2452_v59 = vadd.f32 %v2451_v29, %v2450_v40  ;;  %v1716_v45 = vsub.f32 1.0, %v3214_v62  ;;  %v3216_v35 = vpop.eup %3215  ;;  %v1842_v51 = vmul.f32 %v1778_v18, %v1778_v18 }
 0x373   :  { %v2104_v20 = vpop.xlane.xlu1 %2103  ;;  %v6877_v47 = vpop.xlane.xlu0 %1495  ;;  %v1843_v38 = vmul.f32 %v1779_v50, %v1779_v50  ;;  %3225 = vpow2.f32 %v1634_v19 }
 0x374   :  { %v2359_v4 = vsel %vm7857_vm15, %v2295_v54, 0.0  ;;  %v2232_v53 = vmul.f32 %v2104_v20, %v1905_v11  ;;  %v1780_v40 = vmax.f32 %v1716_v45, 0.0  ;;  %v1717_v54 = vsub.f32 1.0, %v3216_v35  ;;  %v3218_v52 = vpop.eup %3217 }
 0x375   :  { %v2453_v36 = vsel %vm2393_vm3, %v2359_v4, 0.0  ;;  %v1718_v35 = vsub.f32 1.0, %v3218_v52  ;;  %v1910_v52 = vsub.f32 0.0, %v6786_v0 }
 0x376   :  { %v2454_v22 = vadd.f32 %v2453_v36, %v2452_v59  ;;  %v2296_v15 = vmul.f32 %v2232_v53, %v1841_v7  ;;  %v7860_v7 = vld [vmem:[#allocation87_spill] sm:$0xff]  ;;  %v1844_v18 = vmul.f32 %v1780_v40, %v1780_v40 }
 0x377   :  { %v2107_v43 = vpop.xlane.xlu1 %2106  ;;  %v6883_v23 = vpop.xlane.xlu0 %1498  ;;  %vm7861_vm13 = vcmp.ne.s32.totalorder %v7860_v7, 4294967196  ;;  %v1782_v40 = vmax.f32 %v1718_v35, 0.0 }
 0x378   :  { %v2360_v55 = vsel %vm7859_vm8, %v2296_v15, 0.0  ;;  %v2233_v5 = vmul.f32 %v2107_v43, %v1906_v21  ;;  %v1781_v21 = vmax.f32 %v1717_v54, 0.0  ;;  %v1636_v15 = vmul.f32 1.442695, %v6852_v42  ;;  %v7862_v43 = vld [vmem:[#allocation95_spill] sm:$0xff] }
 0x379   :  { %v2455_v16 = vsel %vm2393_vm3, %v2360_v55, 0.0  ;;  %vm7863_vm15 = vcmp.ne.s32.totalorder %v7862_v43, 4294967196 }
 0x37a   :  { %v2456_v24 = vadd.f32 %v2455_v16, %v2454_v22  ;;  %v2297_v31 = vmul.f32 %v2233_v5, %v1842_v51  ;;  %v3220_v22 = vpop.eup %3219  ;;  %v1845_v5 = vmul.f32 %v1781_v21, %v1781_v21  ;;  %3227 = vpow2.f32 %v1636_v15 }
 0x37c   :  { %v2110_v29 = vpop.xlane.xlu1 %2109  ;;  %v6891_v11 = vpop.xlane.xlu0 %1501  ;;  %v2361_v20 = vsel %vm7861_vm13, %v2297_v31, 0.0  ;;  %v7864_v31 = vld [vmem:[#allocation88_spill] sm:$0xff] }
 0x37d   :  { %v2234_v62 = vmul.f32 %v2110_v29, %v1907_v60  ;;  %v2457_v59 = vsel %vm2393_vm3, %v2361_v20, 0.0  ;;  %v1719_v60 = vsub.f32 1.0, %v3220_v22  ;;  %vm7865_vm8 = vcmp.ne.s32.totalorder %v7864_v31, 4294967196 }
 0x37e   :  { %v2458_v14 = vadd.f32 %v2457_v59, %v2456_v24  ;;  %v3222_v24 = vpop.eup %3221  ;;  %v7866_v59 = vld [vmem:[#allocation97_spill] sm:$0xff]  ;;  %v1911_v22 = vsub.f32 0.0, %v6798_v25 }
 0x37f   :  { %v2298_v4 = vmul.f32 %v2234_v62, %v1843_v38  ;;  %v1783_v62 = vmax.f32 %v1719_v60, 0.0  ;;  %vm7867_vm13 = vcmp.ne.s32.totalorder %v7866_v59, 4294967196  ;;  %v1912_v60 = vsub.f32 0.0, %v6815_v32 }
 0x380   :  { %v1913_v59 = vsub.f32 0.0, %v6828_v41  ;;  %v1642_v41 = vmul.f32 1.442695, %v6877_v47 }
 0x381   :  { %v2113_v53 = vpop.xlane.xlu1 %2112  ;;  %v6897_v36 = vpop.xlane.xlu0 %1504  ;;  %v2362_v45 = vsel %vm7863_vm15, %v2298_v4, 0.0 }
 0x382   :  { %v2235_v50 = vmul.f32 %v2113_v53, %v1908_v2  ;;  %v2459_v61 = vsel %vm2393_vm3, %v2362_v45, 0.0  ;;  %v1720_v53 = vsub.f32 1.0, %v3222_v24  ;;  %v1847_v45 = vmul.f32 %v1783_v62, %v1783_v62 }
 0x383   :  { %v2460_v28 = vadd.f32 %v2459_v61, %v2458_v14  ;;  %v1846_v14 = vmul.f32 %v1782_v40, %v1782_v40  ;;  %v7868_v61 = vld [vmem:[#allocation89_spill] sm:$0xff]  ;;  %v7870_v40 = vld [vmem:[#allocation98_spill] sm:$0xff] }
 0x384   :  { %v2299_v55 = vmul.f32 %v2235_v50, %v1844_v18  ;;  %v3224_v18 = vpop.eup %3223  ;;  %vm7869_vm15 = vcmp.ne.s32.totalorder %v7868_v61, 4294967196 }
 0x385   :  { %v2116_v51 = vpop.xlane.xlu1 %2115  ;;  %v3226_v35 = vpop.eup %3225 }
 0x386   :  { %v6904_v16 = vpop.xlane.xlu0 %1507  ;;  %v2363_v19 = vsel %vm7865_vm8, %v2299_v55, 0.0  ;;  %v2236_v29 = vmul.f32 %v2116_v51, %v1909_v37  ;;  %v1784_v55 = vmax.f32 %v1720_v53, 0.0  ;;  %v1721_v51 = vsub.f32 1.0, %v3224_v18 }
 0x387   :  { %v2461_v54 = vsel %vm2393_vm3, %v2363_v19, 0.0  ;;  %vm7871_vm8 = vcmp.ne.s32.totalorder %v7870_v40, 4294967196 }
 0x388   :  { %v2462_v7 = vadd.f32 %v2461_v54, %v2460_v28  ;;  %v2300_v1 = vmul.f32 %v2236_v29, %v1845_v5  ;;  %v1722_v29 = vsub.f32 1.0, %v3226_v35  ;;  %v1914_v35 = vsub.f32 0.0, %v6841_v44 }
 0x38a   :  { %v2119_v20 = vpop.xlane.xlu1 %2118  ;;  %v2364_v2 = vsel %vm7867_vm13, %v2300_v1, 0.0  ;;  %v1785_v1 = vmax.f32 %v1721_v51, 0.0  ;;  %v1646_v51 = vmul.f32 1.442695, %v6891_v11 }
 0x38b   :  { %v6910_v38 = vpop.xlane.xlu0 %1510  ;;  %v2237_v4 = vmul.f32 %v2119_v20, %v1910_v52  ;;  %v2463_v21 = vsel %vm2393_vm3, %v2364_v2, 0.0  ;;  %v1848_v52 = vmul.f32 %v1784_v55, %v1784_v55  ;;  %v3228_v20 = vpop.eup %3227  ;;  %v1638_v2 = vmul.f32 1.442695, %v6862_v58 }
 0x38c   :  { %v2464_v15 = vadd.f32 %v2463_v21, %v2462_v7  ;;  %v1786_v21 = vmax.f32 %v1722_v29, 0.0 }
 0x38d   :  { %v2301_v43 = vmul.f32 %v2237_v4, %v1846_v14  ;;  %v1640_v4 = vmul.f32 1.442695, %v6870_v30  ;;  %3229 = vpow2.f32 %v1638_v2  ;;  %v7876_v2 = vld [vmem:[#allocation91_spill] sm:$0xff] }
 0x38f   :  { %v2122_v0 = vpop.xlane.xlu1 %2121  ;;  %v6916_v50 = vpop.xlane.xlu0 %1513  ;;  %v2365_v37 = vsel %vm7869_vm15, %v2301_v43, 0.0  ;;  %v1849_v43 = vmul.f32 %v1785_v1, %v1785_v1  ;;  %3231 = vpow2.f32 %v1640_v4 }
 0x390   :  { %v2238_v28 = vmul.f32 %v2122_v0, %v1911_v22  ;;  %v2465_v5 = vsel %vm2393_vm3, %v2365_v37, 0.0  ;;  %v7872_v22 = vld [vmem:[#allocation90_spill] sm:$0xff]  ;;  %v1644_v37 = vmul.f32 1.442695, %v6883_v23  ;;  %3233 = vpow2.f32 %v1642_v41 }
 0x391   :  { %v2466_v24 = vadd.f32 %v2465_v5, %v2464_v15  ;;  %vm7873_vm13 = vcmp.ne.s32.totalorder %v7872_v22, 4294967196 }
 0x392   :  { %v2302_v31 = vmul.f32 %v2238_v28, %v1847_v45  ;;  %v1723_v45 = vsub.f32 1.0, %v3228_v20  ;;  %3235 = vpow2.f32 %v1644_v37 }
 0x393   :  { %3237 = vpow2.f32 %v1646_v51 }
 0x394   :  { %v2125_v25 = vpop.xlane.xlu1 %2124  ;;  %v6922_v19 = vpop.xlane.xlu0 %1516  ;;  %v2366_v54 = vsel %vm7871_vm8, %v2302_v31, 0.0  ;;  %v1648_v31 = vmul.f32 1.442695, %v6897_v36  ;;  %v1787_v40 = vmax.f32 %v1723_v45, 0.0  ;;  %vm7877_vm8 = vcmp.ne.s32.totalorder %v7876_v2, 4294967196 }
 0x395   :  { %v2239_v7 = vmul.f32 %v2125_v25, %v1912_v60  ;;  %v2467_v62 = vsel %vm2393_vm3, %v2366_v54, 0.0  ;;  %v1850_v60 = vmul.f32 %v1786_v21, %v1786_v21  ;;  %v7874_v25 = vld [vmem:[#allocation100_spill] sm:$0xff]  ;;  %v1915_v54 = vsub.f32 0.0, %v6852_v42 }
 0x396   :  { %v2468_v32 = vadd.f32 %v2467_v62, %v2466_v24  ;;  %vm7875_vm15 = vcmp.ne.s32.totalorder %v7874_v25, 4294967196  ;;  %3239 = vpow2.f32 %v1648_v31  ;;  %v1652_v42 = vmul.f32 1.442695, %v6910_v38 }
 0x397   :  { %v2303_v14 = vmul.f32 %v2239_v7, %v1848_v52  ;;  %v1650_v7 = vmul.f32 1.442695, %v6904_v16 }
 0x398   :  { %v2128_v53 = vpop.xlane.xlu1 %2127  ;;  %v6930_v18 = vpop.xlane.xlu0 %1519 }
 0x399   :  { %v2367_v15 = vsel %vm7873_vm13, %v2303_v14, 0.0  ;;  %v2240_v0 = vmul.f32 %v2128_v53, %v1913_v59  ;;  %v1851_v14 = vmul.f32 %v1787_v40, %v1787_v40  ;;  %3241 = vpow2.f32 %v1650_v7 }
 0x39a   :  { %v2469_v61 = vsel %vm2393_vm3, %v2367_v15, 0.0  ;;  %3243 = vpow2.f32 %v1652_v42  ;;  %v3230_v37 = vpop.eup %3229 }
 0x39b   :  { %v2470_v28 = vadd.f32 %v2469_v61, %v2468_v32  ;;  %v2304_v55 = vmul.f32 %v2240_v0, %v1849_v43  ;;  %v7878_v0 = vld [vmem:[#allocation101_spill] sm:$0xff]  ;;  %v1724_v31 = vsub.f32 1.0, %v3230_v37 }
 0x39c   :  { %vm7879_vm13 = vcmp.ne.s32.totalorder %v7878_v0, 4294967196  ;;  %v3232_v51 = vpop.eup %3231 }
 0x39d   :  { %v2131_v5 = vpop.xlane.xlu1 %2130  ;;  %v6939_v24 = vpop.xlane.xlu0 %1522  ;;  %v2368_v44 = vsel %vm7875_vm15, %v2304_v55, 0.0 }
 0x39e   :  { %v2241_v29 = vmul.f32 %v2131_v5, %v1914_v35  ;;  %v2471_v52 = vsel %vm2393_vm3, %v2368_v44, 0.0  ;;  %v1654_v35 = vmul.f32 1.442695, %v6916_v50  ;;  %v3234_v5 = vpop.eup %3233  ;;  %v1658_v44 = vmul.f32 1.442695, %v6930_v18 }
 0x39f   :  { %v2472_v1 = vadd.f32 %v2471_v52, %v2470_v28  ;;  %v3236_v25 = vpop.eup %3235  ;;  %v1660_v0 = vmul.f32 1.442695, %v6939_v24 }
 0x3a0   :  { %v2305_v20 = vmul.f32 %v2241_v29, %v1850_v60  ;;  %3245 = vpow2.f32 %v1654_v35  ;;  %v1656_v60 = vmul.f32 1.442695, %v6922_v19  ;;  %v1725_v29 = vsub.f32 1.0, %v3232_v51  ;;  %v3238_v52 = vpop.eup %3237 }
 0x3a1   :  { %v2134_v62 = vpop.xlane.xlu1 %2133  ;;  %v1727_v2 = vsub.f32 1.0, %v3236_v25 }
 0x3a2   :  { %v6947_v59 = vpop.xlane.xlu0 %1525  ;;  %v2369_v32 = vsel %vm7877_vm8, %v2305_v20, 0.0  ;;  %v2242_v4 = vmul.f32 %v2134_v62, %v1915_v54  ;;  %v1916_v20 = vsub.f32 0.0, %v6862_v58  ;;  %3247 = vpow2.f32 %v1656_v60 }
 0x3a3   :  { %v2473_v53 = vsel %vm2393_vm3, %v2369_v32, 0.0  ;;  %v3240_v7 = vpop.eup %3239  ;;  %v1788_v62 = vmax.f32 %v1724_v31, 0.0  ;;  %3249 = vpow2.f32 %v1658_v44  ;;  %v1919_v58 = vsub.f32 0.0, %v6883_v23 }
 0x3a4   :  { %v2474_v21 = vadd.f32 %v2473_v53, %v2472_v1  ;;  %v2306_v22 = vmul.f32 %v2242_v4, %v1851_v14  ;;  %v1726_v1 = vsub.f32 1.0, %v3234_v5  ;;  %v1917_v14 = vsub.f32 0.0, %v6870_v30 }
 0x3a5   :  { %v1789_v4 = vmax.f32 %v1725_v29, 0.0  ;;  %v1729_v35 = vsub.f32 1.0, %v3240_v7  ;;  %v1662_v37 = vmul.f32 1.442695, %v6947_v59  ;;  %v1921_v5 = vsub.f32 0.0, %v6897_v36 }
 0x3a6   :  { %v2137_v15 = vpop.xlane.xlu1 %2136  ;;  %v6953_v43 = vpop.xlane.xlu0 %1528  ;;  %v2370_v45 = vsel %vm7879_vm13, %v2306_v22, 0.0  ;;  %v1918_v22 = vsub.f32 0.0, %v6877_v47  ;;  %v1790_v51 = vmax.f32 %v1726_v1, 0.0  ;;  %v1852_v60 = vmul.f32 %v1788_v62, %v1788_v62 }
 0x3a7   :  { %v2475_v41 = vsel %vm2393_vm3, %v2370_v45, 0.0  ;;  %v3242_v32 = vpop.eup %3241  ;;  %v2243_v45 = vmul.f32 %v2137_v15, %v1916_v20  ;;  %v1791_v31 = vmax.f32 %v1727_v2, 0.0  ;;  %v1922_v44 = vsub.f32 0.0, %v6904_v16 }
 0x3a8   :  { %v6959_v61 = vadd.f32 %v2475_v41, %v2474_v21  ;;  %v1728_v21 = vsub.f32 1.0, %v3238_v52  ;;  %v1920_v41 = vsub.f32 0.0, %v6891_v11  ;;  %v3244_v30 = vpop.eup %3243  ;;  %v1730_v25 = vsub.f32 1.0, %v3242_v32 }
 0x3a9   :  { %v1853_v29 = vmul.f32 %v1789_v4, %v1789_v4  ;;  %3251 = vpow2.f32 %v1660_v0  ;;  %v2307_v23 = vmul.f32 %v2243_v45, %v1852_v60  ;;  %v1793_v20 = vmax.f32 %v1729_v35, 0.0  ;;  %v7880_v35 = vld [vmem:[#allocation92_spill] sm:$0xff] }
 0x3aa   :  { %v2140_v28 = vpop.xlane.xlu1 %2139  ;;  %v1792_v52 = vmax.f32 %v1728_v21, 0.0  ;;  %3253 = vpow2.f32 %v1662_v37  ;;  %v1854_v36 = vmul.f32 %v1790_v51, %v1790_v51  ;;  %v1731_v62 = vsub.f32 1.0, %v3244_v30 }
 0x3ab   :  { %v6961_v55 = vpop.xlane.xlu0 %1531  ;;  %v2244_v11 = vmul.f32 %v2140_v28, %v1917_v14  ;;  %v1855_v9 = vmul.f32 %v1791_v31, %v1791_v31  ;;  %v1794_v47 = vmax.f32 %v1730_v25, 0.0  ;;  %v1664_v0 = vmul.f32 1.442695, %v6953_v43 }
 0x3ac   :  { %v1666_v32 = vmul.f32 1.442695, %v6961_v55  ;;  %v1856_v45 = vmul.f32 %v1792_v52, %v1792_v52  ;;  %vm7881_vm15 = vcmp.ne.s32.totalorder %v7880_v35, 4294967196  ;;  %v1857_v60 = vmul.f32 %v1793_v20, %v1793_v20 }
 0x3ad   :  { %v3246_v2 = vpop.eup %3245  ;;  %v2371_v37 = vsel %vm7881_vm15, %v2307_v23, 0.0  ;;  %v2308_v51 = vmul.f32 %v2244_v11, %v1853_v29  ;;  %v1795_v31 = vmax.f32 %v1731_v62, 0.0  ;;  %v1858_v1 = vmul.f32 %v1794_v47, %v1794_v47  ;;  %v7882_v11 = vld [vmem:[#allocation94_spill] sm:$0xff] }
 0x3ae   :  { %v1732_v25 = vsub.f32 1.0, %v3246_v2  ;;  %3255 = vpow2.f32 %v1666_v32  ;;  %v1928_v57 = vsub.f32 0.0, %v6947_v59  ;;  %v2477_v17 = vsel %vm2393_vm3, %v2371_v37, 0.0 }
 0x3af   :  { %v2143_v40 = vpop.xlane.xlu1 %2142  ;;  %v6965_v54 = vpop.xlane.xlu0 %1534  ;;  %3257 = vpow2.f32 %v1664_v0  ;;  %vm7883_vm8 = vcmp.ne.s32.totalorder %v7882_v11, 4294967196  ;;  %vm7884_vm13 = vcmp.ne.s32.totalorder %v6278_v10, 4294967196  ;;  %v2478_v37 = vadd.f32 %v2477_v17, %v6959_v61 }
 0x3b0   :  { %v2245_v16 = vmul.f32 %v2143_v40, %v1918_v22  ;;  %v1927_v40 = vsub.f32 0.0, %v6939_v24  ;;  %v3248_v52 = vpop.eup %3247  ;;  %v1668_v29 = vmul.f32 1.442695, %v6965_v54  ;;  %v2372_v20 = vsel %vm7883_vm8, %v2308_v51, 0.0 }
 0x3b1   :  { %v3250_v23 = vpop.eup %3249  ;;  %v1796_v2 = vmax.f32 %v1732_v25, 0.0  ;;  %v1733_v35 = vsub.f32 1.0, %v3248_v52  ;;  %v2479_v11 = vsel %vm2393_vm3, %v2372_v20, 0.0  ;;  %v7887_v10 = vsub.f32 0.0, %v6910_v38 }
 0x3b2   :  { %v2309_v21 = vmul.f32 %v2245_v16, %v1854_v36  ;;  %vm7888_vm8 = vcmp.ne.s32.totalorder %v6416_v63, 4294967196 }
 0x3b3   :  { %v2146_v42 = vpop.xlane.xlu1 %2145  ;;  %v6969_v53 = vpop.xlane.xlu0 %1537  ;;  %v1797_v20 = vmax.f32 %v1733_v35, 0.0 }
 0x3b4   :  { %v2246_v30 = vmul.f32 %v2146_v42, %v1919_v58  ;;  %v1670_v22 = vmul.f32 1.442695, %v6969_v53  ;;  %v2373_v32 = vsel %vm7884_vm13, %v2309_v21, 0.0  ;;  %vm7889_vm13 = vcmp.ne.s32.totalorder %v6450_v12, 4294967196 }
 0x3b5   :  { %v2481_v17 = vsel %vm2393_vm3, %v2373_v32, 0.0  ;;  %v7890_v32 = vsub.f32 0.0, %v6916_v50 }
 0x3b6   :  { %v2310_v62 = vmul.f32 %v2246_v30, %v1855_v9  ;;  %3259 = vpow2.f32 %v1670_v22 }
 0x3b7   :  { %v2149_v15 = vpop.xlane.xlu1 %2148  ;;  %v6979_v7 = vpop.xlane.xlu0 %1540  ;;  %3261 = vpow2.f32 %v1668_v29 }
 0x3b8   :  { %v2247_v4 = vmul.f32 %v2149_v15, %v1920_v41  ;;  %v1672_v36 = vmul.f32 1.442695, %v6979_v7  ;;  %v1859_v15 = vmul.f32 %v1795_v31, %v1795_v31  ;;  %v2480_v31 = vadd.f32 %v2479_v11, %v2478_v37 }
 0x3ba   :  { %v2311_v16 = vmul.f32 %v2247_v4, %v1856_v45  ;;  %3263 = vpow2.f32 %v1672_v36  ;;  %v3252_v4 = vpop.eup %3251  ;;  %v2482_v36 = vadd.f32 %v2481_v17, %v2480_v31 }
 0x3bb   :  { %v2152_v28 = vpop.xlane.xlu1 %2151  ;;  %v6986_v14 = vpop.xlane.xlu0 %1543 }
 0x3bc   :  { %v2248_v41 = vmul.f32 %v2152_v28, %v1921_v5  ;;  %v1674_v47 = vmul.f32 1.442695, %v6986_v14  ;;  %v1734_v5 = vsub.f32 1.0, %v3250_v23  ;;  %v7885_v28 = vld [vmem:[#allocation96_spill] sm:$0xff]  ;;  %v3254_v45 = vpop.eup %3253  ;;  %v2375_v25 = vsel %vm7888_vm8, %v2311_v16, 0.0 }
 0x3bd   :  { %vm7886_vm15 = vcmp.ne.s32.totalorder %v7885_v28, 4294967196  ;;  %v1736_v16 = vsub.f32 1.0, %v3254_v45  ;;  %v3256_v11 = vpop.eup %3255  ;;  %vm7892_vm8 = vcmp.ne.s32.totalorder %v6521_v3, 4294967196 }
 0x3be   :  { %v2374_v30 = vsel %vm7886_vm15, %v2310_v62, 0.0  ;;  %v2312_v22 = vmul.f32 %v2248_v41, %v1857_v60  ;;  %3265 = vpow2.f32 %v1674_v47  ;;  %v1798_v62 = vmax.f32 %v1734_v5, 0.0 }
 0x3bf   :  { %v2155_v42 = vpop.xlane.xlu1 %2154  ;;  %v6995_v58 = vpop.xlane.xlu0 %1546  ;;  %v2483_v60 = vsel %vm2393_vm3, %v2374_v30, 0.0  ;;  %vm7891_vm15 = vcmp.ne.s32.totalorder %v6488_v8, 4294967196  ;;  %v1861_v5 = vmul.f32 %v1797_v20, %v1797_v20 }
 0x3c0   :  { %v2249_v0 = vmul.f32 %v2155_v42, %v1922_v44  ;;  %v1929_v44 = vsub.f32 0.0, %v6953_v43  ;;  %v1676_v61 = vmul.f32 1.442695, %v6995_v58  ;;  %v1860_v42 = vmul.f32 %v1796_v2, %v1796_v2  ;;  %v3258_v30 = vpop.eup %3257 }
 0x3c1   :  { %v2376_v41 = vsel %vm7889_vm13, %v2312_v22, 0.0  ;;  %v2484_v37 = vadd.f32 %v2483_v60, %v2482_v36  ;;  %v1931_v22 = vsub.f32 0.0, %v6965_v54  ;;  %vm7894_vm13 = vcmp.ne.s32.totalorder %v6540_v6, 4294967196 }
 0x3c2   :  { %v2313_v52 = vmul.f32 %v2249_v0, %v1858_v1  ;;  %v2485_v1 = vsel %vm2393_vm3, %v2375_v25, 0.0  ;;  %3267 = vpow2.f32 %v1676_v61  ;;  %v1735_v0 = vsub.f32 1.0, %v3252_v4 }
 0x3c3   :  { %v2158_v9 = vpop.xlane.xlu1 %2157  ;;  %v7005_v51 = vpop.xlane.xlu0 %1549  ;;  %v2487_v12 = vsel %vm2393_vm3, %v2376_v41, 0.0  ;;  %v1862_v61 = vmul.f32 %v1798_v62, %v1798_v62  ;;  %v1738_v60 = vsub.f32 1.0, %v3256_v11  ;;  %v1737_v20 = vsub.f32 1.0, %v3258_v30 }
 0x3c4   :  { %v2250_v21 = vmul.f32 %v2158_v9, %v7887_v10  ;;  %v1678_v29 = vmul.f32 1.442695, %v7005_v51  ;;  %v2377_v2 = vsel %vm7891_vm15, %v2313_v52, 0.0  ;;  %v1930_v9 = vsub.f32 0.0, %v6961_v55  ;;  %v3260_v31 = vpop.eup %3259 }
 0x3c5   :  { %v2486_v10 = vadd.f32 %v2485_v1, %v2484_v37  ;;  %v2489_v17 = vsel %vm2393_vm3, %v2377_v2, 0.0  ;;  %v1800_v55 = vmax.f32 %v1736_v16, 0.0  ;;  %v1799_v45 = vmax.f32 %v1735_v0, 0.0  ;;  %v3262_v36 = vpop.eup %3261 }
 0x3c6   :  { %v2314_v47 = vmul.f32 %v2250_v21, %v1859_v15  ;;  %3269 = vpow2.f32 %v1678_v29  ;;  %v7893_v21 = vsub.f32 0.0, %v6922_v19  ;;  %v1932_v62 = vsub.f32 0.0, %v6969_v53 }
 0x3c7   :  { %v2161_v38 = vpop.xlane.xlu1 %2160  ;;  %v7018_v23 = vpop.xlane.xlu0 %1552  ;;  %v2488_v25 = vadd.f32 %v2487_v12, %v2486_v10  ;;  %vm7895_vm15 = vcmp.ne.s32.totalorder %v6565_v26, 4294967196  ;;  %v7896_v6 = vsub.f32 0.0, %v6930_v18  ;;  %v1864_v16 = vmul.f32 %v1800_v55, %v1800_v55 }
 0x3c8   :  { %v2251_v63 = vmul.f32 %v2161_v38, %v7890_v32  ;;  %v1680_v15 = vmul.f32 1.442695, %v7018_v23  ;;  %v2378_v8 = vsel %vm7892_vm8, %v2314_v47, 0.0  ;;  %v1863_v0 = vmul.f32 %v1799_v45, %v1799_v45 }
 0x3c9   :  { %v2491_v38 = vsel %vm2393_vm3, %v2378_v8, 0.0  ;;  %v2490_v41 = vadd.f32 %v2489_v17, %v2488_v25  ;;  %v1740_v59 = vsub.f32 1.0, %v3260_v31  ;;  %v1933_v37 = vsub.f32 0.0, %v6979_v7 }
 0x3ca   :  { %v2315_v35 = vmul.f32 %v2251_v63, %v1860_v42  ;;  %3271 = vpow2.f32 %v1680_v15  ;;  %v3264_v63 = vpop.eup %3263  ;;  %v1802_v11 = vmax.f32 %v1738_v60, 0.0  ;;  %v1739_v18 = vsub.f32 1.0, %v3262_v36 }
 0x3cb   :  { %v2164_v50 = vpop.xlane.xlu1 %2163  ;;  %v2173_v28 = vpop.xlane.xlu0 %2172  ;;  %v2492_v2 = vadd.f32 %v2491_v38, %v2490_v41  ;;  %v1741_v17 = vsub.f32 1.0, %v3264_v63 }
 0x3cc   :  { %v2252_v4 = vmul.f32 %v2164_v50, %v7893_v21  ;;  %v2379_v52 = vsel %vm7894_vm13, %v2315_v35, 0.0  ;;  %v2255_v3 = vmul.f32 %v2173_v28, %v1928_v57  ;;  %v3266_v57 = vpop.eup %3265  ;;  %v1801_v50 = vmax.f32 %v1737_v20, 0.0 }
 0x3cd   :  { %v2493_v1 = vsel %vm2393_vm3, %v2379_v52, 0.0  ;;  %v1804_v21 = vmax.f32 %v1740_v59, 0.0  ;;  %v1866_v31 = vmul.f32 %v1802_v11, %v1802_v11  ;;  %v1805_v41 = vmax.f32 %v1741_v17, 0.0 }
 0x3ce   :  { %v2316_v29 = vmul.f32 %v2252_v4, %v1861_v5  ;;  %v2319_v12 = vmul.f32 %v2255_v3, %v1864_v16  ;;  %v2494_v5 = vadd.f32 %v2493_v1, %v2492_v2  ;;  %v1742_v4 = vsub.f32 1.0, %v3266_v57 }
 0x3cf   :  { %v2167_v19 = vpop.xlane.xlu1 %2166  ;;  %v2179_v42 = vpop.xlane.xlu0 %2178  ;;  %v1865_v60 = vmul.f32 %v1801_v50, %v1801_v50  ;;  %v1868_v20 = vmul.f32 %v1804_v21, %v1804_v21  ;;  %v1936_v2 = vsub.f32 0.0, %v7005_v51  ;;  %v1935_v21 = vsub.f32 0.0, %v6995_v58 }
 0x3d0   :  { %v2380_v47 = vsel %vm7895_vm15, %v2316_v29, 0.0  ;;  %v2253_v32 = vmul.f32 %v2167_v19, %v7896_v6  ;;  %v2257_v30 = vmul.f32 %v2179_v42, %v1930_v9  ;;  %v3268_v55 = vpop.eup %3267  ;;  %v2383_v56 = vsel %vm197_vm12, %v2319_v12, 0.0 }
 0x3d1   :  { %v2495_v53 = vsel %vm2393_vm3, %v2380_v47, 0.0  ;;  %v1806_v36 = vmax.f32 %v1742_v4, 0.0  ;;  %v1743_v6 = vsub.f32 1.0, %v3268_v55  ;;  %v1869_v12 = vmul.f32 %v1805_v41, %v1805_v41 }
 0x3d2   :  { %v2317_v35 = vmul.f32 %v2253_v32, %v1862_v61  ;;  %v1934_v61 = vsub.f32 0.0, %v6986_v14  ;;  %v2496_v45 = vadd.f32 %v2495_v53, %v2494_v5  ;;  %v2321_v3 = vmul.f32 %v2257_v30, %v1866_v31 }
 0x3d3   :  { %v2170_v26 = vpop.xlane.xlu1 %2169  ;;  %v2185_v15 = vpop.xlane.xlu0 %2184  ;;  %v2501_v32 = vsel %vm2393_vm3, %v2383_v56, 0.0  ;;  %v1870_v11 = vmul.f32 %v1806_v36, %v1806_v36  ;;  %v1937_v58 = vsub.f32 0.0, %v7018_v23 }
 0x3d4   :  { %v2381_v28 = vsel %vm195_vm4, %v2317_v35, 0.0  ;;  %v2254_v10 = vmul.f32 %v2170_v26, %v1927_v40  ;;  %v3270_v52 = vpop.eup %3269  ;;  %v2259_v29 = vmul.f32 %v2185_v15, %v1932_v62  ;;  %v1803_v40 = vmax.f32 %v1739_v18, 0.0 }
 0x3d5   :  { %v2497_v8 = vsel %vm2393_vm3, %v2381_v28, 0.0  ;;  %v1744_v62 = vsub.f32 1.0, %v3270_v52  ;;  %v2385_v43 = vsel %vm199_vm10, %v2321_v3, 0.0  ;;  %v1807_v18 = vmax.f32 %v1743_v6, 0.0 }
 0x3d6   :  { %v2318_v25 = vmul.f32 %v2254_v10, %v1863_v0  ;;  %v2498_v38 = vadd.f32 %v2497_v8, %v2496_v45  ;;  %v2323_v63 = vmul.f32 %v2259_v29, %v1868_v20  ;;  %v1867_v0 = vmul.f32 %v1803_v40, %v1803_v40 }
 0x3d7   :  { %v2176_v9 = vpop.xlane.xlu1 %2175  ;;  %v2191_v24 = vpop.xlane.xlu0 %2190  ;;  %v1808_v50 = vmax.f32 %v1744_v62, 0.0  ;;  %v2505_v39 = vsel %vm2393_vm3, %v2385_v43, 0.0  ;;  %v1871_v48 = vmul.f32 %v1807_v18, %v1807_v18 }
 0x3d8   :  { %v2382_v19 = vsel %vm196_vm2, %v2318_v25, 0.0  ;;  %v2256_v14 = vmul.f32 %v2176_v9, %v1929_v44  ;;  %v2261_v1 = vmul.f32 %v2191_v24, %v1934_v61  ;;  %v3272_v49 = vpop.eup %3271  ;;  %v2387_v34 = vsel %vm201_vm11, %v2323_v63, 0.0 }
 0x3d9   :  { %v2499_v42 = vsel %vm2393_vm3, %v2382_v19, 0.0  ;;  %v1745_v54 = vsub.f32 1.0, %v3272_v49  ;;  %v1872_v17 = vmul.f32 %v1808_v50, %v1808_v50  ;;  %v2509_v46 = vsel %vm2393_vm3, %v2387_v34, 0.0 }
 0x3da   :  { %v2500_v27 = vadd.f32 %v2499_v42, %v2498_v38  ;;  %v2320_v47 = vmul.f32 %v2256_v14, %v1865_v60  ;;  %v2325_v5 = vmul.f32 %v2261_v1, %v1870_v11 }
 0x3db   :  { %v2182_v16 = vpop.xlane.xlu1 %2181  ;;  %v2197_v53 = vpop.xlane.xlu0 %2196  ;;  %v1809_v31 = vmax.f32 %v1745_v54, 0.0 }
 0x3dc   :  { %v2384_v44 = vsel %vm198_vm6, %v2320_v47, 0.0  ;;  %v2502_v59 = vadd.f32 %v2501_v32, %v2500_v27  ;;  %v2258_v57 = vmul.f32 %v2182_v16, %v1931_v22  ;;  %v2263_v30 = vmul.f32 %v2197_v53, %v1936_v2 }
 0x3dd   :  { %v2503_v35 = vsel %vm2393_vm3, %v2384_v44, 0.0  ;;  %v2389_v61 = vsel %vm203_vm1, %v2325_v5, 0.0  ;;  %v1873_v33 = vmul.f32 %v1809_v31, %v1809_v31 }
 0x3de   :  { %v2504_v26 = vadd.f32 %v2503_v35, %v2502_v59  ;;  %v2322_v15 = vmul.f32 %v2258_v57, %v1867_v0  ;;  %v2327_v25 = vmul.f32 %v2263_v30, %v1872_v17  ;;  %v2513_v60 = vsel %vm2393_vm3, %v2389_v61, 0.0 }
 0x3df   :  { %v2188_v28 = vpop.xlane.xlu1 %2187 }
 0x3e0   :  { %v2386_v51 = vsel %vm200_vm9, %v2322_v15, 0.0  ;;  %v2506_v22 = vadd.f32 %v2505_v39, %v2504_v26  ;;  %v2260_v10 = vmul.f32 %v2188_v28, %v1933_v37  ;;  %v2391_v38 = vsel %vm205_vm0, %v2327_v25, 0.0 }
 0x3e1   :  { %v2507_v8 = vsel %vm2393_vm3, %v2386_v51, 0.0  ;;  %v2517_v23 = vsel %vm2393_vm3, %v2391_v38, 0.0 }
 0x3e2   :  { %v2508_v4 = vadd.f32 %v2507_v8, %v2506_v22  ;;  %v2324_v55 = vmul.f32 %v2260_v10, %v1869_v12  ;;  %v7900_v12 = vld [vmem:[#allocation17_spill] sm:$0xff] }
 0x3e3   :  { %v2194_v45 = vpop.xlane.xlu1 %2193  ;;  %vm2794_vm2 = vcmp.eq.s32.totalorder %v7900_v12, 0 }
 0x3e4   :  { %v2388_v7 = vsel %vm202_vm7, %v2324_v55, 0.0  ;;  %v2510_v37 = vadd.f32 %v2509_v46, %v2508_v4  ;;  %v2262_v52 = vmul.f32 %v2194_v45, %v1935_v21 }
 0x3e5   :  { %v2511_v56 = vsel %vm2393_vm3, %v2388_v7, 0.0 }
 0x3e6   :  { %v2512_v29 = vadd.f32 %v2511_v56, %v2510_v37  ;;  %v2326_v9 = vmul.f32 %v2262_v52, %v1871_v48 }
 0x3e7   :  { %v2200_v24 = vpop.xlane.xlu1 %2199 }
 0x3e8   :  { %v2390_v19 = vsel %vm204_vm5, %v2326_v9, 0.0  ;;  %v2514_v13 = vadd.f32 %v2513_v60, %v2512_v29  ;;  %v2264_v14 = vmul.f32 %v2200_v24, %v1937_v58 }
 0x3e9   :  { %v2515_v42 = vsel %vm2393_vm3, %v2390_v19, 0.0 }
 0x3ea   :  { %v2516_v20 = vadd.f32 %v2515_v42, %v2514_v13  ;;  %v2328_v36 = vmul.f32 %v2264_v14, %v1873_v33 }
 0x3ec   :  { %v2392_v27 = vsel %vm206_vm14, %v2328_v36, 0.0  ;;  %v2518_v47 = vadd.f32 %v2517_v23, %v2516_v20 }
 0x3ed   :  { %v2519_v62 = vsel %vm2393_vm3, %v2392_v27, 0.0  ;;  %vm2795_vm3 = vcmp.eq.s32.totalorder %v7900_v12, 1 }
 0x3ee   :  { %v2520_v6 = vadd.f32 %v2519_v62, %v2518_v47 }
 0x3ef   :  { %v2786_v32 = vpop.xlane.xlu1 %2785 }
 0x3f0   :  { %2521 = vadd.xlane.f32.xlu0 %v2520_v6  ;;  %v2787_v63 = vrot.slane %v2786_v32, 4 }
 0x3f2   :  { %v2788_v1 = vadd.f32 %v2787_v63, %v2786_v32 }
 0x3f4   :  { %v2789_v16 = vrot.slane %v2788_v1, 2 }
 0x3f6   :  { %v2790_v44 = vadd.f32 %v2789_v16, %v2788_v1 }
 0x3f8   :  { %v2791_v2 = vrot.slane %v2790_v44, 1 }
 0x3fa   :  { %v2792_v53 = vadd.f32 %v2791_v2, %v2790_v44 }
 0x479   :  { %v2522_v0 = vpop.xlane.xlu0 %2521 }
 0x47a   :  { %v2523_v49 = vrot.slane %v2522_v0, 4 }
 0x47c   :  { %v2524_v43 = vadd.f32 %v2523_v49, %v2522_v0 }
 0x47e   :  { %v2525_v59 = vrot.slane %v2524_v43, 2 }
 0x480   :  { %v2526_v57 = vadd.f32 %v2525_v59, %v2524_v43 }
 0x482   :  { %v2527_v35 = vrot.slane %v2526_v57, 1 }
 0x484   :  { %v2528_v11 = vadd.f32 %v2527_v35, %v2526_v57 }
 0x486   :  { %2880 = vpush %v2528_v11 }
 0x487   :  { %2882 = vpush %v2792_v53 }
 0x4b7   :  { %s2881_s1 = spop %2880 }
 0x4b8   :  { %v2798_v26 = vstv %s2881_s1  ;;  %s2883_s20 = spop %2882 }
 0x4b9   :  { %v2796_v15 = vstv %s2883_s20 }
 0x4ba   :  { %v2797_v50 = vsel %vm2795_vm3, %v2796_v15, 0.0 }
 0x4bb   :  { %v2799_v18 = vsel %vm2794_vm2, %v2798_v26, %v2797_v50 }
 0x4bc   :  { %2800 = vst [vmem:[#allocation2] sm:$0x1] %v2799_v18 }
 0x4bd   :  { %3389 = shalt.err (!%p3386_p4)
}
 0x4be   :  { %2810 = dma.vmem_to_hbm [thread:$0]  %s2808_s19, 16, %s7105_s3, [#allocation3]  }
 0x4bf   :  { %3398 = dma.done.wait [#allocation3], 16  }
 0x4c0   :  { %3399 = vsyncadd [#allocation3], 4294967280 }
 0x4c1   :  { %2814 = vsyncpa [#allocation3], 1 }

</bundles_post_ra>
